<compile_context>
chip_gen: v6e
topology: v6e:2x2x1
jax: 0.10.0
libtpu: 0.0.40
codegen_flags: <defaults>
</compile_context>

<pallas_src>
import numpy as np
import jax
import jax.numpy as jnp
from jax import lax
from jax.experimental import pallas as pl
from jax.experimental.pallas import tpu as pltpu

N_CLASSES = 6
N_OUT_PAD = 128   # lane-dense padded head output (sliced to 6 in the wrapper)
H = 64            # LSTM_UNITS
E = 64            # embed_size (small synthetic setting, see NOTE above)
B = 2             # batch
T = 8             # sequence length
TB = T * B

# Row layout of the two manually-DMA'd weight slabs.  Every block starts on a
# 16-row boundary so static slices of the bf16 VMEM scratch stay tile-aligned.
WL2_WIH = 0
WL2_WHH = 2 * H
WL2_B = 4 * H
WL2_ROWS = 4 * H + 16          # 272 rows x 512 lanes (bf16)

WHEAD_W1 = 0
WHEAD_W2 = 2 * H               # 128
WHEAD_WO = 4 * H               # 256
WHEAD_WOF = 6 * H              # 384
WHEAD_BL1 = 6 * H + E          # 448
WHEAD_BL2 = WHEAD_BL1 + 16     # 464
WHEAD_BO = WHEAD_BL2 + 16      # 480
WHEAD_ROWS = WHEAD_BO + 16     # 496 rows x 128 lanes (bf16)


# ----------------------------------------------------------------------------
# In-kernel bidirectional LSTM layer (traced helper, fully unrolled over time).
#   x_tm   : [T*B, D]   time-major f32 rows (row = t*B + b)
#   wih_bf : [D, 8H]    gate-interleaved input projection, bf16 (fwd|bwd lanes)
#   whh_bf : [2H, 8H]   block-diagonal, gate-interleaved recurrent weights, bf16
#   b_bf   : [1, 8H]    gate-interleaved bias (b_ih + b_hh per direction), bf16
#   prev_bf: [T*B,T*B]  time-block reversal permutation, bf16 (exact 0/1)
# Returns  [T*B, 2H] f32 time-major bidirectional output ([fwd_h(t) | bwd_h(t)]).
# ----------------------------------------------------------------------------
def _bilstm_unrolled(x_tm, wih_bf, whh_bf, b_bf, prev_bf, fwd_gate, fwd_lane):
    f32, bf16 = jnp.float32, jnp.bfloat16

    # Hoisted input projection for all rows + folded bias.  The backward
    # direction needs the time-reversed rows: build them with one tiny
    # permutation matmul (MXU) and a single lane-select instead of the old
    # slice-list + concatenate materialization.
    gboth = (jnp.dot(x_tm.astype(bf16), wih_bf, preferred_element_type=f32)
             + b_bf.astype(f32))                                      # [T*B, 8H]
    grev = jnp.dot(prev_bf, gboth.astype(bf16), preferred_element_type=f32)
    gx = jnp.where(fwd_gate, gboth, grev)                             # [T*B, 8H]

    h = jnp.zeros((B, 2 * H), f32)       # lanes 0:H fwd state, H:2H bwd state
    c = jnp.zeros((B, 2 * H), f32)
    hs = []
    for t in range(T):                   # static unroll (T is small & fixed)
        gates = (jnp.dot(h.astype(bf16), whh_bf, preferred_element_type=f32)
                 + gx[t * B:(t + 1) * B])                             # [B, 8H]
        gi = jax.nn.sigmoid(gates[:, 0 * 2 * H:1 * 2 * H])            # 128-lane slabs
        gf = jax.nn.sigmoid(gates[:, 1 * 2 * H:2 * 2 * H])
        gg = jnp.tanh(gates[:, 2 * 2 * H:3 * 2 * H])
        go = jax.nn.sigmoid(gates[:, 3 * 2 * H:4 * 2 * H])
        c = gf * c + gi * gg
        h = go * jnp.tanh(c)
        hs.append(h)                     # step s = [fwd_h(s) | bwd_h(T-1-s)]

    stepm = jnp.concatenate(hs, axis=0)                               # [T*B, 2H]
    srev = jnp.dot(prev_bf, stepm.astype(bf16), preferred_element_type=f32)
    # row s = [fwd_h(s) | bwd_h(s)]  (PyTorch bidirectional layout, time-major)
    return jnp.where(fwd_lane, stepm, srev)


# ----------------------------------------------------------------------------
# Fused kernel: bi-LSTM layer 1 -> bi-LSTM layer 2 -> head, all in VMEM.
# Layer-2 + head weights arrive via manual DMA overlapped with layer-1 compute.
# ----------------------------------------------------------------------------
def _fused_kernel(x_ref, pb2t_ref, prev_ref, pt2b_ref,
                  wih1_ref, whh1_ref, b1_ref,
                  wl2_hbm, whead_hbm,
                  out_ref,
                  wl2_vmem, whead_vmem, dma_sem):
    f32, bf16 = jnp.float32, jnp.bfloat16

    # Kick off the deferred-weight DMAs immediately; they complete behind the
    # layer-1 input projection + 8-step recurrence.
    cp_l2 = pltpu.make_async_copy(wl2_hbm, wl2_vmem, dma_sem.at[0])
    cp_hd = pltpu.make_async_copy(whead_hbm, whead_vmem, dma_sem.at[1])
    cp_l2.start()
    cp_hd.start()

    x_bm = x_ref[...]                    # [T*B, E] f32, batch-major (row = b*T+t)
    pb2t = pb2t_ref[...]                 # [T*B, T*B] bf16 permutations
    prev = prev_ref[...]
    pt2b = pt2b_ref[...]

    # Lane masks shared by both layers (hoisted once).
    gate_lane = lax.broadcasted_iota(jnp.int32, (TB, 8 * H), 1)
    fwd_gate = (gate_lane % (2 * H)) < H
    out_lane = lax.broadcasted_iota(jnp.int32, (TB, 2 * H), 1)
    fwd_lane = out_lane < H

    # Batch-major -> time-major rows via a permutation matmul (exact for 0/1).
    x_tm = jnp.dot(pb2t, x_bm.astype(bf16), preferred_element_type=f32)

    h1 = _bilstm_unrolled(x_tm, wih1_ref[...], whh1_ref[...], b1_ref[...],
                          prev, fwd_gate, fwd_lane)                   # [T*B, 2H]

    # Layer-2 LSTM weights must have landed by now.
    cp_l2.wait()
    wih2 = wl2_vmem[WL2_WIH:WL2_WIH + 2 * H, :]
    whh2 = wl2_vmem[WL2_WHH:WL2_WHH + 2 * H, :]
    b2 = wl2_vmem[WL2_B:WL2_B + 1, :]
    h2 = _bilstm_unrolled(h1, wih2, whh2, b2, prev, fwd_gate, fwd_lane)

    # Head weights.
    cp_hd.wait()
    w1 = whead_vmem[WHEAD_W1:WHEAD_W1 + 2 * H, :]
    w2 = whead_vmem[WHEAD_W2:WHEAD_W2 + 2 * H, :]
    wo = whead_vmem[WHEAD_WO:WHEAD_WO + 2 * H, :]
    wo_fold = whead_vmem[WHEAD_WOF:WHEAD_WOF + E, :]
    bl1 = whead_vmem[WHEAD_BL1:WHEAD_BL1 + 1, :]
    bl2 = whead_vmem[WHEAD_BL2:WHEAD_BL2 + 1, :]
    bo = whead_vmem[WHEAD_BO:WHEAD_BO + 1, :]

    l1 = jnp.maximum(
        jnp.dot(h1.astype(bf16), w1, preferred_element_type=f32) + bl1.astype(f32),
        0.0)
    l2 = jnp.maximum(
        jnp.dot(h2.astype(bf16), w2, preferred_element_type=f32) + bl2.astype(f32),
        0.0)
    hidden_tm = h1 + h2 + l1 + l2                                     # [T*B, 2H] f32

    # Back to batch-major rows, then head matmul.  h_embadd is folded into the
    # head: emb @ wo == x @ (wo[:H] + wo[H:]) == x_bm @ wo_fold.
    hidden_bm = jnp.dot(pt2b, hidden_tm.astype(bf16), preferred_element_type=f32)
    out = (jnp.dot(hidden_bm.astype(bf16), wo, preferred_element_type=f32)
           + jnp.dot(x_bm.astype(bf16), wo_fold, preferred_element_type=f32)
           + bo.astype(f32))                                          # [T*B, 128]
    out_ref[...] = out


# ----------------------------------------------------------------------------
# Forward wrapper: one pallas_call, no wrapper-side transposes.
# ----------------------------------------------------------------------------
def neural_net_forward(x, kp):
    b, t_len, e = x.shape
    assert (b, t_len, e) == (B, T, E)
    assert 2 * min(e, 2048) == 2 * H, "model only well-formed when 2*min(E,2048)==2H"
    x_bm = x.reshape(b * t_len, e)        # free reshape: batch-major rows (b*T + t)

    vmem = pl.BlockSpec(memory_space=pltpu.MemorySpace.VMEM)
    hbm = pl.BlockSpec(memory_space=pl.ANY)

    out_rows = pl.pallas_call(
        _fused_kernel,
        out_shape=jax.ShapeDtypeStruct((b * t_len, N_OUT_PAD), jnp.float32),
        in_specs=[vmem] * 7 + [hbm, hbm],
        out_specs=vmem,
        scratch_shapes=[
            pltpu.VMEM((WL2_ROWS, 8 * H), jnp.bfloat16),
            pltpu.VMEM((WHEAD_ROWS, 2 * H), jnp.bfloat16),
            pltpu.SemaphoreType.DMA((2,)),
        ],
    )(x_bm, kp["pb2t"], kp["prev"], kp["pt2b"],
      kp["wih1"], kp["whh1"], kp["b1"],
      kp["wl2"], kp["whead"])

    # Free reshape + tiny slice; no transpose needed (rows are batch-major).
    return out_rows.reshape(b, t_len, N_OUT_PAD)[:, :, :N_CLASSES]    # [B, T, 6]


# ----------------------------------------------------------------------------
# Parameters: PyTorch-layout init + packing into the fused kernel layout.
# ----------------------------------------------------------------------------
def init_params(key):
    k = 1.0 / jnp.sqrt(jnp.float32(H))

    def u(kk, shape):
        return jax.random.uniform(kk, shape, jnp.float32, -k, k)

    keys = iter(jax.random.split(key, 40))

    def lstm_dir(d_in):
        return {
            "wih": u(next(keys), (d_in, 4 * H)),   # transposed PyTorch weight_ih
            "whh": u(next(keys), (H, 4 * H)),      # transposed PyTorch weight_hh
            "b": u(next(keys), (1, 4 * H)) + u(next(keys), (1, 4 * H)),  # b_ih + b_hh
        }

    return {
        "lstm1_f": lstm_dir(E), "lstm1_b": lstm_dir(E),
        "lstm2_f": lstm_dir(2 * H), "lstm2_b": lstm_dir(2 * H),
        "head": {
            "w1": u(next(keys), (2 * H, 2 * H)), "b1": u(next(keys), (1, 2 * H)),
            "w2": u(next(keys), (2 * H, 2 * H)), "b2": u(next(keys), (1, 2 * H)),
            "wo": u(next(keys), (2 * H, N_CLASSES)), "bo": u(next(keys), (1, N_CLASSES)),
        },
    }


def _interleave_gate_cols(wf, wb):
    """[D, 4H] fwd + [D, 4H] bwd -> [D, 8H] with gate slabs [fwd_g | bwd_g]."""
    d = wf.shape[0]
    wf4 = wf.reshape(d, 4, H)
    wb4 = wb.reshape(d, 4, H)
    return jnp.stack([wf4, wb4], axis=2).reshape(d, 8 * H)


def pack_params(p):
    bf16 = jnp.bfloat16

    def pack_layer(pf, pb):
        wih = _interleave_gate_cols(pf["wih"], pb["wih"])                      # [D, 8H]
        top = _interleave_gate_cols(pf["whh"], jnp.zeros_like(pb["whh"]))      # fwd rows
        bot = _interleave_gate_cols(jnp.zeros_like(pf["whh"]), pb["whh"])      # bwd rows
        whh = jnp.concatenate([top, bot], axis=0)                              # [2H, 8H]
        bias = _interleave_gate_cols(pf["b"], pb["b"])                         # [1, 8H]
        return wih, whh, bias

    wih1, whh1, b1 = pack_layer(p["lstm1_f"], p["lstm1_b"])
    wih2, whh2, b2 = pack_layer(p["lstm2_f"], p["lstm2_b"])

    # Layer-2 LSTM weights packed into one HBM slab (manually DMA'd in-kernel).
    wl2 = jnp.zeros((WL2_ROWS, 8 * H), jnp.float32)
    wl2 = (wl2.at[WL2_WIH:WL2_WIH + 2 * H].set(wih2)
              .at[WL2_WHH:WL2_WHH + 2 * H].set(whh2)
              .at[WL2_B].set(b2[0]))

    hd = p["head"]
    wo_pad = jnp.zeros((2 * H, N_OUT_PAD), jnp.float32).at[:, :N_CLASSES].set(hd["wo"])
    wo_fold = jnp.zeros((E, N_OUT_PAD), jnp.float32).at[:, :N_CLASSES].set(
        hd["wo"][:H] + hd["wo"][H:2 * H])          # h_embadd folded into the head
    bo_pad = jnp.zeros((N_OUT_PAD,), jnp.float32).at[:N_CLASSES].set(hd["bo"][0])

    whead = jnp.zeros((WHEAD_ROWS, 2 * H), jnp.float32)
    whead = (whead.at[WHEAD_W1:WHEAD_W1 + 2 * H].set(hd["w1"])
                  .at[WHEAD_W2:WHEAD_W2 + 2 * H].set(hd["w2"])
                  .at[WHEAD_WO:WHEAD_WO + 2 * H].set(wo_pad)
                  .at[WHEAD_WOF:WHEAD_WOF + E].set(wo_fold)
                  .at[WHEAD_BL1].set(hd["b1"][0])
                  .at[WHEAD_BL2].set(hd["b2"][0])
                  .at[WHEAD_BO].set(bo_pad))

    # Row-permutation matrices (exact in bf16; 0/1 entries).
    pb2t = np.zeros((TB, TB), np.float32)   # batch-major -> time-major
    prev = np.zeros((TB, TB), np.float32)   # reverse time blocks (time-major space)
    for s in range(T):
        for bb in range(B):
            pb2t[s * B + bb, bb * T + s] = 1.0
            prev[s * B + bb, (T - 1 - s) * B + bb] = 1.0
    pt2b = pb2t.T                           # time-major -> batch-major

    return {
        "pb2t": jnp.asarray(pb2t, bf16),
        "prev": jnp.asarray(prev, bf16),
        "pt2b": jnp.asarray(pt2b, bf16),
        "wih1": wih1.astype(bf16), "whh1": whh1.astype(bf16), "b1": b1.astype(bf16),
        "wl2": wl2.astype(bf16), "whead": whead.astype(bf16),
    }


# ----------------------------------------------------------------------------
# Pure-JAX reference (PyTorch semantics, default f32 path) for validation.
# ----------------------------------------------------------------------------
def _lstm_dir_ref(x_tbe, wih, whh, b):
    batch = x_tbe.shape[1]

    def cell(carry, x_t):
        h, c = carry
        gates = x_t @ wih + h @ whh + b
        gi = jax.nn.sigmoid(gates[:, 0:H])
        gf = jax.nn.sigmoid(gates[:, H:2 * H])
        gg = jnp.tanh(gates[:, 2 * H:3 * H])
        go = jax.nn.sigmoid(gates[:, 3 * H:4 * H])
        c = gf * c + gi * gg
        h = go * jnp.tanh(c)
        return (h, c), h

    init = (jnp.zeros((batch, H), jnp.float32), jnp.zeros((batch, H), jnp.float32))
    _, hs = lax.scan(cell, init, x_tbe)
    return hs                                                        # [T, B, H]


def neural_net_ref(x, p):
    h_embadd = jnp.concatenate([x[:, :, :2048], x[:, :, :2048]], axis=-1)
    x_tbe = jnp.transpose(x, (1, 0, 2))

    def bidir(inp, pf, pb):
        fwd = _lstm_dir_ref(inp, pf["wih"], pf["whh"], pf["b"])
        bwd = jnp.flip(_lstm_dir_ref(jnp.flip(inp, 0), pb["wih"], pb["whh"], pb["b"]), 0)
        return jnp.concatenate([fwd, bwd], axis=-1)

    h1 = bidir(x_tbe, p["lstm1_f"], p["lstm1_b"])
    h2 = bidir(h1, p["lstm2_f"], p["lstm2_b"])
    h1b = jnp.transpose(h1, (1, 0, 2))
    h2b = jnp.transpose(h2, (1, 0, 2))
    hd = p["head"]
    l1 = jax.nn.relu(h1b @ hd["w1"] + hd["b1"])
    l2 = jax.nn.relu(h2b @ hd["w2"] + hd["b2"])
    hidden = h1b + h2b + l1 + l2 + h_embadd
    return hidden @ hd["wo"] + hd["bo"]


if __name__ == "__main__":
    key = jax.random.PRNGKey(0)
    kx, kparam = jax.random.split(key)
    x = jax.random.normal(kx, (B, T, E), jnp.float32)
    params = init_params(kparam)
    packed = pack_params(params)

    fwd = jax.jit(neural_net_forward)
    out = jax.block_until_ready(fwd(x, packed))
    assert out.shape == (B, T, N_CLASSES), out.shape
    assert bool(jnp.all(jnp.isfinite(out)))

    ref = jax.jit(neural_net_ref)(x, params)
    max_err = float(jnp.max(jnp.abs(out - ref)))
    # Tolerance accounts for explicit bf16 MXU operands through two stacked
    # bi-LSTM layers + head, compared against a default-precision f32 reference.
    assert max_err < 2e-2, f"kernel/reference mismatch: max |err| = {max_err}"

    print("KERNEL_OK")
</pallas_src>

<mosaic_0001>
module attributes {stable_mosaic.version = 11 : i64} {
  func.func @_fused_kernel(%arg0: memref<16x64xf32, #tpu.memory_space<vmem>>, %arg1: memref<16x16xbf16, #tpu.memory_space<vmem>>, %arg2: memref<16x16xbf16, #tpu.memory_space<vmem>>, %arg3: memref<16x16xbf16, #tpu.memory_space<vmem>>, %arg4: memref<64x512xbf16, #tpu.memory_space<vmem>>, %arg5: memref<128x512xbf16, #tpu.memory_space<vmem>>, %arg6: memref<1x512xbf16, #tpu.memory_space<vmem>>, %arg7: memref<272x512xbf16, #tpu.memory_space<any>>, %arg8: memref<496x128xbf16, #tpu.memory_space<any>>, %arg9: memref<16x128xf32, #tpu.memory_space<vmem>>, %arg10: memref<272x512xbf16, #tpu.memory_space<vmem>>, %arg11: memref<496x128xbf16, #tpu.memory_space<vmem>>, %arg12: memref<2x!tpu.dma_semaphore, #tpu.memory_space<semaphore_mem>>) attributes {dimension_semantics = [], scalar_prefetch = 0 : i64, scratch_operands = 3 : i64, tpu.core_type = #tpu.core_type<tc>} {
    %c0_i32 = arith.constant 0 : i32
    %0 = tpu.memref_slice %arg12[%c0_i32] : memref<2x!tpu.dma_semaphore, #tpu.memory_space<semaphore_mem>> -> memref<1x!tpu.dma_semaphore, #tpu.memory_space<semaphore_mem>>
    %1 = tpu.memref_squeeze %0 : memref<1x!tpu.dma_semaphore, #tpu.memory_space<semaphore_mem>> -> memref<!tpu.dma_semaphore, #tpu.memory_space<semaphore_mem>>
    tpu.enqueue_dma source(%arg7 : memref<272x512xbf16, #tpu.memory_space<any>>) target(%arg10 : memref<272x512xbf16, #tpu.memory_space<vmem>>) target_semaphore(%1 : memref<!tpu.dma_semaphore, #tpu.memory_space<semaphore_mem>>)
    %c1_i32 = arith.constant 1 : i32
    %2 = tpu.memref_slice %arg12[%c1_i32] : memref<2x!tpu.dma_semaphore, #tpu.memory_space<semaphore_mem>> -> memref<1x!tpu.dma_semaphore, #tpu.memory_space<semaphore_mem>>
    %3 = tpu.memref_squeeze %2 : memref<1x!tpu.dma_semaphore, #tpu.memory_space<semaphore_mem>> -> memref<!tpu.dma_semaphore, #tpu.memory_space<semaphore_mem>>
    tpu.enqueue_dma source(%arg8 : memref<496x128xbf16, #tpu.memory_space<any>>) target(%arg11 : memref<496x128xbf16, #tpu.memory_space<vmem>>) target_semaphore(%3 : memref<!tpu.dma_semaphore, #tpu.memory_space<semaphore_mem>>)
    %c0 = arith.constant 0 : index
    %c0_0 = arith.constant 0 : index
    %4 = vector.load %arg0[%c0, %c0_0] : memref<16x64xf32, #tpu.memory_space<vmem>>, vector<16x64xf32>
    %c0_1 = arith.constant 0 : index
    %c0_2 = arith.constant 0 : index
    %5 = vector.load %arg1[%c0_1, %c0_2] : memref<16x16xbf16, #tpu.memory_space<vmem>>, vector<16x16xbf16>
    %c0_3 = arith.constant 0 : index
    %c0_4 = arith.constant 0 : index
    %6 = vector.load %arg2[%c0_3, %c0_4] : memref<16x16xbf16, #tpu.memory_space<vmem>>, vector<16x16xbf16>
    %c0_5 = arith.constant 0 : index
    %c0_6 = arith.constant 0 : index
    %7 = vector.load %arg3[%c0_5, %c0_6] : memref<16x16xbf16, #tpu.memory_space<vmem>>, vector<16x16xbf16>
    %8 = tpu.iota {dimensions = array<i32: 1>} : vector<16x512xi32>
    %c128_i32 = arith.constant 128 : i32
    %c0_i32_7 = arith.constant 0 : i32
    %9 = arith.cmpi eq, %c128_i32, %c0_i32_7 : i32
    %c1_i32_8 = arith.constant 1 : i32
    %10 = arith.select %9, %c1_i32_8, %c128_i32 : i32
    %11 = vector.broadcast %10 : i32 to vector<16x512xi32>
    %12 = arith.remsi %8, %11 : vector<16x512xi32>
    %c0_i32_9 = arith.constant 0 : i32
    %13 = vector.broadcast %c0_i32_9 : i32 to vector<16x512xi32>
    %14 = arith.cmpi ne, %12, %13 : vector<16x512xi32>
    %c0_i32_10 = arith.constant 0 : i32
    %15 = vector.broadcast %c0_i32_10 : i32 to vector<16x512xi32>
    %16 = arith.cmpi slt, %12, %15 : vector<16x512xi32>
    %c0_i32_11 = arith.constant 0 : i32
    %17 = arith.cmpi slt, %10, %c0_i32_11 : i32
    %18 = vector.broadcast %17 : i1 to vector<16x512xi1>
    %19 = vector.broadcast %18 : vector<16x512xi1> to vector<16x512xi1>
    %20 = arith.xori %16, %19 : vector<16x512xi1>
    %21 = arith.andi %20, %14 : vector<16x512xi1>
    %22 = vector.broadcast %10 : i32 to vector<16x512xi32>
    %23 = arith.addi %12, %22 : vector<16x512xi32>
    %24 = arith.select %21, %23, %12 : vector<16x512xi1>, vector<16x512xi32>
    %c64_i32 = arith.constant 64 : i32
    %25 = vector.broadcast %c64_i32 : i32 to vector<16x512xi32>
    %26 = arith.cmpi slt, %24, %25 : vector<16x512xi32>
    %27 = tpu.iota {dimensions = array<i32: 1>} : vector<16x128xi32>
    %c64_i32_12 = arith.constant 64 : i32
    %28 = vector.broadcast %c64_i32_12 : i32 to vector<16x128xi32>
    %29 = arith.cmpi slt, %27, %28 : vector<16x128xi32>
    %30 = arith.truncf %4 : vector<16x64xf32> to vector<16x64xbf16>
    %cst = arith.constant dense<0.000000e+00> : vector<16x64xf32>
    %31 = tpu.matmul %5, %30, %cst {dimension_numbers = #tpu.dot_dimension_numbers<[1], [0], [0], [1], [0, 0, 1, 1], [], []>} : vector<16x16xbf16>, vector<16x64xbf16>, vector<16x64xf32> -> vector<16x64xf32>
    %c0_13 = arith.constant 0 : index
    %c0_14 = arith.constant 0 : index
    %32 = vector.load %arg4[%c0_13, %c0_14] : memref<64x512xbf16, #tpu.memory_space<vmem>>, vector<64x512xbf16>
    %c0_15 = arith.constant 0 : index
    %c0_16 = arith.constant 0 : index
    %33 = vector.load %arg5[%c0_15, %c0_16] : memref<128x512xbf16, #tpu.memory_space<vmem>>, vector<128x512xbf16>
    %c0_17 = arith.constant 0 : index
    %c0_18 = arith.constant 0 : index
    %34 = vector.load %arg6[%c0_17, %c0_18] : memref<1x512xbf16, #tpu.memory_space<vmem>>, vector<1x512xbf16>
    %35 = arith.truncf %31 : vector<16x64xf32> to vector<16x64xbf16>
    %cst_19 = arith.constant dense<0.000000e+00> : vector<16x512xf32>
    %36 = tpu.matmul %35, %32, %cst_19 {dimension_numbers = #tpu.dot_dimension_numbers<[1], [0], [0], [1], [0, 0, 1, 1], [], []>} : vector<16x64xbf16>, vector<64x512xbf16>, vector<16x512xf32> -> vector<16x512xf32>
    %37 = arith.extf %34 : vector<1x512xbf16> to vector<1x512xf32>
    %38 = vector.broadcast %37 : vector<1x512xf32> to vector<16x512xf32>
    %39 = arith.addf %36, %38 : vector<16x512xf32>
    %40 = arith.truncf %39 : vector<16x512xf32> to vector<16x512xbf16>
    %cst_20 = arith.constant dense<0.000000e+00> : vector<16x512xf32>
    %41 = tpu.matmul %6, %40, %cst_20 {dimension_numbers = #tpu.dot_dimension_numbers<[1], [0], [0], [1], [0, 0, 1, 1], [], []>} : vector<16x16xbf16>, vector<16x512xbf16>, vector<16x512xf32> -> vector<16x512xf32>
    %42 = arith.select %26, %39, %41 : vector<16x512xi1>, vector<16x512xf32>
    %cst_21 = arith.constant 0.000000e+00 : f32
    %43 = vector.broadcast %cst_21 : f32 to vector<2x128xf32>
    %cst_22 = arith.constant 0.000000e+00 : f32
    %44 = vector.broadcast %cst_22 : f32 to vector<2x128xf32>
    %45 = arith.truncf %43 : vector<2x128xf32> to vector<2x128xbf16>
    %cst_23 = arith.constant dense<0.000000e+00> : vector<2x512xf32>
    %46 = tpu.matmul %45, %33, %cst_23 {dimension_numbers = #tpu.dot_dimension_numbers<[1], [0], [0], [1], [0, 0, 1, 1], [], []>} : vector<2x128xbf16>, vector<128x512xbf16>, vector<2x512xf32> -> vector<2x512xf32>
    %47 = vector.extract_strided_slice %42 {offsets = [0, 0], sizes = [2, 512], strides = [1, 1]} : vector<16x512xf32> to vector<2x512xf32>
    %48 = arith.addf %46, %47 : vector<2x512xf32>
    %49 = vector.extract_strided_slice %48 {offsets = [0, 0], sizes = [2, 128], strides = [1, 1]} : vector<2x512xf32> to vector<2x128xf32>
    %50 = arith.negf %49 : vector<2x128xf32>
    %51 = math.exp %50 : vector<2x128xf32>
    %cst_24 = arith.constant 1.000000e+00 : f32
    %52 = vector.broadcast %cst_24 : f32 to vector<2x128xf32>
    %53 = arith.addf %52, %51 : vector<2x128xf32>
    %54 = arith.divf %52, %53 : vector<2x128xf32>
    %55 = vector.extract_strided_slice %48 {offsets = [0, 128], sizes = [2, 128], strides = [1, 1]} : vector<2x512xf32> to vector<2x128xf32>
    %56 = arith.negf %55 : vector<2x128xf32>
    %57 = math.exp %56 : vector<2x128xf32>
    %cst_25 = arith.constant 1.000000e+00 : f32
    %58 = vector.broadcast %cst_25 : f32 to vector<2x128xf32>
    %59 = arith.addf %58, %57 : vector<2x128xf32>
    %60 = arith.divf %58, %59 : vector<2x128xf32>
    %61 = vector.extract_strided_slice %48 {offsets = [0, 256], sizes = [2, 128], strides = [1, 1]} : vector<2x512xf32> to vector<2x128xf32>
    %62 = math.tanh %61 : vector<2x128xf32>
    %63 = vector.extract_strided_slice %48 {offsets = [0, 384], sizes = [2, 128], strides = [1, 1]} : vector<2x512xf32> to vector<2x128xf32>
    %64 = arith.negf %63 : vector<2x128xf32>
    %65 = math.exp %64 : vector<2x128xf32>
    %cst_26 = arith.constant 1.000000e+00 : f32
    %66 = vector.broadcast %cst_26 : f32 to vector<2x128xf32>
    %67 = arith.addf %66, %65 : vector<2x128xf32>
    %68 = arith.divf %66, %67 : vector<2x128xf32>
    %69 = arith.mulf %60, %44 : vector<2x128xf32>
    %70 = arith.mulf %54, %62 : vector<2x128xf32>
    %71 = arith.addf %69, %70 : vector<2x128xf32>
    %72 = math.tanh %71 : vector<2x128xf32>
    %73 = arith.mulf %68, %72 : vector<2x128xf32>
    %74 = arith.truncf %73 : vector<2x128xf32> to vector<2x128xbf16>
    %cst_27 = arith.constant dense<0.000000e+00> : vector<2x512xf32>
    %75 = tpu.matmul %74, %33, %cst_27 {dimension_numbers = #tpu.dot_dimension_numbers<[1], [0], [0], [1], [0, 0, 1, 1], [], []>} : vector<2x128xbf16>, vector<128x512xbf16>, vector<2x512xf32> -> vector<2x512xf32>
    %76 = vector.extract_strided_slice %42 {offsets = [2, 0], sizes = [2, 512], strides = [1, 1]} : vector<16x512xf32> to vector<2x512xf32>
    %77 = arith.addf %75, %76 : vector<2x512xf32>
    %78 = vector.extract_strided_slice %77 {offsets = [0, 0], sizes = [2, 128], strides = [1, 1]} : vector<2x512xf32> to vector<2x128xf32>
    %79 = arith.negf %78 : vector<2x128xf32>
    %80 = math.exp %79 : vector<2x128xf32>
    %cst_28 = arith.constant 1.000000e+00 : f32
    %81 = vector.broadcast %cst_28 : f32 to vector<2x128xf32>
    %82 = arith.addf %81, %80 : vector<2x128xf32>
    %83 = arith.divf %81, %82 : vector<2x128xf32>
    %84 = vector.extract_strided_slice %77 {offsets = [0, 128], sizes = [2, 128], strides = [1, 1]} : vector<2x512xf32> to vector<2x128xf32>
    %85 = arith.negf %84 : vector<2x128xf32>
    %86 = math.exp %85 : vector<2x128xf32>
    %cst_29 = arith.constant 1.000000e+00 : f32
    %87 = vector.broadcast %cst_29 : f32 to vector<2x128xf32>
    %88 = arith.addf %87, %86 : vector<2x128xf32>
    %89 = arith.divf %87, %88 : vector<2x128xf32>
    %90 = vector.extract_strided_slice %77 {offsets = [0, 256], sizes = [2, 128], strides = [1, 1]} : vector<2x512xf32> to vector<2x128xf32>
    %91 = math.tanh %90 : vector<2x128xf32>
    %92 = vector.extract_strided_slice %77 {offsets = [0, 384], sizes = [2, 128], strides = [1, 1]} : vector<2x512xf32> to vector<2x128xf32>
    %93 = arith.negf %92 : vector<2x128xf32>
    %94 = math.exp %93 : vector<2x128xf32>
    %cst_30 = arith.constant 1.000000e+00 : f32
    %95 = vector.broadcast %cst_30 : f32 to vector<2x128xf32>
    %96 = arith.addf %95, %94 : vector<2x128xf32>
    %97 = arith.divf %95, %96 : vector<2x128xf32>
    %98 = arith.mulf %89, %71 : vector<2x128xf32>
    %99 = arith.mulf %83, %91 : vector<2x128xf32>
    %100 = arith.addf %98, %99 : vector<2x128xf32>
    %101 = math.tanh %100 : vector<2x128xf32>
    %102 = arith.mulf %97, %101 : vector<2x128xf32>
    %103 = arith.truncf %102 : vector<2x128xf32> to vector<2x128xbf16>
    %cst_31 = arith.constant dense<0.000000e+00> : vector<2x512xf32>
    %104 = tpu.matmul %103, %33, %cst_31 {dimension_numbers = #tpu.dot_dimension_numbers<[1], [0], [0], [1], [0, 0, 1, 1], [], []>} : vector<2x128xbf16>, vector<128x512xbf16>, vector<2x512xf32> -> vector<2x512xf32>
    %105 = vector.extract_strided_slice %42 {offsets = [4, 0], sizes = [2, 512], strides = [1, 1]} : vector<16x512xf32> to vector<2x512xf32>
    %106 = arith.addf %104, %105 : vector<2x512xf32>
    %107 = vector.extract_strided_slice %106 {offsets = [0, 0], sizes = [2, 128], strides = [1, 1]} : vector<2x512xf32> to vector<2x128xf32>
    %108 = arith.negf %107 : vector<2x128xf32>
    %109 = math.exp %108 : vector<2x128xf32>
    %cst_32 = arith.constant 1.000000e+00 : f32
    %110 = vector.broadcast %cst_32 : f32 to vector<2x128xf32>
    %111 = arith.addf %110, %109 : vector<2x128xf32>
    %112 = arith.divf %110, %111 : vector<2x128xf32>
    %113 = vector.extract_strided_slice %106 {offsets = [0, 128], sizes = [2, 128], strides = [1, 1]} : vector<2x512xf32> to vector<2x128xf32>
    %114 = arith.negf %113 : vector<2x128xf32>
    %115 = math.exp %114 : vector<2x128xf32>
    %cst_33 = arith.constant 1.000000e+00 : f32
    %116 = vector.broadcast %cst_33 : f32 to vector<2x128xf32>
    %117 = arith.addf %116, %115 : vector<2x128xf32>
    %118 = arith.divf %116, %117 : vector<2x128xf32>
    %119 = vector.extract_strided_slice %106 {offsets = [0, 256], sizes = [2, 128], strides = [1, 1]} : vector<2x512xf32> to vector<2x128xf32>
    %120 = math.tanh %119 : vector<2x128xf32>
    %121 = vector.extract_strided_slice %106 {offsets = [0, 384], sizes = [2, 128], strides = [1, 1]} : vector<2x512xf32> to vector<2x128xf32>
    %122 = arith.negf %121 : vector<2x128xf32>
    %123 = math.exp %122 : vector<2x128xf32>
    %cst_34 = arith.constant 1.000000e+00 : f32
    %124 = vector.broadcast %cst_34 : f32 to vector<2x128xf32>
    %125 = arith.addf %124, %123 : vector<2x128xf32>
    %126 = arith.divf %124, %125 : vector<2x128xf32>
    %127 = arith.mulf %118, %100 : vector<2x128xf32>
    %128 = arith.mulf %112, %120 : vector<2x128xf32>
    %129 = arith.addf %127, %128 : vector<2x128xf32>
    %130 = math.tanh %129 : vector<2x128xf32>
    %131 = arith.mulf %126, %130 : vector<2x128xf32>
    %132 = arith.truncf %131 : vector<2x128xf32> to vector<2x128xbf16>
    %cst_35 = arith.constant dense<0.000000e+00> : vector<2x512xf32>
    %133 = tpu.matmul %132, %33, %cst_35 {dimension_numbers = #tpu.dot_dimension_numbers<[1], [0], [0], [1], [0, 0, 1, 1], [], []>} : vector<2x128xbf16>, vector<128x512xbf16>, vector<2x512xf32> -> vector<2x512xf32>
    %134 = vector.extract_strided_slice %42 {offsets = [6, 0], sizes = [2, 512], strides = [1, 1]} : vector<16x512xf32> to vector<2x512xf32>
    %135 = arith.addf %133, %134 : vector<2x512xf32>
    %136 = vector.extract_strided_slice %135 {offsets = [0, 0], sizes = [2, 128], strides = [1, 1]} : vector<2x512xf32> to vector<2x128xf32>
    %137 = arith.negf %136 : vector<2x128xf32>
    %138 = math.exp %137 : vector<2x128xf32>
    %cst_36 = arith.constant 1.000000e+00 : f32
    %139 = vector.broadcast %cst_36 : f32 to vector<2x128xf32>
    %140 = arith.addf %139, %138 : vector<2x128xf32>
    %141 = arith.divf %139, %140 : vector<2x128xf32>
    %142 = vector.extract_strided_slice %135 {offsets = [0, 128], sizes = [2, 128], strides = [1, 1]} : vector<2x512xf32> to vector<2x128xf32>
    %143 = arith.negf %142 : vector<2x128xf32>
    %144 = math.exp %143 : vector<2x128xf32>
    %cst_37 = arith.constant 1.000000e+00 : f32
    %145 = vector.broadcast %cst_37 : f32 to vector<2x128xf32>
    %146 = arith.addf %145, %144 : vector<2x128xf32>
    %147 = arith.divf %145, %146 : vector<2x128xf32>
    %148 = vector.extract_strided_slice %135 {offsets = [0, 256], sizes = [2, 128], strides = [1, 1]} : vector<2x512xf32> to vector<2x128xf32>
    %149 = math.tanh %148 : vector<2x128xf32>
    %150 = vector.extract_strided_slice %135 {offsets = [0, 384], sizes = [2, 128], strides = [1, 1]} : vector<2x512xf32> to vector<2x128xf32>
    %151 = arith.negf %150 : vector<2x128xf32>
    %152 = math.exp %151 : vector<2x128xf32>
    %cst_38 = arith.constant 1.000000e+00 : f32
    %153 = vector.broadcast %cst_38 : f32 to vector<2x128xf32>
    %154 = arith.addf %153, %152 : vector<2x128xf32>
    %155 = arith.divf %153, %154 : vector<2x128xf32>
    %156 = arith.mulf %147, %129 : vector<2x128xf32>
    %157 = arith.mulf %141, %149 : vector<2x128xf32>
    %158 = arith.addf %156, %157 : vector<2x128xf32>
    %159 = math.tanh %158 : vector<2x128xf32>
    %160 = arith.mulf %155, %159 : vector<2x128xf32>
    %161 = arith.truncf %160 : vector<2x128xf32> to vector<2x128xbf16>
    %cst_39 = arith.constant dense<0.000000e+00> : vector<2x512xf32>
    %162 = tpu.matmul %161, %33, %cst_39 {dimension_numbers = #tpu.dot_dimension_numbers<[1], [0], [0], [1], [0, 0, 1, 1], [], []>} : vector<2x128xbf16>, vector<128x512xbf16>, vector<2x512xf32> -> vector<2x512xf32>
    %163 = vector.extract_strided_slice %42 {offsets = [8, 0], sizes = [2, 512], strides = [1, 1]} : vector<16x512xf32> to vector<2x512xf32>
    %164 = arith.addf %162, %163 : vector<2x512xf32>
    %165 = vector.extract_strided_slice %164 {offsets = [0, 0], sizes = [2, 128], strides = [1, 1]} : vector<2x512xf32> to vector<2x128xf32>
    %166 = arith.negf %165 : vector<2x128xf32>
    %167 = math.exp %166 : vector<2x128xf32>
    %cst_40 = arith.constant 1.000000e+00 : f32
    %168 = vector.broadcast %cst_40 : f32 to vector<2x128xf32>
    %169 = arith.addf %168, %167 : vector<2x128xf32>
    %170 = arith.divf %168, %169 : vector<2x128xf32>
    %171 = vector.extract_strided_slice %164 {offsets = [0, 128], sizes = [2, 128], strides = [1, 1]} : vector<2x512xf32> to vector<2x128xf32>
    %172 = arith.negf %171 : vector<2x128xf32>
    %173 = math.exp %172 : vector<2x128xf32>
    %cst_41 = arith.constant 1.000000e+00 : f32
    %174 = vector.broadcast %cst_41 : f32 to vector<2x128xf32>
    %175 = arith.addf %174, %173 : vector<2x128xf32>
    %176 = arith.divf %174, %175 : vector<2x128xf32>
    %177 = vector.extract_strided_slice %164 {offsets = [0, 256], sizes = [2, 128], strides = [1, 1]} : vector<2x512xf32> to vector<2x128xf32>
    %178 = math.tanh %177 : vector<2x128xf32>
    %179 = vector.extract_strided_slice %164 {offsets = [0, 384], sizes = [2, 128], strides = [1, 1]} : vector<2x512xf32> to vector<2x128xf32>
    %180 = arith.negf %179 : vector<2x128xf32>
    %181 = math.exp %180 : vector<2x128xf32>
    %cst_42 = arith.constant 1.000000e+00 : f32
    %182 = vector.broadcast %cst_42 : f32 to vector<2x128xf32>
    %183 = arith.addf %182, %181 : vector<2x128xf32>
    %184 = arith.divf %182, %183 : vector<2x128xf32>
    %185 = arith.mulf %176, %158 : vector<2x128xf32>
    %186 = arith.mulf %170, %178 : vector<2x128xf32>
    %187 = arith.addf %185, %186 : vector<2x128xf32>
    %188 = math.tanh %187 : vector<2x128xf32>
    %189 = arith.mulf %184, %188 : vector<2x128xf32>
    %190 = arith.truncf %189 : vector<2x128xf32> to vector<2x128xbf16>
    %cst_43 = arith.constant dense<0.000000e+00> : vector<2x512xf32>
    %191 = tpu.matmul %190, %33, %cst_43 {dimension_numbers = #tpu.dot_dimension_numbers<[1], [0], [0], [1], [0, 0, 1, 1], [], []>} : vector<2x128xbf16>, vector<128x512xbf16>, vector<2x512xf32> -> vector<2x512xf32>
    %192 = vector.extract_strided_slice %42 {offsets = [10, 0], sizes = [2, 512], strides = [1, 1]} : vector<16x512xf32> to vector<2x512xf32>
    %193 = arith.addf %191, %192 : vector<2x512xf32>
    %194 = vector.extract_strided_slice %193 {offsets = [0, 0], sizes = [2, 128], strides = [1, 1]} : vector<2x512xf32> to vector<2x128xf32>
    %195 = arith.negf %194 : vector<2x128xf32>
    %196 = math.exp %195 : vector<2x128xf32>
    %cst_44 = arith.constant 1.000000e+00 : f32
    %197 = vector.broadcast %cst_44 : f32 to vector<2x128xf32>
    %198 = arith.addf %197, %196 : vector<2x128xf32>
    %199 = arith.divf %197, %198 : vector<2x128xf32>
    %200 = vector.extract_strided_slice %193 {offsets = [0, 128], sizes = [2, 128], strides = [1, 1]} : vector<2x512xf32> to vector<2x128xf32>
    %201 = arith.negf %200 : vector<2x128xf32>
    %202 = math.exp %201 : vector<2x128xf32>
    %cst_45 = arith.constant 1.000000e+00 : f32
    %203 = vector.broadcast %cst_45 : f32 to vector<2x128xf32>
    %204 = arith.addf %203, %202 : vector<2x128xf32>
    %205 = arith.divf %203, %204 : vector<2x128xf32>
    %206 = vector.extract_strided_slice %193 {offsets = [0, 256], sizes = [2, 128], strides = [1, 1]} : vector<2x512xf32> to vector<2x128xf32>
    %207 = math.tanh %206 : vector<2x128xf32>
    %208 = vector.extract_strided_slice %193 {offsets = [0, 384], sizes = [2, 128], strides = [1, 1]} : vector<2x512xf32> to vector<2x128xf32>
    %209 = arith.negf %208 : vector<2x128xf32>
    %210 = math.exp %209 : vector<2x128xf32>
    %cst_46 = arith.constant 1.000000e+00 : f32
    %211 = vector.broadcast %cst_46 : f32 to vector<2x128xf32>
    %212 = arith.addf %211, %210 : vector<2x128xf32>
    %213 = arith.divf %211, %212 : vector<2x128xf32>
    %214 = arith.mulf %205, %187 : vector<2x128xf32>
    %215 = arith.mulf %199, %207 : vector<2x128xf32>
    %216 = arith.addf %214, %215 : vector<2x128xf32>
    %217 = math.tanh %216 : vector<2x128xf32>
    %218 = arith.mulf %213, %217 : vector<2x128xf32>
    %219 = arith.truncf %218 : vector<2x128xf32> to vector<2x128xbf16>
    %cst_47 = arith.constant dense<0.000000e+00> : vector<2x512xf32>
    %220 = tpu.matmul %219, %33, %cst_47 {dimension_numbers = #tpu.dot_dimension_numbers<[1], [0], [0], [1], [0, 0, 1, 1], [], []>} : vector<2x128xbf16>, vector<128x512xbf16>, vector<2x512xf32> -> vector<2x512xf32>
    %221 = vector.extract_strided_slice %42 {offsets = [12, 0], sizes = [2, 512], strides = [1, 1]} : vector<16x512xf32> to vector<2x512xf32>
    %222 = arith.addf %220, %221 : vector<2x512xf32>
    %223 = vector.extract_strided_slice %222 {offsets = [0, 0], sizes = [2, 128], strides = [1, 1]} : vector<2x512xf32> to vector<2x128xf32>
    %224 = arith.negf %223 : vector<2x128xf32>
    %225 = math.exp %224 : vector<2x128xf32>
    %cst_48 = arith.constant 1.000000e+00 : f32
    %226 = vector.broadcast %cst_48 : f32 to vector<2x128xf32>
    %227 = arith.addf %226, %225 : vector<2x128xf32>
    %228 = arith.divf %226, %227 : vector<2x128xf32>
    %229 = vector.extract_strided_slice %222 {offsets = [0, 128], sizes = [2, 128], strides = [1, 1]} : vector<2x512xf32> to vector<2x128xf32>
    %230 = arith.negf %229 : vector<2x128xf32>
    %231 = math.exp %230 : vector<2x128xf32>
    %cst_49 = arith.constant 1.000000e+00 : f32
    %232 = vector.broadcast %cst_49 : f32 to vector<2x128xf32>
    %233 = arith.addf %232, %231 : vector<2x128xf32>
    %234 = arith.divf %232, %233 : vector<2x128xf32>
    %235 = vector.extract_strided_slice %222 {offsets = [0, 256], sizes = [2, 128], strides = [1, 1]} : vector<2x512xf32> to vector<2x128xf32>
    %236 = math.tanh %235 : vector<2x128xf32>
    %237 = vector.extract_strided_slice %222 {offsets = [0, 384], sizes = [2, 128], strides = [1, 1]} : vector<2x512xf32> to vector<2x128xf32>
    %238 = arith.negf %237 : vector<2x128xf32>
    %239 = math.exp %238 : vector<2x128xf32>
    %cst_50 = arith.constant 1.000000e+00 : f32
    %240 = vector.broadcast %cst_50 : f32 to vector<2x128xf32>
    %241 = arith.addf %240, %239 : vector<2x128xf32>
    %242 = arith.divf %240, %241 : vector<2x128xf32>
    %243 = arith.mulf %234, %216 : vector<2x128xf32>
    %244 = arith.mulf %228, %236 : vector<2x128xf32>
    %245 = arith.addf %243, %244 : vector<2x128xf32>
    %246 = math.tanh %245 : vector<2x128xf32>
    %247 = arith.mulf %242, %246 : vector<2x128xf32>
    %248 = arith.truncf %247 : vector<2x128xf32> to vector<2x128xbf16>
    %cst_51 = arith.constant dense<0.000000e+00> : vector<2x512xf32>
    %249 = tpu.matmul %248, %33, %cst_51 {dimension_numbers = #tpu.dot_dimension_numbers<[1], [0], [0], [1], [0, 0, 1, 1], [], []>} : vector<2x128xbf16>, vector<128x512xbf16>, vector<2x512xf32> -> vector<2x512xf32>
    %250 = vector.extract_strided_slice %42 {offsets = [14, 0], sizes = [2, 512], strides = [1, 1]} : vector<16x512xf32> to vector<2x512xf32>
    %251 = arith.addf %249, %250 : vector<2x512xf32>
    %252 = vector.extract_strided_slice %251 {offsets = [0, 0], sizes = [2, 128], strides = [1, 1]} : vector<2x512xf32> to vector<2x128xf32>
    %253 = arith.negf %252 : vector<2x128xf32>
    %254 = math.exp %253 : vector<2x128xf32>
    %cst_52 = arith.constant 1.000000e+00 : f32
    %255 = vector.broadcast %cst_52 : f32 to vector<2x128xf32>
    %256 = arith.addf %255, %254 : vector<2x128xf32>
    %257 = arith.divf %255, %256 : vector<2x128xf32>
    %258 = vector.extract_strided_slice %251 {offsets = [0, 128], sizes = [2, 128], strides = [1, 1]} : vector<2x512xf32> to vector<2x128xf32>
    %259 = arith.negf %258 : vector<2x128xf32>
    %260 = math.exp %259 : vector<2x128xf32>
    %cst_53 = arith.constant 1.000000e+00 : f32
    %261 = vector.broadcast %cst_53 : f32 to vector<2x128xf32>
    %262 = arith.addf %261, %260 : vector<2x128xf32>
    %263 = arith.divf %261, %262 : vector<2x128xf32>
    %264 = vector.extract_strided_slice %251 {offsets = [0, 256], sizes = [2, 128], strides = [1, 1]} : vector<2x512xf32> to vector<2x128xf32>
    %265 = math.tanh %264 : vector<2x128xf32>
    %266 = vector.extract_strided_slice %251 {offsets = [0, 384], sizes = [2, 128], strides = [1, 1]} : vector<2x512xf32> to vector<2x128xf32>
    %267 = arith.negf %266 : vector<2x128xf32>
    %268 = math.exp %267 : vector<2x128xf32>
    %cst_54 = arith.constant 1.000000e+00 : f32
    %269 = vector.broadcast %cst_54 : f32 to vector<2x128xf32>
    %270 = arith.addf %269, %268 : vector<2x128xf32>
    %271 = arith.divf %269, %270 : vector<2x128xf32>
    %272 = arith.mulf %263, %245 : vector<2x128xf32>
    %273 = arith.mulf %257, %265 : vector<2x128xf32>
    %274 = arith.addf %272, %273 : vector<2x128xf32>
    %275 = math.tanh %274 : vector<2x128xf32>
    %276 = arith.mulf %271, %275 : vector<2x128xf32>
    %277 = tpu.concatenate %73, %102, %131, %160, %189, %218, %247, %276 in 0 : vector<2x128xf32>, vector<2x128xf32>, vector<2x128xf32>, vector<2x128xf32>, vector<2x128xf32>, vector<2x128xf32>, vector<2x128xf32>, vector<2x128xf32> -> vector<16x128xf32>
    %278 = arith.truncf %277 : vector<16x128xf32> to vector<16x128xbf16>
    %cst_55 = arith.constant dense<0.000000e+00> : vector<16x128xf32>
    %279 = tpu.matmul %6, %278, %cst_55 {dimension_numbers = #tpu.dot_dimension_numbers<[1], [0], [0], [1], [0, 0, 1, 1], [], []>} : vector<16x16xbf16>, vector<16x128xbf16>, vector<16x128xf32> -> vector<16x128xf32>
    %280 = arith.select %29, %277, %279 : vector<16x128xi1>, vector<16x128xf32>
    %c0_i32_56 = arith.constant 0 : i32
    %281 = tpu.memref_slice %arg12[%c0_i32_56] : memref<2x!tpu.dma_semaphore, #tpu.memory_space<semaphore_mem>> -> memref<1x!tpu.dma_semaphore, #tpu.memory_space<semaphore_mem>>
    %282 = tpu.memref_squeeze %281 : memref<1x!tpu.dma_semaphore, #tpu.memory_space<semaphore_mem>> -> memref<!tpu.dma_semaphore, #tpu.memory_space<semaphore_mem>>
    tpu.wait_dma2 semaphore(%282 : memref<!tpu.dma_semaphore, #tpu.memory_space<semaphore_mem>>) src(%arg7 : memref<272x512xbf16, #tpu.memory_space<any>>) dst(%arg10 : memref<272x512xbf16, #tpu.memory_space<vmem>>)
    %c0_57 = arith.constant 0 : index
    %c0_58 = arith.constant 0 : index
    %283 = vector.load %arg10[%c0_57, %c0_58] : memref<272x512xbf16, #tpu.memory_space<vmem>>, vector<128x512xbf16>
    %c128 = arith.constant 128 : index
    %c0_59 = arith.constant 0 : index
    %284 = vector.load %arg10[%c128, %c0_59] : memref<272x512xbf16, #tpu.memory_space<vmem>>, vector<128x512xbf16>
    %c256 = arith.constant 256 : index
    %c0_60 = arith.constant 0 : index
    %285 = vector.load %arg10[%c256, %c0_60] : memref<272x512xbf16, #tpu.memory_space<vmem>>, vector<1x512xbf16>
    %286 = arith.truncf %280 : vector<16x128xf32> to vector<16x128xbf16>
    %cst_61 = arith.constant dense<0.000000e+00> : vector<16x512xf32>
    %287 = tpu.matmul %286, %283, %cst_61 {dimension_numbers = #tpu.dot_dimension_numbers<[1], [0], [0], [1], [0, 0, 1, 1], [], []>} : vector<16x128xbf16>, vector<128x512xbf16>, vector<16x512xf32> -> vector<16x512xf32>
    %288 = arith.extf %285 : vector<1x512xbf16> to vector<1x512xf32>
    %289 = vector.broadcast %288 : vector<1x512xf32> to vector<16x512xf32>
    %290 = arith.addf %287, %289 : vector<16x512xf32>
    %291 = arith.truncf %290 : vector<16x512xf32> to vector<16x512xbf16>
    %cst_62 = arith.constant dense<0.000000e+00> : vector<16x512xf32>
    %292 = tpu.matmul %6, %291, %cst_62 {dimension_numbers = #tpu.dot_dimension_numbers<[1], [0], [0], [1], [0, 0, 1, 1], [], []>} : vector<16x16xbf16>, vector<16x512xbf16>, vector<16x512xf32> -> vector<16x512xf32>
    %293 = arith.select %26, %290, %292 : vector<16x512xi1>, vector<16x512xf32>
    %cst_63 = arith.constant 0.000000e+00 : f32
    %294 = vector.broadcast %cst_63 : f32 to vector<2x128xf32>
    %cst_64 = arith.constant 0.000000e+00 : f32
    %295 = vector.broadcast %cst_64 : f32 to vector<2x128xf32>
    %296 = arith.truncf %294 : vector<2x128xf32> to vector<2x128xbf16>
    %cst_65 = arith.constant dense<0.000000e+00> : vector<2x512xf32>
    %297 = tpu.matmul %296, %284, %cst_65 {dimension_numbers = #tpu.dot_dimension_numbers<[1], [0], [0], [1], [0, 0, 1, 1], [], []>} : vector<2x128xbf16>, vector<128x512xbf16>, vector<2x512xf32> -> vector<2x512xf32>
    %298 = vector.extract_strided_slice %293 {offsets = [0, 0], sizes = [2, 512], strides = [1, 1]} : vector<16x512xf32> to vector<2x512xf32>
    %299 = arith.addf %297, %298 : vector<2x512xf32>
    %300 = vector.extract_strided_slice %299 {offsets = [0, 0], sizes = [2, 128], strides = [1, 1]} : vector<2x512xf32> to vector<2x128xf32>
    %301 = arith.negf %300 : vector<2x128xf32>
    %302 = math.exp %301 : vector<2x128xf32>
    %cst_66 = arith.constant 1.000000e+00 : f32
    %303 = vector.broadcast %cst_66 : f32 to vector<2x128xf32>
    %304 = arith.addf %303, %302 : vector<2x128xf32>
    %305 = arith.divf %303, %304 : vector<2x128xf32>
    %306 = vector.extract_strided_slice %299 {offsets = [0, 128], sizes = [2, 128], strides = [1, 1]} : vector<2x512xf32> to vector<2x128xf32>
    %307 = arith.negf %306 : vector<2x128xf32>
    %308 = math.exp %307 : vector<2x128xf32>
    %cst_67 = arith.constant 1.000000e+00 : f32
    %309 = vector.broadcast %cst_67 : f32 to vector<2x128xf32>
    %310 = arith.addf %309, %308 : vector<2x128xf32>
    %311 = arith.divf %309, %310 : vector<2x128xf32>
    %312 = vector.extract_strided_slice %299 {offsets = [0, 256], sizes = [2, 128], strides = [1, 1]} : vector<2x512xf32> to vector<2x128xf32>
    %313 = math.tanh %312 : vector<2x128xf32>
    %314 = vector.extract_strided_slice %299 {offsets = [0, 384], sizes = [2, 128], strides = [1, 1]} : vector<2x512xf32> to vector<2x128xf32>
    %315 = arith.negf %314 : vector<2x128xf32>
    %316 = math.exp %315 : vector<2x128xf32>
    %cst_68 = arith.constant 1.000000e+00 : f32
    %317 = vector.broadcast %cst_68 : f32 to vector<2x128xf32>
    %318 = arith.addf %317, %316 : vector<2x128xf32>
    %319 = arith.divf %317, %318 : vector<2x128xf32>
    %320 = arith.mulf %311, %295 : vector<2x128xf32>
    %321 = arith.mulf %305, %313 : vector<2x128xf32>
    %322 = arith.addf %320, %321 : vector<2x128xf32>
    %323 = math.tanh %322 : vector<2x128xf32>
    %324 = arith.mulf %319, %323 : vector<2x128xf32>
    %325 = arith.truncf %324 : vector<2x128xf32> to vector<2x128xbf16>
    %cst_69 = arith.constant dense<0.000000e+00> : vector<2x512xf32>
    %326 = tpu.matmul %325, %284, %cst_69 {dimension_numbers = #tpu.dot_dimension_numbers<[1], [0], [0], [1], [0, 0, 1, 1], [], []>} : vector<2x128xbf16>, vector<128x512xbf16>, vector<2x512xf32> -> vector<2x512xf32>
    %327 = vector.extract_strided_slice %293 {offsets = [2, 0], sizes = [2, 512], strides = [1, 1]} : vector<16x512xf32> to vector<2x512xf32>
    %328 = arith.addf %326, %327 : vector<2x512xf32>
    %329 = vector.extract_strided_slice %328 {offsets = [0, 0], sizes = [2, 128], strides = [1, 1]} : vector<2x512xf32> to vector<2x128xf32>
    %330 = arith.negf %329 : vector<2x128xf32>
    %331 = math.exp %330 : vector<2x128xf32>
    %cst_70 = arith.constant 1.000000e+00 : f32
    %332 = vector.broadcast %cst_70 : f32 to vector<2x128xf32>
    %333 = arith.addf %332, %331 : vector<2x128xf32>
    %334 = arith.divf %332, %333 : vector<2x128xf32>
    %335 = vector.extract_strided_slice %328 {offsets = [0, 128], sizes = [2, 128], strides = [1, 1]} : vector<2x512xf32> to vector<2x128xf32>
    %336 = arith.negf %335 : vector<2x128xf32>
    %337 = math.exp %336 : vector<2x128xf32>
    %cst_71 = arith.constant 1.000000e+00 : f32
    %338 = vector.broadcast %cst_71 : f32 to vector<2x128xf32>
    %339 = arith.addf %338, %337 : vector<2x128xf32>
    %340 = arith.divf %338, %339 : vector<2x128xf32>
    %341 = vector.extract_strided_slice %328 {offsets = [0, 256], sizes = [2, 128], strides = [1, 1]} : vector<2x512xf32> to vector<2x128xf32>
    %342 = math.tanh %341 : vector<2x128xf32>
    %343 = vector.extract_strided_slice %328 {offsets = [0, 384], sizes = [2, 128], strides = [1, 1]} : vector<2x512xf32> to vector<2x128xf32>
    %344 = arith.negf %343 : vector<2x128xf32>
    %345 = math.exp %344 : vector<2x128xf32>
    %cst_72 = arith.constant 1.000000e+00 : f32
    %346 = vector.broadcast %cst_72 : f32 to vector<2x128xf32>
    %347 = arith.addf %346, %345 : vector<2x128xf32>
    %348 = arith.divf %346, %347 : vector<2x128xf32>
    %349 = arith.mulf %340, %322 : vector<2x128xf32>
    %350 = arith.mulf %334, %342 : vector<2x128xf32>
    %351 = arith.addf %349, %350 : vector<2x128xf32>
    %352 = math.tanh %351 : vector<2x128xf32>
    %353 = arith.mulf %348, %352 : vector<2x128xf32>
    %354 = arith.truncf %353 : vector<2x128xf32> to vector<2x128xbf16>
    %cst_73 = arith.constant dense<0.000000e+00> : vector<2x512xf32>
    %355 = tpu.matmul %354, %284, %cst_73 {dimension_numbers = #tpu.dot_dimension_numbers<[1], [0], [0], [1], [0, 0, 1, 1], [], []>} : vector<2x128xbf16>, vector<128x512xbf16>, vector<2x512xf32> -> vector<2x512xf32>
    %356 = vector.extract_strided_slice %293 {offsets = [4, 0], sizes = [2, 512], strides = [1, 1]} : vector<16x512xf32> to vector<2x512xf32>
    %357 = arith.addf %355, %356 : vector<2x512xf32>
    %358 = vector.extract_strided_slice %357 {offsets = [0, 0], sizes = [2, 128], strides = [1, 1]} : vector<2x512xf32> to vector<2x128xf32>
    %359 = arith.negf %358 : vector<2x128xf32>
    %360 = math.exp %359 : vector<2x128xf32>
    %cst_74 = arith.constant 1.000000e+00 : f32
    %361 = vector.broadcast %cst_74 : f32 to vector<2x128xf32>
    %362 = arith.addf %361, %360 : vector<2x128xf32>
    %363 = arith.divf %361, %362 : vector<2x128xf32>
    %364 = vector.extract_strided_slice %357 {offsets = [0, 128], sizes = [2, 128], strides = [1, 1]} : vector<2x512xf32> to vector<2x128xf32>
    %365 = arith.negf %364 : vector<2x128xf32>
    %366 = math.exp %365 : vector<2x128xf32>
    %cst_75 = arith.constant 1.000000e+00 : f32
    %367 = vector.broadcast %cst_75 : f32 to vector<2x128xf32>
    %368 = arith.addf %367, %366 : vector<2x128xf32>
    %369 = arith.divf %367, %368 : vector<2x128xf32>
    %370 = vector.extract_strided_slice %357 {offsets = [0, 256], sizes = [2, 128], strides = [1, 1]} : vector<2x512xf32> to vector<2x128xf32>
    %371 = math.tanh %370 : vector<2x128xf32>
    %372 = vector.extract_strided_slice %357 {offsets = [0, 384], sizes = [2, 128], strides = [1, 1]} : vector<2x512xf32> to vector<2x128xf32>
    %373 = arith.negf %372 : vector<2x128xf32>
    %374 = math.exp %373 : vector<2x128xf32>
    %cst_76 = arith.constant 1.000000e+00 : f32
    %375 = vector.broadcast %cst_76 : f32 to vector<2x128xf32>
    %376 = arith.addf %375, %374 : vector<2x128xf32>
    %377 = arith.divf %375, %376 : vector<2x128xf32>
    %378 = arith.mulf %369, %351 : vector<2x128xf32>
    %379 = arith.mulf %363, %371 : vector<2x128xf32>
    %380 = arith.addf %378, %379 : vector<2x128xf32>
    %381 = math.tanh %380 : vector<2x128xf32>
    %382 = arith.mulf %377, %381 : vector<2x128xf32>
    %383 = arith.truncf %382 : vector<2x128xf32> to vector<2x128xbf16>
    %cst_77 = arith.constant dense<0.000000e+00> : vector<2x512xf32>
    %384 = tpu.matmul %383, %284, %cst_77 {dimension_numbers = #tpu.dot_dimension_numbers<[1], [0], [0], [1], [0, 0, 1, 1], [], []>} : vector<2x128xbf16>, vector<128x512xbf16>, vector<2x512xf32> -> vector<2x512xf32>
    %385 = vector.extract_strided_slice %293 {offsets = [6, 0], sizes = [2, 512], strides = [1, 1]} : vector<16x512xf32> to vector<2x512xf32>
    %386 = arith.addf %384, %385 : vector<2x512xf32>
    %387 = vector.extract_strided_slice %386 {offsets = [0, 0], sizes = [2, 128], strides = [1, 1]} : vector<2x512xf32> to vector<2x128xf32>
    %388 = arith.negf %387 : vector<2x128xf32>
    %389 = math.exp %388 : vector<2x128xf32>
    %cst_78 = arith.constant 1.000000e+00 : f32
    %390 = vector.broadcast %cst_78 : f32 to vector<2x128xf32>
    %391 = arith.addf %390, %389 : vector<2x128xf32>
    %392 = arith.divf %390, %391 : vector<2x128xf32>
    %393 = vector.extract_strided_slice %386 {offsets = [0, 128], sizes = [2, 128], strides = [1, 1]} : vector<2x512xf32> to vector<2x128xf32>
    %394 = arith.negf %393 : vector<2x128xf32>
    %395 = math.exp %394 : vector<2x128xf32>
    %cst_79 = arith.constant 1.000000e+00 : f32
    %396 = vector.broadcast %cst_79 : f32 to vector<2x128xf32>
    %397 = arith.addf %396, %395 : vector<2x128xf32>
    %398 = arith.divf %396, %397 : vector<2x128xf32>
    %399 = vector.extract_strided_slice %386 {offsets = [0, 256], sizes = [2, 128], strides = [1, 1]} : vector<2x512xf32> to vector<2x128xf32>
    %400 = math.tanh %399 : vector<2x128xf32>
    %401 = vector.extract_strided_slice %386 {offsets = [0, 384], sizes = [2, 128], strides = [1, 1]} : vector<2x512xf32> to vector<2x128xf32>
    %402 = arith.negf %401 : vector<2x128xf32>
    %403 = math.exp %402 : vector<2x128xf32>
    %cst_80 = arith.constant 1.000000e+00 : f32
    %404 = vector.broadcast %cst_80 : f32 to vector<2x128xf32>
    %405 = arith.addf %404, %403 : vector<2x128xf32>
    %406 = arith.divf %404, %405 : vector<2x128xf32>
    %407 = arith.mulf %398, %380 : vector<2x128xf32>
    %408 = arith.mulf %392, %400 : vector<2x128xf32>
    %409 = arith.addf %407, %408 : vector<2x128xf32>
    %410 = math.tanh %409 : vector<2x128xf32>
    %411 = arith.mulf %406, %410 : vector<2x128xf32>
    %412 = arith.truncf %411 : vector<2x128xf32> to vector<2x128xbf16>
    %cst_81 = arith.constant dense<0.000000e+00> : vector<2x512xf32>
    %413 = tpu.matmul %412, %284, %cst_81 {dimension_numbers = #tpu.dot_dimension_numbers<[1], [0], [0], [1], [0, 0, 1, 1], [], []>} : vector<2x128xbf16>, vector<128x512xbf16>, vector<2x512xf32> -> vector<2x512xf32>
    %414 = vector.extract_strided_slice %293 {offsets = [8, 0], sizes = [2, 512], strides = [1, 1]} : vector<16x512xf32> to vector<2x512xf32>
    %415 = arith.addf %413, %414 : vector<2x512xf32>
    %416 = vector.extract_strided_slice %415 {offsets = [0, 0], sizes = [2, 128], strides = [1, 1]} : vector<2x512xf32> to vector<2x128xf32>
    %417 = arith.negf %416 : vector<2x128xf32>
    %418 = math.exp %417 : vector<2x128xf32>
    %cst_82 = arith.constant 1.000000e+00 : f32
    %419 = vector.broadcast %cst_82 : f32 to vector<2x128xf32>
    %420 = arith.addf %419, %418 : vector<2x128xf32>
    %421 = arith.divf %419, %420 : vector<2x128xf32>
    %422 = vector.extract_strided_slice %415 {offsets = [0, 128], sizes = [2, 128], strides = [1, 1]} : vector<2x512xf32> to vector<2x128xf32>
    %423 = arith.negf %422 : vector<2x128xf32>
    %424 = math.exp %423 : vector<2x128xf32>
    %cst_83 = arith.constant 1.000000e+00 : f32
    %425 = vector.broadcast %cst_83 : f32 to vector<2x128xf32>
    %426 = arith.addf %425, %424 : vector<2x128xf32>
    %427 = arith.divf %425, %426 : vector<2x128xf32>
    %428 = vector.extract_strided_slice %415 {offsets = [0, 256], sizes = [2, 128], strides = [1, 1]} : vector<2x512xf32> to vector<2x128xf32>
    %429 = math.tanh %428 : vector<2x128xf32>
    %430 = vector.extract_strided_slice %415 {offsets = [0, 384], sizes = [2, 128], strides = [1, 1]} : vector<2x512xf32> to vector<2x128xf32>
    %431 = arith.negf %430 : vector<2x128xf32>
    %432 = math.exp %431 : vector<2x128xf32>
    %cst_84 = arith.constant 1.000000e+00 : f32
    %433 = vector.broadcast %cst_84 : f32 to vector<2x128xf32>
    %434 = arith.addf %433, %432 : vector<2x128xf32>
    %435 = arith.divf %433, %434 : vector<2x128xf32>
    %436 = arith.mulf %427, %409 : vector<2x128xf32>
    %437 = arith.mulf %421, %429 : vector<2x128xf32>
    %438 = arith.addf %436, %437 : vector<2x128xf32>
    %439 = math.tanh %438 : vector<2x128xf32>
    %440 = arith.mulf %435, %439 : vector<2x128xf32>
    %441 = arith.truncf %440 : vector<2x128xf32> to vector<2x128xbf16>
    %cst_85 = arith.constant dense<0.000000e+00> : vector<2x512xf32>
    %442 = tpu.matmul %441, %284, %cst_85 {dimension_numbers = #tpu.dot_dimension_numbers<[1], [0], [0], [1], [0, 0, 1, 1], [], []>} : vector<2x128xbf16>, vector<128x512xbf16>, vector<2x512xf32> -> vector<2x512xf32>
    %443 = vector.extract_strided_slice %293 {offsets = [10, 0], sizes = [2, 512], strides = [1, 1]} : vector<16x512xf32> to vector<2x512xf32>
    %444 = arith.addf %442, %443 : vector<2x512xf32>
    %445 = vector.extract_strided_slice %444 {offsets = [0, 0], sizes = [2, 128], strides = [1, 1]} : vector<2x512xf32> to vector<2x128xf32>
    %446 = arith.negf %445 : vector<2x128xf32>
    %447 = math.exp %446 : vector<2x128xf32>
    %cst_86 = arith.constant 1.000000e+00 : f32
    %448 = vector.broadcast %cst_86 : f32 to vector<2x128xf32>
    %449 = arith.addf %448, %447 : vector<2x128xf32>
    %450 = arith.divf %448, %449 : vector<2x128xf32>
    %451 = vector.extract_strided_slice %444 {offsets = [0, 128], sizes = [2, 128], strides = [1, 1]} : vector<2x512xf32> to vector<2x128xf32>
    %452 = arith.negf %451 : vector<2x128xf32>
    %453 = math.exp %452 : vector<2x128xf32>
    %cst_87 = arith.constant 1.000000e+00 : f32
    %454 = vector.broadcast %cst_87 : f32 to vector<2x128xf32>
    %455 = arith.addf %454, %453 : vector<2x128xf32>
    %456 = arith.divf %454, %455 : vector<2x128xf32>
    %457 = vector.extract_strided_slice %444 {offsets = [0, 256], sizes = [2, 128], strides = [1, 1]} : vector<2x512xf32> to vector<2x128xf32>
    %458 = math.tanh %457 : vector<2x128xf32>
    %459 = vector.extract_strided_slice %444 {offsets = [0, 384], sizes = [2, 128], strides = [1, 1]} : vector<2x512xf32> to vector<2x128xf32>
    %460 = arith.negf %459 : vector<2x128xf32>
    %461 = math.exp %460 : vector<2x128xf32>
    %cst_88 = arith.constant 1.000000e+00 : f32
    %462 = vector.broadcast %cst_88 : f32 to vector<2x128xf32>
    %463 = arith.addf %462, %461 : vector<2x128xf32>
    %464 = arith.divf %462, %463 : vector<2x128xf32>
    %465 = arith.mulf %456, %438 : vector<2x128xf32>
    %466 = arith.mulf %450, %458 : vector<2x128xf32>
    %467 = arith.addf %465, %466 : vector<2x128xf32>
    %468 = math.tanh %467 : vector<2x128xf32>
    %469 = arith.mulf %464, %468 : vector<2x128xf32>
    %470 = arith.truncf %469 : vector<2x128xf32> to vector<2x128xbf16>
    %cst_89 = arith.constant dense<0.000000e+00> : vector<2x512xf32>
    %471 = tpu.matmul %470, %284, %cst_89 {dimension_numbers = #tpu.dot_dimension_numbers<[1], [0], [0], [1], [0, 0, 1, 1], [], []>} : vector<2x128xbf16>, vector<128x512xbf16>, vector<2x512xf32> -> vector<2x512xf32>
    %472 = vector.extract_strided_slice %293 {offsets = [12, 0], sizes = [2, 512], strides = [1, 1]} : vector<16x512xf32> to vector<2x512xf32>
    %473 = arith.addf %471, %472 : vector<2x512xf32>
    %474 = vector.extract_strided_slice %473 {offsets = [0, 0], sizes = [2, 128], strides = [1, 1]} : vector<2x512xf32> to vector<2x128xf32>
    %475 = arith.negf %474 : vector<2x128xf32>
    %476 = math.exp %475 : vector<2x128xf32>
    %cst_90 = arith.constant 1.000000e+00 : f32
    %477 = vector.broadcast %cst_90 : f32 to vector<2x128xf32>
    %478 = arith.addf %477, %476 : vector<2x128xf32>
    %479 = arith.divf %477, %478 : vector<2x128xf32>
    %480 = vector.extract_strided_slice %473 {offsets = [0, 128], sizes = [2, 128], strides = [1, 1]} : vector<2x512xf32> to vector<2x128xf32>
    %481 = arith.negf %480 : vector<2x128xf32>
    %482 = math.exp %481 : vector<2x128xf32>
    %cst_91 = arith.constant 1.000000e+00 : f32
    %483 = vector.broadcast %cst_91 : f32 to vector<2x128xf32>
    %484 = arith.addf %483, %482 : vector<2x128xf32>
    %485 = arith.divf %483, %484 : vector<2x128xf32>
    %486 = vector.extract_strided_slice %473 {offsets = [0, 256], sizes = [2, 128], strides = [1, 1]} : vector<2x512xf32> to vector<2x128xf32>
    %487 = math.tanh %486 : vector<2x128xf32>
    %488 = vector.extract_strided_slice %473 {offsets = [0, 384], sizes = [2, 128], strides = [1, 1]} : vector<2x512xf32> to vector<2x128xf32>
    %489 = arith.negf %488 : vector<2x128xf32>
    %490 = math.exp %489 : vector<2x128xf32>
    %cst_92 = arith.constant 1.000000e+00 : f32
    %491 = vector.broadcast %cst_92 : f32 to vector<2x128xf32>
    %492 = arith.addf %491, %490 : vector<2x128xf32>
    %493 = arith.divf %491, %492 : vector<2x128xf32>
    %494 = arith.mulf %485, %467 : vector<2x128xf32>
    %495 = arith.mulf %479, %487 : vector<2x128xf32>
    %496 = arith.addf %494, %495 : vector<2x128xf32>
    %497 = math.tanh %496 : vector<2x128xf32>
    %498 = arith.mulf %493, %497 : vector<2x128xf32>
    %499 = arith.truncf %498 : vector<2x128xf32> to vector<2x128xbf16>
    %cst_93 = arith.constant dense<0.000000e+00> : vector<2x512xf32>
    %500 = tpu.matmul %499, %284, %cst_93 {dimension_numbers = #tpu.dot_dimension_numbers<[1], [0], [0], [1], [0, 0, 1, 1], [], []>} : vector<2x128xbf16>, vector<128x512xbf16>, vector<2x512xf32> -> vector<2x512xf32>
    %501 = vector.extract_strided_slice %293 {offsets = [14, 0], sizes = [2, 512], strides = [1, 1]} : vector<16x512xf32> to vector<2x512xf32>
    %502 = arith.addf %500, %501 : vector<2x512xf32>
    %503 = vector.extract_strided_slice %502 {offsets = [0, 0], sizes = [2, 128], strides = [1, 1]} : vector<2x512xf32> to vector<2x128xf32>
    %504 = arith.negf %503 : vector<2x128xf32>
    %505 = math.exp %504 : vector<2x128xf32>
    %cst_94 = arith.constant 1.000000e+00 : f32
    %506 = vector.broadcast %cst_94 : f32 to vector<2x128xf32>
    %507 = arith.addf %506, %505 : vector<2x128xf32>
    %508 = arith.divf %506, %507 : vector<2x128xf32>
    %509 = vector.extract_strided_slice %502 {offsets = [0, 128], sizes = [2, 128], strides = [1, 1]} : vector<2x512xf32> to vector<2x128xf32>
    %510 = arith.negf %509 : vector<2x128xf32>
    %511 = math.exp %510 : vector<2x128xf32>
    %cst_95 = arith.constant 1.000000e+00 : f32
    %512 = vector.broadcast %cst_95 : f32 to vector<2x128xf32>
    %513 = arith.addf %512, %511 : vector<2x128xf32>
    %514 = arith.divf %512, %513 : vector<2x128xf32>
    %515 = vector.extract_strided_slice %502 {offsets = [0, 256], sizes = [2, 128], strides = [1, 1]} : vector<2x512xf32> to vector<2x128xf32>
    %516 = math.tanh %515 : vector<2x128xf32>
    %517 = vector.extract_strided_slice %502 {offsets = [0, 384], sizes = [2, 128], strides = [1, 1]} : vector<2x512xf32> to vector<2x128xf32>
    %518 = arith.negf %517 : vector<2x128xf32>
    %519 = math.exp %518 : vector<2x128xf32>
    %cst_96 = arith.constant 1.000000e+00 : f32
    %520 = vector.broadcast %cst_96 : f32 to vector<2x128xf32>
    %521 = arith.addf %520, %519 : vector<2x128xf32>
    %522 = arith.divf %520, %521 : vector<2x128xf32>
    %523 = arith.mulf %514, %496 : vector<2x128xf32>
    %524 = arith.mulf %508, %516 : vector<2x128xf32>
    %525 = arith.addf %523, %524 : vector<2x128xf32>
    %526 = math.tanh %525 : vector<2x128xf32>
    %527 = arith.mulf %522, %526 : vector<2x128xf32>
    %528 = tpu.concatenate %324, %353, %382, %411, %440, %469, %498, %527 in 0 : vector<2x128xf32>, vector<2x128xf32>, vector<2x128xf32>, vector<2x128xf32>, vector<2x128xf32>, vector<2x128xf32>, vector<2x128xf32>, vector<2x128xf32> -> vector<16x128xf32>
    %529 = arith.truncf %528 : vector<16x128xf32> to vector<16x128xbf16>
    %cst_97 = arith.constant dense<0.000000e+00> : vector<16x128xf32>
    %530 = tpu.matmul %6, %529, %cst_97 {dimension_numbers = #tpu.dot_dimension_numbers<[1], [0], [0], [1], [0, 0, 1, 1], [], []>} : vector<16x16xbf16>, vector<16x128xbf16>, vector<16x128xf32> -> vector<16x128xf32>
    %531 = arith.select %29, %528, %530 : vector<16x128xi1>, vector<16x128xf32>
    %c1_i32_98 = arith.constant 1 : i32
    %532 = tpu.memref_slice %arg12[%c1_i32_98] : memref<2x!tpu.dma_semaphore, #tpu.memory_space<semaphore_mem>> -> memref<1x!tpu.dma_semaphore, #tpu.memory_space<semaphore_mem>>
    %533 = tpu.memref_squeeze %532 : memref<1x!tpu.dma_semaphore, #tpu.memory_space<semaphore_mem>> -> memref<!tpu.dma_semaphore, #tpu.memory_space<semaphore_mem>>
    tpu.wait_dma2 semaphore(%533 : memref<!tpu.dma_semaphore, #tpu.memory_space<semaphore_mem>>) src(%arg8 : memref<496x128xbf16, #tpu.memory_space<any>>) dst(%arg11 : memref<496x128xbf16, #tpu.memory_space<vmem>>)
    %c0_99 = arith.constant 0 : index
    %c0_100 = arith.constant 0 : index
    %534 = vector.load %arg11[%c0_99, %c0_100] : memref<496x128xbf16, #tpu.memory_space<vmem>>, vector<128x128xbf16>
    %c128_101 = arith.constant 128 : index
    %c0_102 = arith.constant 0 : index
    %535 = vector.load %arg11[%c128_101, %c0_102] : memref<496x128xbf16, #tpu.memory_space<vmem>>, vector<128x128xbf16>
    %c256_103 = arith.constant 256 : index
    %c0_104 = arith.constant 0 : index
    %536 = vector.load %arg11[%c256_103, %c0_104] : memref<496x128xbf16, #tpu.memory_space<vmem>>, vector<128x128xbf16>
    %c384 = arith.constant 384 : index
    %c0_105 = arith.constant 0 : index
    %537 = vector.load %arg11[%c384, %c0_105] : memref<496x128xbf16, #tpu.memory_space<vmem>>, vector<64x128xbf16>
    %c448 = arith.constant 448 : index
    %c0_106 = arith.constant 0 : index
    %538 = vector.load %arg11[%c448, %c0_106] : memref<496x128xbf16, #tpu.memory_space<vmem>>, vector<1x128xbf16>
    %c464 = arith.constant 464 : index
    %c0_107 = arith.constant 0 : index
    %539 = vector.load %arg11[%c464, %c0_107] : memref<496x128xbf16, #tpu.memory_space<vmem>>, vector<1x128xbf16>
    %c480 = arith.constant 480 : index
    %c0_108 = arith.constant 0 : index
    %540 = vector.load %arg11[%c480, %c0_108] : memref<496x128xbf16, #tpu.memory_space<vmem>>, vector<1x128xbf16>
    %541 = arith.truncf %280 : vector<16x128xf32> to vector<16x128xbf16>
    %cst_109 = arith.constant dense<0.000000e+00> : vector<16x128xf32>
    %542 = tpu.matmul %541, %534, %cst_109 {dimension_numbers = #tpu.dot_dimension_numbers<[1], [0], [0], [1], [0, 0, 1, 1], [], []>} : vector<16x128xbf16>, vector<128x128xbf16>, vector<16x128xf32> -> vector<16x128xf32>
    %543 = arith.extf %538 : vector<1x128xbf16> to vector<1x128xf32>
    %544 = vector.broadcast %543 : vector<1x128xf32> to vector<16x128xf32>
    %545 = arith.addf %542, %544 : vector<16x128xf32>
    %cst_110 = arith.constant 0.000000e+00 : f32
    %546 = vector.broadcast %cst_110 : f32 to vector<16x128xf32>
    %547 = arith.maximumf %545, %546 : vector<16x128xf32>
    %548 = arith.truncf %531 : vector<16x128xf32> to vector<16x128xbf16>
    %cst_111 = arith.constant dense<0.000000e+00> : vector<16x128xf32>
    %549 = tpu.matmul %548, %535, %cst_111 {dimension_numbers = #tpu.dot_dimension_numbers<[1], [0], [0], [1], [0, 0, 1, 1], [], []>} : vector<16x128xbf16>, vector<128x128xbf16>, vector<16x128xf32> -> vector<16x128xf32>
    %550 = arith.extf %539 : vector<1x128xbf16> to vector<1x128xf32>
    %551 = vector.broadcast %550 : vector<1x128xf32> to vector<16x128xf32>
    %552 = arith.addf %549, %551 : vector<16x128xf32>
    %cst_112 = arith.constant 0.000000e+00 : f32
    %553 = vector.broadcast %cst_112 : f32 to vector<16x128xf32>
    %554 = arith.maximumf %552, %553 : vector<16x128xf32>
    %555 = arith.addf %280, %531 : vector<16x128xf32>
    %556 = arith.addf %555, %547 : vector<16x128xf32>
    %557 = arith.addf %556, %554 : vector<16x128xf32>
    %558 = arith.truncf %557 : vector<16x128xf32> to vector<16x128xbf16>
    %cst_113 = arith.constant dense<0.000000e+00> : vector<16x128xf32>
    %559 = tpu.matmul %7, %558, %cst_113 {dimension_numbers = #tpu.dot_dimension_numbers<[1], [0], [0], [1], [0, 0, 1, 1], [], []>} : vector<16x16xbf16>, vector<16x128xbf16>, vector<16x128xf32> -> vector<16x128xf32>
    %560 = arith.truncf %559 : vector<16x128xf32> to vector<16x128xbf16>
    %cst_114 = arith.constant dense<0.000000e+00> : vector<16x128xf32>
    %561 = tpu.matmul %560, %536, %cst_114 {dimension_numbers = #tpu.dot_dimension_numbers<[1], [0], [0], [1], [0, 0, 1, 1], [], []>} : vector<16x128xbf16>, vector<128x128xbf16>, vector<16x128xf32> -> vector<16x128xf32>
    %562 = arith.truncf %4 : vector<16x64xf32> to vector<16x64xbf16>
    %cst_115 = arith.constant dense<0.000000e+00> : vector<16x128xf32>
    %563 = tpu.matmul %562, %537, %cst_115 {dimension_numbers = #tpu.dot_dimension_numbers<[1], [0], [0], [1], [0, 0, 1, 1], [], []>} : vector<16x64xbf16>, vector<64x128xbf16>, vector<16x128xf32> -> vector<16x128xf32>
    %564 = arith.addf %561, %563 : vector<16x128xf32>
    %565 = arith.extf %540 : vector<1x128xbf16> to vector<1x128xf32>
    %566 = vector.broadcast %565 : vector<1x128xf32> to vector<16x128xf32>
    %567 = arith.addf %564, %566 : vector<16x128xf32>
    %c0_116 = arith.constant 0 : index
    %c0_117 = arith.constant 0 : index
    %568 = vector.load %arg9[%c0_116, %c0_117] : memref<16x128xf32, #tpu.memory_space<vmem>>, vector<16x128xf32>
    tpu.vector_store %arg9[%c0_116, %c0_117], %567 {strides = array<i32>} : memref<16x128xf32, #tpu.memory_space<vmem>>, vector<16x128xf32>,
    return
  }
}

</mosaic_0001>

<bundles_post_ra>
// kernel: neural_net_forward.1
= control target key start
LH: loop header
LB: loop body
LE: loop exit
PB: predicated region body
PF: predicated region fallthrough
CT: control target
= control target key end

     0   :  { %14 = vsyncpa [#allocation6], 0  ;;  %s6117_s0 = inlined_call_operand.hbm [shape: f32[16,64], index: 0, kind: input, shape index: {}]   ;;  %s6118_s1 = inlined_call_operand.hbm [shape: bf16[16,16], index: 1, kind: input, shape index: {}]   ;;  %s6119_s2 = inlined_call_operand.hbm [shape: bf16[16,16], index: 2, kind: input, shape index: {}]   ;;  %s6120_s3 = inlined_call_operand.vmem [shape: bf16[16,16], index: 3, kind: input, shape index: {}]   ;;  %s6121_s4 = inlined_call_operand.hbm [shape: bf16[64,512], index: 4, kind: input, shape index: {}]   ;;  %s6122_s5 = inlined_call_operand.hbm [shape: bf16[128,512], index: 5, kind: input, shape index: {}]   ;;  %s6123_s6 = inlined_call_operand.hbm [shape: bf16[1,512], index: 6, kind: input, shape index: {}]   ;;  %s6124_s7 = inlined_call_operand.hbm [shape: bf16[272,512], index: 7, kind: input, shape index: {}]   ;;  %s6125_s8 = inlined_call_operand.hbm [shape: bf16[496,128], index: 8, kind: input, shape index: {}]   ;;  %s6126_s9 = inlined_call_operand.vmem [shape: f32[16,128], index: 9, kind: output, shape index: {}]  }
   0x1   :  { %15 = vsyncpa [#allocation8], 0 }
   0x2   :  { %16 = vsyncpa [#allocation11], 0 }
   0x3   :  { %17 = vsyncpa [#allocation14], 0  ;;  %s4876_s30 = smov [#allocation7]  }
   0x4   :  { %s35_s10 = sshll.u32 %s4876_s30, 4  ;;  %s36_s10 = int_to_ptr.vmem [resolvable:$true] %s35_s10 }
   0x5   :  { %s4712_s11 = scalar_lea.vmem %s36_s10, 128  ;;  %p4717_p1 = scmp.lt.s32.totalorder %s36_s10, %s36_s10 }
   0x6   :  { %p4713_p0 = scmp.ne.s32.totalorder %s36_s10, %s4712_s11  ;;  %p4718_p2 = scmp.lt.s32.totalorder %s4712_s11, %s4712_s11 }
   0x8   :  { %p4719_p3 = por %p4718_p2, %p4717_p1 }
   0xa   :  { %p4720_p4 = pnand %p4719_p3, %p4713_p0 }
   0xc   :  { %4723 = shalt.err (!%p4720_p4)
}
   0xd   :  { %s4877_s12 = smov 64   ;;  %s4878_s13 = smov 4  }
   0xe   :  { %41 = dma.hbm_to_vmem [thread:$0]  %s6118_s1, 128, %s36_s10, [#allocation8], %s4877_s12, %s4877_s12, %s4878_s13  }
   0xf   :  { %s4879_s16 = smov [#allocation10]  }
  0x10   :  { %s61_s17 = sshll.u32 %s4879_s16, 4  ;;  %s62_s17 = int_to_ptr.vmem [resolvable:$true] %s61_s17 }
  0x11   :  { %s4732_s18 = scalar_lea.vmem %s62_s17, 2048  ;;  %p4737_p6 = scmp.lt.s32.totalorder %s62_s17, %s62_s17 }
  0x12   :  { %p4733_p5 = scmp.ne.s32.totalorder %s62_s17, %s4732_s18  ;;  %p4738_p7 = scmp.lt.s32.totalorder %s4732_s18, %s4732_s18 }
  0x14   :  { %p4739_p8 = por %p4738_p7, %p4737_p6 }
  0x16   :  { %p4740_p9 = pnand %p4739_p8, %p4733_p5 }
  0x18   :  { %4743 = shalt.err (!%p4740_p9)
}
  0x19   :  { %s4880_s19 = smov 256   ;;  %s4881_s20 = smov 16  }
  0x1a   :  { %67 = dma.hbm_to_vmem [thread:$0]  %s6121_s4, 2048, %s62_s17, [#allocation11], %s4880_s19, %s4880_s19, %s4881_s20  }
  0x1b   :  { %s4882_s1 = smov [#allocation5]  }
  0x1c   :  { %s23_s23 = sshll.u32 %s4882_s1, 4  ;;  %s24_s23 = int_to_ptr.vmem [resolvable:$true] %s23_s23 }
  0x1d   :  { %s4752_s24 = scalar_lea.vmem %s24_s23, 256  ;;  %p4757_p11 = scmp.lt.s32.totalorder %s24_s23, %s24_s23 }
  0x1e   :  { %p4753_p10 = scmp.ne.s32.totalorder %s24_s23, %s4752_s24  ;;  %p4758_p12 = scmp.lt.s32.totalorder %s4752_s24, %s4752_s24 }
  0x20   :  { %p4759_p13 = por %p4758_p12, %p4757_p11 }
  0x22   :  { %p4760_p0 = pnand %p4759_p13, %p4753_p10 }
  0x24   :  { %4763 = shalt.err (!%p4760_p0)
}
  0x25   :  { %s4883_s25 = smov 128   ;;  %s4884_s26 = smov 8  }
  0x26   :  { %29 = dma.hbm_to_vmem [thread:$0]  %s6117_s0, 256, %s24_s23, [#allocation6], %s4883_s25, %s4883_s25, %s4884_s26  }
  0x27   :  { %s4885_s29 = smov [#allocation9]   ;;  %s4886_s4 = smov [#allocation12]  }
  0x28   :  { %s47_s30 = sshll.u32 %s4885_s29, 4  ;;  %s73_s10 = sshll.u32 %s4886_s4, 4  ;;  %s48_s30 = int_to_ptr.vmem [resolvable:$true] %s47_s30  ;;  %s74_s10 = int_to_ptr.vmem [resolvable:$true] %s73_s10 }
  0x29   :  { %s4772_s11 = scalar_lea.vmem %s48_s30, 128  ;;  %p4777_p2 = scmp.lt.s32.totalorder %s48_s30, %s48_s30 }
  0x2a   :  { %p4773_p1 = scmp.ne.s32.totalorder %s48_s30, %s4772_s11  ;;  %p4778_p3 = scmp.lt.s32.totalorder %s4772_s11, %s4772_s11 }
  0x2c   :  { %p4779_p4 = por %p4778_p3, %p4777_p2 }
  0x2e   :  { %p4780_p5 = pnand %p4779_p4, %p4773_p1 }
  0x30   :  { %4783 = shalt.err (!%p4780_p5)
}
  0x31   :  { %53 = dma.hbm_to_vmem [thread:$0]  %s6119_s2, 128, %s48_s30, [#allocation8], %s4877_s12, %s4877_s12, %s4878_s13  }
  0x32   :  { %s4792_s0 = scalar_lea.vmem %s74_s10, 4096  ;;  %p4797_p7 = scmp.lt.s32.totalorder %s74_s10, %s74_s10 }
  0x33   :  { %p4793_p6 = scmp.ne.s32.totalorder %s74_s10, %s4792_s0  ;;  %p4798_p8 = scmp.lt.s32.totalorder %s4792_s0, %s4792_s0 }
  0x35   :  { %p4799_p9 = por %p4798_p8, %p4797_p7 }
  0x37   :  { %p4800_p10 = pnand %p4799_p9, %p4793_p6 }
  0x39   :  { %4803 = shalt.err (!%p4800_p10)
}
  0x3a   :  { %79 = dma.hbm_to_vmem [thread:$0]  %s6122_s5, 4096, %s74_s10, [#allocation11], %s4880_s19, %s4880_s19, %s4881_s20  }
  0x3b   :  { %s4887_s18 = smov [#allocation13]  }
  0x3c   :  { %s86_s21 = sshll.u32 %s4887_s18, 4  ;;  %s87_s21 = int_to_ptr.vmem [resolvable:$true] %s86_s21 }
  0x3d   :  { %s4812_s22 = scalar_lea.vmem %s87_s21, 64  ;;  %p4817_p12 = scmp.lt.s32.totalorder %s87_s21, %s87_s21 }
  0x3e   :  { %p4813_p11 = scmp.ne.s32.totalorder %s87_s21, %s4812_s22  ;;  %p4818_p13 = scmp.lt.s32.totalorder %s4812_s22, %s4812_s22 }
  0x40   :  { %p4819_p0 = por %p4818_p13, %p4817_p12 }
  0x42   :  { %p4820_p1 = pnand %p4819_p0, %p4813_p11 }
  0x44   :  { %4823 = shalt.err (!%p4820_p1)
}
  0x45   :  { %89 = dma.hbm_to_vmem [thread:$0]  %s6123_s6, 64, %s87_s21, [#allocation14]  }
  0x46   :  { %4864 = dma.done.wait [#allocation6], 256  }
  0x47   :  { %4865 = vsyncadd [#allocation6], 4294967040 }
  0x48   :  { %4866 = dma.done.wait [#allocation8], 256  }
  0x49   :  { %4867 = vsyncadd [#allocation8], 4294967040 }
  0x4a   :  { %4868 = dma.done.wait [#allocation11], 6144  }
  0x4b   :  { %4869 = vsyncadd [#allocation11], 4294961152 }
  0x4c   :  { %4870 = dma.done.wait [#allocation14], 64  }
  0x4d   :  { %4871 = vsyncadd [#allocation14], 4294967232  ;;  %v6127_v0 = vmov 0.0   ;;  %vm4889_vm0 = vmmov 0   ;;  %v4979_v1 = vld [vmem:[%s6120_s3] sm:$0xf]  ;;  %v140_v45 = vlaneseq }
  0x4e   :  { %4073 = vmatprep.subr.bf16.mxu0 %v6127_v0  ;;  %4075 = vmatprep.mubr.msk.bf16.mxu0 %vm4889_vm0, %v6127_v0  ;;  %6153 = vst [vmem:[#allocation27_spill] sm:$0xff] %v4979_v1  ;;  %v4984_v2 = vld [vmem:[%s6120_s3 + $0x4] sm:$0xf]  ;;  %v132_v3 = vld [vmem:[#allocation5] sm:$0xff]  ;;  %v4186_v6 = vld [vmem:[#allocation7] sm:$0xff]   ;;  %vm204_vm1 = vcmask 130048  }
  0x4f   :  { %6154 = vst [vmem:[#allocation28_spill] sm:$0xff] %v4984_v2  ;;  %v133_v4 = vld [vmem:[#allocation5 + $0x8] sm:$0xff]  ;;  %v4187_v7 = vld [vmem:[#allocation10 + $0x64] ss:$16 sps:$4 sm:$0xff]   ;;  %v4192_v10 = vld [vmem:[#allocation10 + $0x60] ss:$16 sps:$4 sm:$0xff]  }
  0x50   :  { %v4986_v5 = vpack.c.bf16 %v133_v4, %v132_v3  ;;  %v4189_v8 = vld [vmem:[#allocation10 + $0x68] ss:$16 sps:$4 sm:$0xff]   ;;  %v4191_v9 = vld [vmem:[#allocation10 + $0x6c] ss:$16 sps:$4 sm:$0xff]   ;;  %429 = vmatprep.subr.bf16.mxu1 %v4187_v7  ;;  %v4193_v11 = vld [vmem:[#allocation10 + $0x44] ss:$16 sps:$4 sm:$0xff]  }
  0x51   :  { %430 = vmatpush1.bf16.msra.mxu1 %v4192_v10  ;;  %v4195_v12 = vld [vmem:[#allocation10 + $0x48] ss:$16 sps:$4 sm:$0xff]   ;;  %v4197_v13 = vld [vmem:[#allocation10 + $0x4c] ss:$16 sps:$4 sm:$0xff]   ;;  %v4198_v14 = vld [vmem:[#allocation10 + $0x40] ss:$16 sps:$4 sm:$0xff]  }
  0x52   :  { %6155 = vst [vmem:[#allocation29_spill] sm:$0xff] %v4986_v5  ;;  %4074 = vmatpush3.bf16.msra.mxu0 %v4986_v5  ;;  %431 = vmatprep.subr.bf16.mxu1 %v4193_v11  ;;  %v4199_v15 = vld [vmem:[#allocation10 + $0x24] ss:$16 sps:$4 sm:$0xff]   ;;  %v4203_v16 = vld [vmem:[#allocation10 + $0x2c] ss:$16 sps:$4 sm:$0xff]   ;;  %v6129_v23 = vmov 0  }
  0x53   :  { %472 = vmatprep.subr.bf16.mxu0 %v4191_v9  ;;  %v4201_v17 = vld [vmem:[#allocation10 + $0x28] ss:$16 sps:$4 sm:$0xff]   ;;  %v4204_v18 = vld [vmem:[#allocation10 + $0x20] ss:$16 sps:$4 sm:$0xff]   ;;  %v4205_v19 = vld [vmem:[#allocation10 + $0x4] ss:$16 sps:$4 sm:$0xff]   ;;  %453 = vmatprep.mubr.bf16.mxu1 %v6129_v23 }
  0x54   :  { %v4209_v20 = vld [vmem:[#allocation10 + $0xc] ss:$16 sps:$4 sm:$0xff]   ;;  %v4207_v21 = vld [vmem:[#allocation10 + $0x8] ss:$16 sps:$4 sm:$0xff]   ;;  %v4210_v22 = vld [vmem:[#allocation10] ss:$16 sps:$4 sm:$0xff]  }
  0x55   :  { %4076 = vmatmul.mubr.msk.bf16.vlgmr.msra.gmra.mxu0 %vm204_vm1, %v4186_v6  ;;  %432 = vmatpush1.bf16.msra.mxu1 %v4198_v14  ;;  %v4992_v24 = vld [vmem:[#allocation12 + $0xe4] ss:$16 sps:$4 sm:$0xff]   ;;  %vm417_vm2 = vcmask 523264   ;;  %v4995_v28 = vld [vmem:[#allocation12 + $0xe0] ss:$16 sps:$4 sm:$0xff]   ;;  %v302_v46 = vshrl.u32 %v140_v45, 7 }
  0x56   :  { %473 = vmatpush1.bf16.msra.mxu0 %v4189_v8  ;;  %433 = vmatprep.subr.bf16.mxu1 %v4199_v15  ;;  %v4997_v30 = vld [vmem:[#allocation12 + $0xc4] ss:$16 sps:$4 sm:$0xff]   ;;  %v5002_v32 = vld [vmem:[#allocation12 + $0xc0] ss:$16 sps:$4 sm:$0xff]   ;;  %v6161_v0 = vmov 0  ;;  %vm1702_vm7 = vcmask 1041408  }
  0x57   :  { %474 = vmatprep.subr.bf16.mxu0 %v4197_v13  ;;  %496 = vmatprep.mubr.bf16.mxu0 %v6129_v23  ;;  %v5006_v33 = vld [vmem:[#allocation12 + $0xa4] ss:$16 sps:$4 sm:$0xff]   ;;  %v5010_v34 = vld [vmem:[#allocation12 + $0xa0] ss:$16 sps:$4 sm:$0xff]   ;;  %v307_v48 = vsub.s32 2, %v302_v46  ;;  %v5064_v50 = vsub.s32 0, %v302_v46 }
  0x58   :  { %v5013_v35 = vld [vmem:[#allocation12 + $0x84] ss:$16 sps:$4 sm:$0xff]   ;;  %v5016_v36 = vld [vmem:[#allocation12 + $0x80] ss:$16 sps:$4 sm:$0xff]   ;;  %v315_v51 = vsub.s32 6, %v302_v46  ;;  %v311_v55 = vsub.s32 4, %v302_v46 }
  0x59   :  { %434 = vmatpush1.bf16.msra.mxu1 %v4204_v18  ;;  %v5020_v37 = vld [vmem:[#allocation12 + $0x64] ss:$16 sps:$4 sm:$0xff]   ;;  %v5022_v38 = vld [vmem:[#allocation12 + $0x60] ss:$16 sps:$4 sm:$0xff]   ;;  %6156 = vst [vmem:[#allocation30_spill] sm:$0xff] %v5064_v50  ;;  %vm1704_vm8 = vcmask 1043456  }
  0x5a   :  { %475 = vmatpush1.bf16.msra.mxu0 %v4195_v12  ;;  %435 = vmatprep.subr.bf16.mxu1 %v4205_v19  ;;  %v5026_v39 = vld [vmem:[#allocation12 + $0x44] ss:$16 sps:$4 sm:$0xff]   ;;  %v5028_v40 = vld [vmem:[#allocation12 + $0x40] ss:$16 sps:$4 sm:$0xff]   ;;  %v5091_v19 = vld [vmem:[#allocation9] sm:$0xff]   ;;  %vm1706_vm9 = vcmask 1045504  }
  0x5b   :  { %476 = vmatprep.subr.bf16.mxu0 %v4203_v16  ;;  %v5032_v41 = vld [vmem:[#allocation12 + $0x24] ss:$16 sps:$4 sm:$0xff]   ;;  %v5034_v42 = vld [vmem:[#allocation12 + $0x20] ss:$16 sps:$4 sm:$0xff]   ;;  %6157 = vst [vmem:[#allocation31_spill] sm:$0xff] %v5091_v19  ;;  %s4891_s3 = smov [#allocation2]  }
  0x5c   :  { %v5038_v43 = vld [vmem:[#allocation12 + $0x4] ss:$16 sps:$4 sm:$0xff]   ;;  %v5040_v44 = vld [vmem:[#allocation12] ss:$16 sps:$4 sm:$0xff]   ;;  %v5120_v46 = vld [vmem:[#allocation12 + $0x8c] ss:$16 sps:$4 sm:$0xff]  }
  0x5d   :  { %436 = vmatpush1.bf16.msra.mxu1 %v4210_v22  ;;  %v297_v47 = vld [vmem:[#allocation13] sm:$0xf]  ;;  %s116_s20 = sshll.u32 %s4891_s3, 4  ;;  %s4892_s1 = smov [#allocation3]   ;;  %s117_s20 = int_to_ptr.vmem [resolvable:$true] %s116_s20 }
  0x5e   :  { %477 = vmatpush1.bf16.msra.mxu0 %v4201_v17  ;;  %773 = vmatprep.subr.bf16.mxu1 %v4992_v24  ;;  %v299_v49 = vunpack.c.l.bf16 %v297_v47  ;;  %v5123_v47 = vld [vmem:[#allocation12 + $0x88] ss:$16 sps:$4 sm:$0xff]   ;;  %s128_s23 = sshll.u32 %s4892_s1, 4  ;;  %s4832_s24 = scalar_lea.vmem %s117_s20, 8704  ;;  %s129_s23 = int_to_ptr.vmem [resolvable:$true] %s128_s23 }
  0x5f   :  { %478 = vmatprep.subr.bf16.mxu0 %v4209_v20  ;;  %p4833_p2 = scmp.ne.s32.totalorder %s117_s20, %s4832_s24  ;;  %p4837_p3 = scmp.lt.s32.totalorder %s117_s20, %s117_s20 }
  0x60   :  { %v308_v52 = vrot.slane %v299_v49, %v307_v48  ;;  %v304_v53 = vrot.slane %v299_v49, %v5064_v50  ;;  %v316_v57 = vrot.slane %v299_v49, %v315_v51  ;;  %v312_v62 = vrot.slane %v299_v49, %v311_v55  ;;  %v5126_v48 = vld [vmem:[#allocation12 + $0x6c] ss:$16 sps:$4 sm:$0xff]   ;;  %v5129_v49 = vld [vmem:[#allocation12 + $0x68] ss:$16 sps:$4 sm:$0xff]   ;;  %p4838_p4 = scmp.lt.s32.totalorder %s4832_s24, %s4832_s24 }
  0x61   :  { %v5132_v51 = vld [vmem:[#allocation12 + $0x4c] ss:$16 sps:$4 sm:$0xff]  }
  0x62   :  { %479 = vmatpush1.bf16.msra.mxu0 %v4207_v21  ;;  %v328_v60 = vrot.slane %v308_v52, %v5064_v50  ;;  %v324_v61 = vrot.slane %v304_v53, %v5064_v50  ;;  %v336_v4 = vrot.slane %v316_v57, %v5064_v50  ;;  %v332_v13 = vrot.slane %v312_v62, %v5064_v50  ;;  %v5095_v21 = vld [vmem:[#allocation12 + $0xec] ss:$16 sps:$4 sm:$0xff]   ;;  %v5135_v52 = vld [vmem:[#allocation12 + $0x48] ss:$16 sps:$4 sm:$0xff]   ;;  %p4839_p5 = por %p4838_p4, %p4837_p3 }
  0x63   :  { %v5138_v53 = vld [vmem:[#allocation12 + $0x2c] ss:$16 sps:$4 sm:$0xff]  }
  0x64   :  { %v5144_v55 = vld [vmem:[#allocation12 + $0xc] ss:$16 sps:$4 sm:$0xff]   ;;  %p4840_p6 = pnand %p4839_p5, %p4833_p2 }
 0x115   :  { %v242_v25 = vpop.f32.mrf.mxu0 }
 0x117   :  { %v4077_v26 = vpop.f32.mrf.mxu0 }
 0x118   :  { %v5105_v26 = vld [vmem:[#allocation12 + $0xcc] ss:$16 sps:$4 sm:$0xff]  }
 0x119   :  { %v245_v27 = vpop.f32.mrf.mxu0 }
 0x11a   :  { %v298_v29 = vpack.c.bf16 %v245_v27, %v242_v25  ;;  %v5103_v25 = vld [vmem:[#allocation12 + $0xe8] ss:$16 sps:$4 sm:$0xff]  }
 0x11b   :  { %v4078_v31 = vpop.f32.mrf.mxu0  ;;  %v5110_v27 = vld [vmem:[#allocation12 + $0xc8] ss:$16 sps:$4 sm:$0xff]  }
 0x11c   :  { %3847 = vmatmul.mubr.msk.bf16.vlgmr.msra.gmra.mxu1 %vm417_vm2, %v298_v29  ;;  %3848 = vmatmul.mubr.msk.bf16.vlgmr.msra.gmra.mxu0 %vm417_vm2, %v298_v29  ;;  %v5114_v29 = vld [vmem:[#allocation12 + $0xac] ss:$16 sps:$4 sm:$0xff]   ;;  %v5117_v31 = vld [vmem:[#allocation12 + $0xa8] ss:$16 sps:$4 sm:$0xff]  }
 0x11d   :  { %774 = vmatpush1.bf16.msra.mxu1 %v4995_v28  ;;  %551 = vmatprep.mubr.bf16.mxu0 %v6129_v23 }
 0x11e   :  { %775 = vmatprep.subr.bf16.mxu1 %v4997_v30  ;;  %805 = vmatprep.mubr.bf16.mxu1 %v6129_v23 }
 0x121   :  { %776 = vmatpush1.bf16.msra.mxu1 %v5002_v32 }
 0x122   :  { %777 = vmatprep.subr.bf16.mxu1 %v5006_v33 }
 0x125   :  { %778 = vmatpush1.bf16.msra.mxu1 %v5010_v34 }
 0x126   :  { %779 = vmatprep.subr.bf16.mxu1 %v5013_v35 }
 0x129   :  { %780 = vmatpush1.bf16.msra.mxu1 %v5016_v36 }
 0x12a   :  { %781 = vmatprep.subr.bf16.mxu1 %v5020_v37 }
 0x12d   :  { %782 = vmatpush1.bf16.msra.mxu1 %v5022_v38 }
 0x12e   :  { %783 = vmatprep.subr.bf16.mxu1 %v5026_v39 }
 0x131   :  { %784 = vmatpush1.bf16.msra.mxu1 %v5028_v40 }
 0x132   :  { %785 = vmatprep.subr.bf16.mxu1 %v5032_v41 }
 0x135   :  { %786 = vmatpush1.bf16.msra.mxu1 %v5034_v42 }
 0x136   :  { %787 = vmatprep.subr.bf16.mxu1 %v5038_v43 }
 0x139   :  { %788 = vmatpush1.bf16.msra.mxu1 %v5040_v44 }
 0x13a   :  { %892 = vmatprep.subr.bf16.mxu1 %v4992_v24 }
 0x13c   :  { %806 = vmatmul.mubr.bf16.vlgmr.msra.gmra.mxu1 %v6129_v23 }
 0x13d   :  { %893 = vmatpush1.bf16.msra.mxu1 %v4995_v28  ;;  %924 = vmatprep.mubr.bf16.mxu1 %v6129_v23 }
 0x13e   :  { %894 = vmatprep.subr.bf16.mxu1 %v4997_v30 }
 0x141   :  { %895 = vmatpush1.bf16.msra.mxu1 %v5002_v32 }
 0x142   :  { %896 = vmatprep.subr.bf16.mxu1 %v5006_v33 }
 0x145   :  { %897 = vmatpush1.bf16.msra.mxu1 %v5010_v34 }
 0x146   :  { %898 = vmatprep.subr.bf16.mxu1 %v5013_v35 }
 0x149   :  { %899 = vmatpush1.bf16.msra.mxu1 %v5016_v36 }
 0x14a   :  { %900 = vmatprep.subr.bf16.mxu1 %v5020_v37 }
 0x14d   :  { %901 = vmatpush1.bf16.msra.mxu1 %v5022_v38 }
 0x14e   :  { %902 = vmatprep.subr.bf16.mxu1 %v5026_v39 }
 0x151   :  { %903 = vmatpush1.bf16.msra.mxu1 %v5028_v40 }
 0x152   :  { %904 = vmatprep.subr.bf16.mxu1 %v5032_v41 }
 0x155   :  { %905 = vmatpush1.bf16.msra.mxu1 %v5034_v42 }
 0x156   :  { %906 = vmatprep.subr.bf16.mxu1 %v5038_v43 }
 0x159   :  { %907 = vmatpush1.bf16.msra.mxu1 %v5040_v44 }
 0x15a   :  { %1007 = vmatprep.subr.bf16.mxu1 %v4992_v24 }
 0x1dc   :  { %v455_v54 = vpop.f32.mrf.mxu1  ;;  %v498_v56 = vpop.f32.mrf.mxu0 }
 0x1dd   :  { %v5078_v12 = vadd.f32 %v455_v54, %v324_v61  ;;  %v5093_v20 = vadd.f32 %v498_v56, %v332_v13  ;;  %v5141_v54 = vld [vmem:[#allocation12 + $0x28] ss:$16 sps:$4 sm:$0xff]  }
 0x1de   :  { %v457_v58 = vpop.f32.mrf.mxu1  ;;  %v500_v59 = vpop.f32.mrf.mxu0  ;;  %v5147_v56 = vld [vmem:[#allocation12 + $0x8] ss:$16 sps:$4 sm:$0xff]  }
 0x1df   :  { %v5072_v9 = vadd.f32 %v457_v58, %v328_v60  ;;  %v5081_v14 = vadd.f32 %v500_v59, %v336_v4 }
 0x1e0   :  { %v459_v63 = vpop.f32.mrf.mxu1  ;;  %v502_v3 = vpop.f32.mrf.mxu0 }
 0x1e1   :  { %v5070_v6 = vadd.f32 %v459_v63, %v324_v61  ;;  %v5087_v17 = vadd.f32 %v502_v3, %v332_v13  ;;  %v5171_v61 = vand.u32 127, %v140_v45  ;;  %v6158_v13 = vmov 0 }
 0x1e2   :  { %v461_v7 = vpop.f32.mrf.mxu1  ;;  %v504_v8 = vpop.f32.mrf.mxu0 }
 0x1e3   :  { %v5074_v10 = vadd.f32 %v461_v7, %v328_v60  ;;  %v5076_v11 = vadd.f32 %v504_v8, %v336_v4  ;;  %v507_v16 = vpack.c.bf16 %v5070_v6, %v5078_v12  ;;  %v509_v22 = vpack.c.bf16 %v5087_v17, %v5093_v20 }
 0x1e4   :  { %v142_v62 = vadd.s32 128, %v5171_v61  ;;  %v143_v8 = vadd.s32 256, %v5171_v61  ;;  %vm193_vm4 = vcmp.lt.s32.totalorder %v5171_v61, 64 }
 0x1e5   :  { %v508_v15 = vpack.c.bf16 %v5074_v10, %v5072_v9  ;;  %v510_v18 = vpack.c.bf16 %v5076_v11, %v5081_v14 }
 0x1e6   :  { %v156_v3 = vand.u32 127, %v142_v62 }
 0x1e7   :  { %533 = vmatprep.subr.bf16.mxu0 %v508_v15 }
 0x1e8   :  { %534 = vmatpush1.bf16.msra.mxu0 %v507_v16  ;;  %vm5177_vm3 = vcmp.lt.s32.totalorder %v156_v3, 64  ;;  %v144_v16 = vadd.s32 384, %v5171_v61 }
 0x1e9   :  { %576 = vmatprep.subr.bf16.mxu0 %v510_v18  ;;  %v6159_v13 = vsel %vm5177_vm3, 4294967295, %v6158_v13  ;;  %v163_v18 = vand.u32 127, %v143_v8 }
 0x1ea   :  { %6160 = vst [vmem:[#allocation32_spill] sm:$0xff] %v6159_v13 }
 0x1eb   :  { %3850 = vmatmul.mubr.msk.bf16.vlgmr.msra.gmra.mxu0 %vm204_vm1, %v5091_v19  ;;  %vm5198_vm5 = vcmp.lt.s32.totalorder %v163_v18, 64 }
 0x1ec   :  { %577 = vmatpush1.bf16.msra.mxu0 %v509_v22  ;;  %594 = vmatprep.mubr.bf16.mxu0 %v6129_v23  ;;  %v6162_v0 = vsel %vm5198_vm5, 4294967295, %v6161_v0 }
 0x1ed   :  { %814 = vmatprep.subr.bf16.mxu0 %v5095_v21  ;;  %6163 = vst [vmem:[#allocation33_spill] sm:$0xff] %v6162_v0 }
 0x1f3   :  { %3851 = vmatmul.mubr.msk.bf16.vlgmr.msra.gmra.mxu0 %vm204_vm1, %v5091_v19 }
 0x1f4   :  { %815 = vmatpush1.bf16.msra.mxu0 %v5103_v25  ;;  %846 = vmatprep.mubr.bf16.mxu0 %v6129_v23 }
 0x1f5   :  { %816 = vmatprep.subr.bf16.mxu0 %v5105_v26 }
 0x1f8   :  { %817 = vmatpush1.bf16.msra.mxu0 %v5110_v27 }
 0x1f9   :  { %818 = vmatprep.subr.bf16.mxu0 %v5114_v29 }
 0x1fc   :  { %819 = vmatpush1.bf16.msra.mxu0 %v5117_v31  ;;  %v807_v57 = vpop.f32.mrf.mxu1 }
 0x1fd   :  { %820 = vmatprep.subr.bf16.mxu0 %v5120_v46 }
 0x1fe   :  { %v809_v58 = vpop.f32.mrf.mxu1 }
 0x200   :  { %821 = vmatpush1.bf16.msra.mxu0 %v5123_v47  ;;  %v811_v59 = vpop.f32.mrf.mxu1 }
 0x201   :  { %822 = vmatprep.subr.bf16.mxu0 %v5126_v48 }
 0x202   :  { %v812_v60 = vpop.f32.mrf.mxu1 }
 0x203   :  { %v170_v60 = vand.u32 127, %v144_v16 }
 0x204   :  { %823 = vmatpush1.bf16.msra.mxu0 %v5129_v49 }
 0x205   :  { %824 = vmatprep.subr.bf16.mxu0 %v5132_v51  ;;  %vm5209_vm6 = vcmp.lt.s32.totalorder %v170_v60, 64 }
 0x208   :  { %825 = vmatpush1.bf16.msra.mxu0 %v5135_v52 }
 0x209   :  { %826 = vmatprep.subr.bf16.mxu0 %v5138_v53 }
 0x20c   :  { %827 = vmatpush1.bf16.msra.mxu0 %v5141_v54 }
 0x20d   :  { %828 = vmatprep.subr.bf16.mxu0 %v5144_v55 }
 0x210   :  { %829 = vmatpush1.bf16.msra.mxu0 %v5147_v56 }
 0x211   :  { %933 = vmatprep.subr.bf16.mxu0 %v5095_v21 }
 0x213   :  { %847 = vmatmul.mubr.bf16.vlgmr.msra.gmra.mxu0 %v6129_v23 }
 0x214   :  { %934 = vmatpush1.bf16.msra.mxu0 %v5103_v25  ;;  %965 = vmatprep.mubr.bf16.mxu0 %v6129_v23 }
 0x215   :  { %935 = vmatprep.subr.bf16.mxu0 %v5105_v26 }
 0x218   :  { %936 = vmatpush1.bf16.msra.mxu0 %v5110_v27 }
 0x219   :  { %937 = vmatprep.subr.bf16.mxu0 %v5114_v29 }
 0x21c   :  { %938 = vmatpush1.bf16.msra.mxu0 %v5117_v31 }
 0x21d   :  { %939 = vmatprep.subr.bf16.mxu0 %v5120_v46 }
 0x220   :  { %940 = vmatpush1.bf16.msra.mxu0 %v5123_v47 }
 0x221   :  { %941 = vmatprep.subr.bf16.mxu0 %v5126_v48 }
 0x224   :  { %942 = vmatpush1.bf16.msra.mxu0 %v5129_v49 }
 0x225   :  { %943 = vmatprep.subr.bf16.mxu0 %v5132_v51 }
 0x228   :  { %944 = vmatpush1.bf16.msra.mxu0 %v5135_v52 }
 0x229   :  { %945 = vmatprep.subr.bf16.mxu0 %v5138_v53 }
 0x22c   :  { %946 = vmatpush1.bf16.msra.mxu0 %v5141_v54 }
 0x22d   :  { %947 = vmatprep.subr.bf16.mxu0 %v5144_v55 }
 0x230   :  { %948 = vmatpush1.bf16.msra.mxu0 %v5147_v56 }
 0x231   :  { %1048 = vmatprep.subr.bf16.mxu0 %v5095_v21 }
 0x2ab   :  { %v553_v63 = vpop.f32.mrf.mxu0 }
 0x2ac   :  { %v5196_v3 = vsel %vm193_vm4, %v5078_v12, %v553_v63 }
 0x2ad   :  { %v555_v4 = vpop.f32.mrf.mxu0 }
 0x2ae   :  { %v5191_v59 = vsel %vm5177_vm3, %v5072_v9, %v555_v4  ;;  %v808_v9 = vadd.f32 %v807_v57, %v5196_v3  ;;  %v6165_v4 = vmov 0 }
 0x2af   :  { %v5174_v7 = vpop.f32.mrf.mxu0  ;;  %v810_v8 = vadd.f32 %v809_v58, %v5191_v59  ;;  %v6166_v4 = vsel %vm5209_vm6, 4294967295, %v6165_v4 }
 0x2b0   :  { %6167 = vst [vmem:[#allocation35_spill] sm:$0xff] %v6166_v4  ;;  %v3884_v18 = vmul.f32 -1.442695, %v808_v9 }
 0x2b1   :  { %v559_v15 = vpop.f32.mrf.mxu0  ;;  %v3885_v16 = vmul.f32 -1.442695, %v810_v8 }
 0x2b2   :  { %v5185_v45 = vsel %vm5177_vm3, %v5074_v10, %v559_v15 }
 0x2b3   :  { %v596_v22 = vpop.f32.mrf.mxu0  ;;  %4260 = vpow2.f32 %v3885_v16 }
 0x2b4   :  { %4262 = vpow2.f32 %v3884_v18  ;;  %v5221_v57 = vsel %vm5198_vm5, %v5093_v20, %v596_v22 }
 0x2b5   :  { %v598_v62 = vpop.f32.mrf.mxu0  ;;  %v886_v13 = vrot.slane %v5221_v57, 2 }
 0x2b7   :  { %v600_v10 = vpop.f32.mrf.mxu0 }
 0x2b8   :  { %v5206_v15 = vsel %vm5198_vm5, %v5087_v17, %v600_v10 }
 0x2b9   :  { %6164 = vst [vmem:[#allocation34_spill] sm:$0xff] %v5206_v15  ;;  %v602_v12 = vpop.f32.mrf.mxu0 }
 0x2ba   :  { %v5216_v63 = vsel %vm5209_vm6, %v5076_v11, %v602_v12  ;;  %v5227_v11 = vsel %vm5209_vm6, %v5081_v14, %v598_v62 }
 0x2bb   :  { %6168 = vst [vmem:[#allocation36_spill] sm:$0xff] %v5216_v63  ;;  %v887_v0 = vrot.slane %v5227_v11, 2 }
 0x2c0   :  { %v4261_v58 = vpop.eup %4260 }
 0x2c1   :  { %v4263_v23 = vpop.eup %4262  ;;  %v864_v17 = vadd.f32 1.0, %v4261_v58 }
 0x2c2   :  { %v858_v10 = vadd.f32 1.0, %v4263_v23 }
 0x2c3   :  { %4264 = vrcp.f32 %v864_v17 }
 0x2c4   :  { %4266 = vrcp.f32 %v858_v10 }
 0x2d0   :  { %v4265_v20 = vpop.eup %4264 }
 0x2d1   :  { %v4267_v22 = vpop.eup %4266  ;;  %v874_v58 = vmul.f32 0.0, %v4265_v20  ;;  %v885_v20 = vrot.slane %v5191_v59, 2 }
 0x2d3   :  { %v848_v60 = vpop.f32.mrf.mxu0 }
 0x2d4   :  { %v849_v5 = vadd.f32 %v848_v60, %v5221_v57 }
 0x2d5   :  { %v850_v8 = vpop.f32.mrf.mxu0 }
 0x2d6   :  { %4268 = vtanh.f32 %v849_v5  ;;  %v851_v9 = vadd.f32 %v850_v8, %v5227_v11 }
 0x2d7   :  { %v852_v23 = vpop.f32.mrf.mxu0 }
 0x2d8   :  { %v3886_v12 = vmul.f32 -1.442695, %v851_v9  ;;  %v6169_v9 = vmov 0  }
 0x2d9   :  { %v853_v16 = vpop.f32.mrf.mxu0 }
 0x2da   :  { %4270 = vpow2.f32 %v3886_v12 }
 0x2e3   :  { %v4269_v18 = vpop.eup %4268 }
 0x2e4   :  { %v875_v17 = vmul.f32 %v4269_v18, %v4267_v22 }
 0x2e6   :  { %v5230_v60 = vadd.f32 %v875_v17, %v874_v58 }
 0x2e7   :  { %v4271_v10 = vpop.eup %4270 }
 0x2e8   :  { %v871_v1 = vadd.f32 1.0, %v4271_v10  ;;  %4272 = vtanh.f32 %v5230_v60 }
 0x2ea   :  { %4274 = vrcp.f32 %v871_v1  ;;  %v884_v1 = vrot.slane %v5196_v3, 2 }
 0x2f5   :  { %v4273_v14 = vpop.eup %4272 }
 0x2f7   :  { %v4275_v5 = vpop.eup %4274 }
 0x2f8   :  { %v5233_v62 = vmul.f32 %v4275_v5, %v4273_v14 }
 0x2fa   :  { %v879_v8 = vpack.c.bf16 %v5233_v62, %v5233_v62 }
 0x2fc   :  { %925 = vmatmul.mubr.bf16.vlgmr.msra.gmra.mxu1 %v879_v8  ;;  %966 = vmatmul.mubr.bf16.vlgmr.msra.gmra.mxu0 %v879_v8 }
 0x2fd   :  { %1008 = vmatpush1.bf16.msra.mxu1 %v4995_v28  ;;  %1049 = vmatpush1.bf16.msra.mxu0 %v5103_v25 }
 0x2fe   :  { %1009 = vmatprep.subr.bf16.mxu1 %v4997_v30  ;;  %1050 = vmatprep.subr.bf16.mxu0 %v5105_v26 }
 0x2ff   :  { %1039 = vmatprep.mubr.bf16.mxu1 %v6169_v9  ;;  %1080 = vmatprep.mubr.bf16.mxu0 %v6169_v9 }
 0x301   :  { %1010 = vmatpush1.bf16.msra.mxu1 %v5002_v32  ;;  %1051 = vmatpush1.bf16.msra.mxu0 %v5110_v27 }
 0x302   :  { %1011 = vmatprep.subr.bf16.mxu1 %v5006_v33  ;;  %1052 = vmatprep.subr.bf16.mxu0 %v5114_v29 }
 0x305   :  { %1012 = vmatpush1.bf16.msra.mxu1 %v5010_v34  ;;  %1053 = vmatpush1.bf16.msra.mxu0 %v5117_v31 }
 0x306   :  { %1013 = vmatprep.subr.bf16.mxu1 %v5013_v35  ;;  %1054 = vmatprep.subr.bf16.mxu0 %v5120_v46 }
 0x309   :  { %1014 = vmatpush1.bf16.msra.mxu1 %v5016_v36  ;;  %1055 = vmatpush1.bf16.msra.mxu0 %v5123_v47 }
 0x30a   :  { %1015 = vmatprep.subr.bf16.mxu1 %v5020_v37  ;;  %1056 = vmatprep.subr.bf16.mxu0 %v5126_v48 }
 0x30d   :  { %1016 = vmatpush1.bf16.msra.mxu1 %v5022_v38  ;;  %1057 = vmatpush1.bf16.msra.mxu0 %v5129_v49 }
 0x30e   :  { %1017 = vmatprep.subr.bf16.mxu1 %v5026_v39  ;;  %1058 = vmatprep.subr.bf16.mxu0 %v5132_v51 }
 0x311   :  { %1018 = vmatpush1.bf16.msra.mxu1 %v5028_v40  ;;  %1059 = vmatpush1.bf16.msra.mxu0 %v5135_v52 }
 0x312   :  { %1019 = vmatprep.subr.bf16.mxu1 %v5032_v41  ;;  %1060 = vmatprep.subr.bf16.mxu0 %v5138_v53 }
 0x315   :  { %1020 = vmatpush1.bf16.msra.mxu1 %v5034_v42  ;;  %1061 = vmatpush1.bf16.msra.mxu0 %v5141_v54 }
 0x316   :  { %1021 = vmatprep.subr.bf16.mxu1 %v5038_v43  ;;  %1062 = vmatprep.subr.bf16.mxu0 %v5144_v55 }
 0x319   :  { %1022 = vmatpush1.bf16.msra.mxu1 %v5040_v44  ;;  %1063 = vmatpush1.bf16.msra.mxu0 %v5147_v56 }
 0x31a   :  { %1122 = vmatprep.subr.bf16.mxu1 %v4992_v24  ;;  %1163 = vmatprep.subr.bf16.mxu0 %v5095_v21 }
 0x3bc   :  { %v926_v23 = vpop.f32.mrf.mxu1  ;;  %v967_v12 = vpop.f32.mrf.mxu0 }
 0x3bd   :  { %v927_v16 = vadd.f32 %v926_v23, %v884_v1  ;;  %v968_v19 = vadd.f32 %v967_v12, %v886_v13 }
 0x3be   :  { %v928_v22 = vpop.f32.mrf.mxu1  ;;  %v969_v18 = vpop.f32.mrf.mxu0 }
 0x3bf   :  { %v3887_v58 = vmul.f32 -1.442695, %v927_v16  ;;  %v929_v17 = vadd.f32 %v928_v22, %v885_v20  ;;  %v970_v4 = vadd.f32 %v969_v18, %v887_v0 }
 0x3c0   :  { %v930_v10 = vpop.f32.mrf.mxu1  ;;  %v971_v14 = vpop.f32.mrf.mxu0 }
 0x3c1   :  { %4276 = vpow2.f32 %v3887_v58  ;;  %v3888_v5 = vmul.f32 -1.442695, %v929_v17  ;;  %v3889_v1 = vmul.f32 -1.442695, %v970_v4 }
 0x3c2   :  { %v931_v8 = vpop.f32.mrf.mxu1  ;;  %v972_v2 = vpop.f32.mrf.mxu0 }
 0x3c3   :  { %4278 = vpow2.f32 %v3888_v5  ;;  %v1000_v5 = vrot.slane %v5191_v59, 4 }
 0x3c4   :  { %4280 = vtanh.f32 %v968_v19 }
 0x3c5   :  { %4282 = vpow2.f32 %v3889_v1 }
 0x3ce   :  { %v4277_v23 = vpop.eup %4276 }
 0x3cf   :  { %v977_v50 = vadd.f32 1.0, %v4277_v23 }
 0x3d0   :  { %v4279_v15 = vpop.eup %4278 }
 0x3d1   :  { %4284 = vrcp.f32 %v977_v50  ;;  %v983_v16 = vadd.f32 1.0, %v4279_v15  ;;  %v4281_v20 = vpop.eup %4280  ;;  %v999_v15 = vrot.slane %v5196_v3, 4 }
 0x3d2   :  { %v4283_v22 = vpop.eup %4282 }
 0x3d3   :  { %4286 = vrcp.f32 %v983_v16  ;;  %v990_v10 = vadd.f32 1.0, %v4283_v22 }
 0x3d5   :  { %4288 = vrcp.f32 %v990_v10  ;;  %v1002_v10 = vrot.slane %v5227_v11, 4 }
 0x3de   :  { %v4285_v58 = vpop.eup %4284 }
 0x3df   :  { %v994_v2 = vmul.f32 %v4285_v58, %v4281_v20 }
 0x3e0   :  { %v4287_v17 = vpop.eup %4286 }
 0x3e1   :  { %v993_v0 = vmul.f32 %v4287_v17, %v5230_v60 }
 0x3e2   :  { %v4289_v13 = vpop.eup %4288 }
 0x3e3   :  { %v5276_v18 = vadd.f32 %v994_v2, %v993_v0 }
 0x3e5   :  { %4290 = vtanh.f32 %v5276_v18 }
 0x3f2   :  { %v4291_v19 = vpop.eup %4290 }
 0x3f3   :  { %v5279_v4 = vmul.f32 %v4291_v19, %v4289_v13  ;;  %v1001_v13 = vrot.slane %v5221_v57, 4 }
 0x3f5   :  { %v998_v50 = vpack.c.bf16 %v5279_v4, %v5279_v4 }
 0x3f7   :  { %1040 = vmatmul.mubr.bf16.vlgmr.msra.gmra.mxu1 %v998_v50  ;;  %1081 = vmatmul.mubr.bf16.vlgmr.msra.gmra.mxu0 %v998_v50 }
 0x3f8   :  { %1123 = vmatpush1.bf16.msra.mxu1 %v4995_v28  ;;  %1164 = vmatpush1.bf16.msra.mxu0 %v5103_v25 }
 0x3f9   :  { %1124 = vmatprep.subr.bf16.mxu1 %v4997_v30  ;;  %1165 = vmatprep.subr.bf16.mxu0 %v5105_v26 }
 0x3fa   :  { %1154 = vmatprep.mubr.bf16.mxu1 %v6169_v9  ;;  %1195 = vmatprep.mubr.bf16.mxu0 %v6169_v9 }
 0x3fc   :  { %1125 = vmatpush1.bf16.msra.mxu1 %v5002_v32  ;;  %1166 = vmatpush1.bf16.msra.mxu0 %v5110_v27 }
 0x3fd   :  { %1126 = vmatprep.subr.bf16.mxu1 %v5006_v33  ;;  %1167 = vmatprep.subr.bf16.mxu0 %v5114_v29 }
 0x400   :  { %1127 = vmatpush1.bf16.msra.mxu1 %v5010_v34  ;;  %1168 = vmatpush1.bf16.msra.mxu0 %v5117_v31 }
 0x401   :  { %1128 = vmatprep.subr.bf16.mxu1 %v5013_v35  ;;  %1169 = vmatprep.subr.bf16.mxu0 %v5120_v46 }
 0x404   :  { %1129 = vmatpush1.bf16.msra.mxu1 %v5016_v36  ;;  %1170 = vmatpush1.bf16.msra.mxu0 %v5123_v47 }
 0x405   :  { %1130 = vmatprep.subr.bf16.mxu1 %v5020_v37  ;;  %1171 = vmatprep.subr.bf16.mxu0 %v5126_v48 }
 0x408   :  { %1131 = vmatpush1.bf16.msra.mxu1 %v5022_v38  ;;  %1172 = vmatpush1.bf16.msra.mxu0 %v5129_v49 }
 0x409   :  { %1132 = vmatprep.subr.bf16.mxu1 %v5026_v39  ;;  %1173 = vmatprep.subr.bf16.mxu0 %v5132_v51 }
 0x40c   :  { %1133 = vmatpush1.bf16.msra.mxu1 %v5028_v40  ;;  %1174 = vmatpush1.bf16.msra.mxu0 %v5135_v52 }
 0x40d   :  { %1134 = vmatprep.subr.bf16.mxu1 %v5032_v41  ;;  %1175 = vmatprep.subr.bf16.mxu0 %v5138_v53 }
 0x410   :  { %1135 = vmatpush1.bf16.msra.mxu1 %v5034_v42  ;;  %1176 = vmatpush1.bf16.msra.mxu0 %v5141_v54 }
 0x411   :  { %1136 = vmatprep.subr.bf16.mxu1 %v5038_v43  ;;  %1177 = vmatprep.subr.bf16.mxu0 %v5144_v55 }
 0x414   :  { %1137 = vmatpush1.bf16.msra.mxu1 %v5040_v44  ;;  %1178 = vmatpush1.bf16.msra.mxu0 %v5147_v56 }
 0x415   :  { %1229 = vmatprep.subr.bf16.mxu1 %v4992_v24  ;;  %1270 = vmatprep.subr.bf16.mxu0 %v5095_v21 }
 0x4b7   :  { %v1041_v60 = vpop.f32.mrf.mxu1  ;;  %v1082_v12 = vpop.f32.mrf.mxu0 }
 0x4b8   :  { %v1042_v14 = vadd.f32 %v1041_v60, %v999_v15  ;;  %v1083_v19 = vadd.f32 %v1082_v12, %v1001_v13 }
 0x4b9   :  { %v1043_v8 = vpop.f32.mrf.mxu1  ;;  %v1084_v1 = vpop.f32.mrf.mxu0 }
 0x4ba   :  { %v3890_v23 = vmul.f32 -1.442695, %v1042_v14  ;;  %v1044_v16 = vadd.f32 %v1043_v8, %v1000_v5  ;;  %v1085_v0 = vadd.f32 %v1084_v1, %v1002_v10 }
 0x4bb   :  { %v1045_v20 = vpop.f32.mrf.mxu1  ;;  %v1086_v22 = vpop.f32.mrf.mxu0 }
 0x4bc   :  { %4292 = vpow2.f32 %v3890_v23  ;;  %v3891_v58 = vmul.f32 -1.442695, %v1044_v16  ;;  %v3892_v50 = vmul.f32 -1.442695, %v1085_v0 }
 0x4bd   :  { %v1046_v2 = vpop.f32.mrf.mxu1  ;;  %v1087_v17 = vpop.f32.mrf.mxu0 }
 0x4be   :  { %4294 = vpow2.f32 %v3891_v58  ;;  %v1685_v17 = vrot.slane %v5279_v4, 6 }
 0x4bf   :  { %4296 = vtanh.f32 %v1083_v19 }
 0x4c0   :  { %4298 = vpow2.f32 %v3892_v50  ;;  %v1703_v13 = vsel %vm1702_vm7, %v5233_v62, %v1685_v17  ;;  %v1114_v62 = vrot.slane %v5196_v3, 6  ;;  %v1116_v3 = vrot.slane %v5221_v57, 6 }
 0x4c9   :  { %v4293_v15 = vpop.eup %4292 }
 0x4ca   :  { %v1092_v60 = vadd.f32 1.0, %v4293_v15  ;;  %v1115_v15 = vrot.slane %v5191_v59, 6 }
 0x4cb   :  { %v4295_v63 = vpop.eup %4294 }
 0x4cc   :  { %4300 = vrcp.f32 %v1092_v60  ;;  %v1098_v14 = vadd.f32 1.0, %v4295_v63  ;;  %v4297_v5 = vpop.eup %4296 }
 0x4cd   :  { %v4299_v8 = vpop.eup %4298 }
 0x4ce   :  { %4302 = vrcp.f32 %v1098_v14  ;;  %v1105_v22 = vadd.f32 1.0, %v4299_v8 }
 0x4d0   :  { %4304 = vrcp.f32 %v1105_v22 }
 0x4d9   :  { %v4301_v23 = vpop.eup %4300 }
 0x4da   :  { %v1109_v16 = vmul.f32 %v4301_v23, %v4297_v5 }
 0x4db   :  { %v4303_v20 = vpop.eup %4302 }
 0x4dc   :  { %v1108_v1 = vmul.f32 %v4303_v20, %v5276_v18 }
 0x4dd   :  { %v4305_v12 = vpop.eup %4304 }
 0x4de   :  { %v5322_v58 = vadd.f32 %v1109_v16, %v1108_v1 }
 0x4e0   :  { %4306 = vtanh.f32 %v5322_v58 }
 0x4ed   :  { %v4307_v2 = vpop.eup %4306 }
 0x4ee   :  { %v1112_v10 = vmul.f32 %v4307_v2, %v4305_v12  ;;  %v1117_v12 = vrot.slane %v5227_v11, 6 }
 0x4f0   :  { %v1113_v63 = vpack.c.bf16 %v1112_v10, %v1112_v10  ;;  %v1688_v0 = vrot.slane %v1112_v10, 4 }
 0x4f2   :  { %1155 = vmatmul.mubr.bf16.vlgmr.msra.gmra.mxu1 %v1113_v63  ;;  %1196 = vmatmul.mubr.bf16.vlgmr.msra.gmra.mxu0 %v1113_v63  ;;  %v5329_v18 = vsel %vm1704_vm8, %v1703_v13, %v1688_v0 }
 0x4f3   :  { %1230 = vmatpush1.bf16.msra.mxu1 %v4995_v28  ;;  %1271 = vmatpush1.bf16.msra.mxu0 %v5103_v25 }
 0x4f4   :  { %1231 = vmatprep.subr.bf16.mxu1 %v4997_v30  ;;  %1272 = vmatprep.subr.bf16.mxu0 %v5105_v26 }
 0x4f5   :  { %1261 = vmatprep.mubr.bf16.mxu1 %v6169_v9  ;;  %1302 = vmatprep.mubr.bf16.mxu0 %v6169_v9 }
 0x4f7   :  { %1232 = vmatpush1.bf16.msra.mxu1 %v5002_v32  ;;  %1273 = vmatpush1.bf16.msra.mxu0 %v5110_v27 }
 0x4f8   :  { %1233 = vmatprep.subr.bf16.mxu1 %v5006_v33  ;;  %1274 = vmatprep.subr.bf16.mxu0 %v5114_v29 }
 0x4fb   :  { %1234 = vmatpush1.bf16.msra.mxu1 %v5010_v34  ;;  %1275 = vmatpush1.bf16.msra.mxu0 %v5117_v31 }
 0x4fc   :  { %1235 = vmatprep.subr.bf16.mxu1 %v5013_v35  ;;  %1276 = vmatprep.subr.bf16.mxu0 %v5120_v46 }
 0x4ff   :  { %1236 = vmatpush1.bf16.msra.mxu1 %v5016_v36  ;;  %1277 = vmatpush1.bf16.msra.mxu0 %v5123_v47 }
 0x500   :  { %1237 = vmatprep.subr.bf16.mxu1 %v5020_v37  ;;  %1278 = vmatprep.subr.bf16.mxu0 %v5126_v48 }
 0x503   :  { %1238 = vmatpush1.bf16.msra.mxu1 %v5022_v38  ;;  %1279 = vmatpush1.bf16.msra.mxu0 %v5129_v49 }
 0x504   :  { %1239 = vmatprep.subr.bf16.mxu1 %v5026_v39  ;;  %1280 = vmatprep.subr.bf16.mxu0 %v5132_v51 }
 0x507   :  { %1240 = vmatpush1.bf16.msra.mxu1 %v5028_v40  ;;  %1281 = vmatpush1.bf16.msra.mxu0 %v5135_v52 }
 0x508   :  { %1241 = vmatprep.subr.bf16.mxu1 %v5032_v41  ;;  %1282 = vmatprep.subr.bf16.mxu0 %v5138_v53 }
 0x50b   :  { %1242 = vmatpush1.bf16.msra.mxu1 %v5034_v42  ;;  %1283 = vmatpush1.bf16.msra.mxu0 %v5141_v54 }
 0x50c   :  { %1243 = vmatprep.subr.bf16.mxu1 %v5038_v43  ;;  %1284 = vmatprep.subr.bf16.mxu0 %v5144_v55 }
 0x50f   :  { %1244 = vmatpush1.bf16.msra.mxu1 %v5040_v44  ;;  %1285 = vmatpush1.bf16.msra.mxu0 %v5147_v56 }
 0x510   :  { %1348 = vmatprep.subr.bf16.mxu1 %v4992_v24  ;;  %1389 = vmatprep.subr.bf16.mxu0 %v5095_v21 }
 0x5b2   :  { %v1156_v4 = vpop.f32.mrf.mxu1  ;;  %v1197_v19 = vpop.f32.mrf.mxu0 }
 0x5b3   :  { %v1157_v50 = vadd.f32 %v1156_v4, %v1114_v62  ;;  %v1198_v17 = vadd.f32 %v1197_v19, %v1116_v3 }
 0x5b4   :  { %v1158_v60 = vpop.f32.mrf.mxu1  ;;  %v1199_v14 = vpop.f32.mrf.mxu0 }
 0x5b5   :  { %v3893_v5 = vmul.f32 -1.442695, %v1157_v50  ;;  %v1159_v8 = vadd.f32 %v1158_v60, %v1115_v15  ;;  %v1200_v2 = vadd.f32 %v1199_v14, %v1117_v12 }
 0x5b6   :  { %v1160_v23 = vpop.f32.mrf.mxu1  ;;  %v1201_v16 = vpop.f32.mrf.mxu0 }
 0x5b7   :  { %4308 = vpow2.f32 %v3893_v5  ;;  %v3894_v20 = vmul.f32 -1.442695, %v1159_v8  ;;  %v3895_v10 = vmul.f32 -1.442695, %v1200_v2 }
 0x5b8   :  { %v1161_v22 = vpop.f32.mrf.mxu1  ;;  %v1202_v1 = vpop.f32.mrf.mxu0 }
 0x5b9   :  { %4310 = vpow2.f32 %v3894_v20 }
 0x5ba   :  { %4312 = vtanh.f32 %v1198_v17 }
 0x5bb   :  { %4314 = vpow2.f32 %v3895_v10 }
 0x5c4   :  { %v4309_v63 = vpop.eup %4308 }
 0x5c5   :  { %v1207_v59 = vadd.f32 1.0, %v4309_v63 }
 0x5c6   :  { %v4311_v0 = vpop.eup %4310 }
 0x5c7   :  { %4316 = vrcp.f32 %v1207_v59  ;;  %v1213_v13 = vadd.f32 1.0, %v4311_v0  ;;  %v4313_v62 = vpop.eup %4312 }
 0x5c8   :  { %v4315_v4 = vpop.eup %4314 }
 0x5c9   :  { %4318 = vrcp.f32 %v1213_v13  ;;  %v1220_v5 = vadd.f32 1.0, %v4315_v4 }
 0x5cb   :  { %4320 = vrcp.f32 %v1220_v5  ;;  %v5439_v5 = vld [vmem:[#allocation12 + $0xc0] ss:$16 sps:$4 sm:$0xff]  }
 0x5d4   :  { %v4317_v50 = vpop.eup %4316 }
 0x5d5   :  { %v1224_v15 = vmul.f32 %v4317_v50, %v4313_v62 }
 0x5d6   :  { %v4319_v60 = vpop.eup %4318 }
 0x5d7   :  { %v1223_v11 = vmul.f32 %v4319_v60, %v5322_v58  ;;  %v5433_v60 = vld [vmem:[#allocation12 + $0xc4] ss:$16 sps:$4 sm:$0xff]  }
 0x5d8   :  { %v4321_v57 = vpop.eup %4320 }
 0x5d9   :  { %v5370_v14 = vadd.f32 %v1224_v15, %v1223_v11  ;;  %v5429_v15 = vld [vmem:[#allocation12 + $0xe0] ss:$16 sps:$4 sm:$0xff]   ;;  %v5443_v11 = vld [vmem:[#allocation12 + $0xa4] ss:$16 sps:$4 sm:$0xff]  }
 0x5db   :  { %4322 = vtanh.f32 %v5370_v14 }
 0x5e8   :  { %v4323_v19 = vpop.eup %4322 }
 0x5e9   :  { %v1227_v8 = vmul.f32 %v4323_v19, %v4321_v57 }
 0x5eb   :  { %v1228_v23 = vpack.c.bf16 %v1227_v8, %v1227_v8  ;;  %v1691_v16 = vrot.slane %v1227_v8, 2  ;;  %v1341_v8 = vrot.slane %v5185_v45, 2 }
 0x5ed   :  { %1262 = vmatmul.mubr.bf16.vlgmr.msra.gmra.mxu1 %v1228_v23  ;;  %1303 = vmatmul.mubr.bf16.vlgmr.msra.gmra.mxu0 %v1228_v23  ;;  %v5375_v20 = vsel %vm1706_vm9, %v5329_v18, %v1691_v16 }
 0x5ee   :  { %1349 = vmatpush1.bf16.msra.mxu1 %v4995_v28  ;;  %1390 = vmatpush1.bf16.msra.mxu0 %v5103_v25  ;;  %v5415_v28 = vsel %vm193_vm4, %v5070_v6, %v5174_v7  ;;  %v6171_v7 = vld [vmem:[#allocation34_spill] sm:$0xff] }
 0x5ef   :  { %1350 = vmatprep.subr.bf16.mxu1 %v4997_v30  ;;  %1391 = vmatprep.subr.bf16.mxu0 %v5105_v26 }
 0x5f0   :  { %1380 = vmatprep.mubr.bf16.mxu1 %v6169_v9  ;;  %1421 = vmatprep.mubr.bf16.mxu0 %v6169_v9 }
 0x5f2   :  { %1351 = vmatpush1.bf16.msra.mxu1 %v5002_v32  ;;  %1392 = vmatpush1.bf16.msra.mxu0 %v5110_v27 }
 0x5f3   :  { %1352 = vmatprep.subr.bf16.mxu1 %v5006_v33  ;;  %1393 = vmatprep.subr.bf16.mxu0 %v5114_v29 }
 0x5f6   :  { %1353 = vmatpush1.bf16.msra.mxu1 %v5010_v34  ;;  %1394 = vmatpush1.bf16.msra.mxu0 %v5117_v31 }
 0x5f7   :  { %1354 = vmatprep.subr.bf16.mxu1 %v5013_v35  ;;  %1395 = vmatprep.subr.bf16.mxu0 %v5120_v46 }
 0x5fa   :  { %1355 = vmatpush1.bf16.msra.mxu1 %v5016_v36  ;;  %1396 = vmatpush1.bf16.msra.mxu0 %v5123_v47 }
 0x5fb   :  { %1356 = vmatprep.subr.bf16.mxu1 %v5020_v37  ;;  %1397 = vmatprep.subr.bf16.mxu0 %v5126_v48 }
 0x5fe   :  { %1357 = vmatpush1.bf16.msra.mxu1 %v5022_v38  ;;  %1398 = vmatpush1.bf16.msra.mxu0 %v5129_v49 }
 0x5ff   :  { %1358 = vmatprep.subr.bf16.mxu1 %v5026_v39  ;;  %1399 = vmatprep.subr.bf16.mxu0 %v5132_v51 }
 0x602   :  { %1359 = vmatpush1.bf16.msra.mxu1 %v5028_v40  ;;  %1400 = vmatpush1.bf16.msra.mxu0 %v5135_v52 }
 0x603   :  { %1360 = vmatprep.subr.bf16.mxu1 %v5032_v41  ;;  %1401 = vmatprep.subr.bf16.mxu0 %v5138_v53 }
 0x606   :  { %1361 = vmatpush1.bf16.msra.mxu1 %v5034_v42  ;;  %1402 = vmatpush1.bf16.msra.mxu0 %v5141_v54  ;;  %v6170_v42 = vld [vmem:[#allocation36_spill] sm:$0xff] }
 0x607   :  { %1362 = vmatprep.subr.bf16.mxu1 %v5038_v43  ;;  %1403 = vmatprep.subr.bf16.mxu0 %v5144_v55 }
 0x60a   :  { %1363 = vmatpush1.bf16.msra.mxu1 %v5040_v44  ;;  %1404 = vmatpush1.bf16.msra.mxu0 %v5147_v56 }
 0x60b   :  { %1463 = vmatprep.subr.bf16.mxu1 %v4992_v24  ;;  %1504 = vmatprep.subr.bf16.mxu0 %v5095_v21 }
 0x6ad   :  { %v1263_v30 = vpop.f32.mrf.mxu1  ;;  %v1304_v32 = vpop.f32.mrf.mxu0 }
 0x6ae   :  { %v1264_v33 = vadd.f32 %v1263_v30, %v5415_v28  ;;  %v1305_v58 = vadd.f32 %v1304_v32, %v6171_v7 }
 0x6af   :  { %v1265_v34 = vpop.f32.mrf.mxu1  ;;  %v1306_v35 = vpop.f32.mrf.mxu0 }
 0x6b0   :  { %v3896_v36 = vmul.f32 -1.442695, %v1264_v33  ;;  %v1266_v37 = vadd.f32 %v1265_v34, %v5185_v45  ;;  %v1307_v43 = vadd.f32 %v1306_v35, %v6170_v42 }
 0x6b1   :  { %v1267_v38 = vpop.f32.mrf.mxu1  ;;  %v1308_v39 = vpop.f32.mrf.mxu0 }
 0x6b2   :  { %4324 = vpow2.f32 %v3896_v36  ;;  %v3897_v24 = vmul.f32 -1.442695, %v1266_v37  ;;  %v3898_v44 = vmul.f32 -1.442695, %v1307_v43  ;;  %v1342_v37 = vrot.slane %v6171_v7, 2 }
 0x6b3   :  { %v1268_v40 = vpop.f32.mrf.mxu1  ;;  %v1309_v41 = vpop.f32.mrf.mxu0 }
 0x6b4   :  { %4326 = vpow2.f32 %v3897_v24 }
 0x6b5   :  { %4328 = vpow2.f32 %v3898_v44 }
 0x6bf   :  { %v4325_v6 = vpop.eup %4324 }
 0x6c0   :  { %v1314_v18 = vadd.f32 1.0, %v4325_v6 }
 0x6c1   :  { %v4327_v22 = vpop.eup %4326 }
 0x6c2   :  { %4330 = vrcp.f32 %v1314_v18  ;;  %v1320_v1 = vadd.f32 1.0, %v4327_v22  ;;  %v4329_v12 = vpop.eup %4328 }
 0x6c3   :  { %4332 = vtanh.f32 %v1305_v58  ;;  %v1327_v10 = vadd.f32 1.0, %v4329_v12 }
 0x6c4   :  { %4334 = vrcp.f32 %v1320_v1 }
 0x6c5   :  { %4336 = vrcp.f32 %v1327_v10 }
 0x6cf   :  { %v4331_v2 = vpop.eup %4330 }
 0x6d0   :  { %v4333_v3 = vpop.eup %4332 }
 0x6d1   :  { %v4335_v17 = vpop.eup %4334  ;;  %v1331_v63 = vmul.f32 %v4333_v3, %v4331_v2 }
 0x6d2   :  { %v1330_v59 = vmul.f32 %v4335_v17, %v5370_v14  ;;  %v4337_v13 = vpop.eup %4336  ;;  %v5455_v14 = vld [vmem:[#allocation12 + $0x80] ss:$16 sps:$4 sm:$0xff]  }
 0x6d4   :  { %v5422_v0 = vadd.f32 %v1331_v63, %v1330_v59  ;;  %v4404_v59 = vld [vmem:[#allocation12 + $0xe8] ss:$16 sps:$4 sm:$0xff]  }
 0x6d6   :  { %4338 = vtanh.f32 %v5422_v0 }
 0x6e3   :  { %v4339_v62 = vpop.eup %4338 }
 0x6e4   :  { %v5425_v4 = vmul.f32 %v4339_v62, %v4337_v13  ;;  %v4406_v13 = vld [vmem:[#allocation12 + $0xc8] ss:$16 sps:$4 sm:$0xff]   ;;  %v4407_v62 = vld [vmem:[#allocation12 + $0xac] ss:$16 sps:$4 sm:$0xff]  }
 0x6e6   :  { %v1335_v50 = vpack.c.bf16 %v5425_v4, %v5425_v4 }
 0x6e8   :  { %1381 = vmatmul.mubr.bf16.vlgmr.msra.gmra.mxu1 %v1335_v50  ;;  %1422 = vmatmul.mubr.bf16.vlgmr.msra.gmra.mxu0 %v1335_v50  ;;  %v4408_v50 = vld [vmem:[#allocation12 + $0xa8] ss:$16 sps:$4 sm:$0xff]  }
 0x6e9   :  { %1464 = vmatpush1.bf16.msra.mxu1 %v5429_v15  ;;  %1505 = vmatpush1.bf16.msra.mxu0 %v5103_v25  ;;  %v5447_v25 = vld [vmem:[#allocation12 + $0xa0] ss:$16 sps:$4 sm:$0xff]  }
 0x6ea   :  { %1465 = vmatprep.subr.bf16.mxu1 %v5433_v60  ;;  %1506 = vmatprep.subr.bf16.mxu0 %v5105_v26  ;;  %v5451_v26 = vld [vmem:[#allocation12 + $0x84] ss:$16 sps:$4 sm:$0xff]  }
 0x6eb   :  { %1495 = vmatprep.mubr.bf16.mxu1 %v6169_v9  ;;  %1536 = vmatprep.mubr.bf16.mxu0 %v6169_v9 }
 0x6ed   :  { %1466 = vmatpush1.bf16.msra.mxu1 %v5439_v5  ;;  %1507 = vmatpush1.bf16.msra.mxu0 %v5110_v27  ;;  %v5459_v27 = vld [vmem:[#allocation12 + $0x64] ss:$16 sps:$4 sm:$0xff]  }
 0x6ee   :  { %1467 = vmatprep.subr.bf16.mxu1 %v5443_v11  ;;  %1508 = vmatprep.subr.bf16.mxu0 %v5114_v29  ;;  %v5463_v29 = vld [vmem:[#allocation12 + $0x60] ss:$16 sps:$4 sm:$0xff]  }
 0x6f1   :  { %1468 = vmatpush1.bf16.msra.mxu1 %v5447_v25  ;;  %1509 = vmatpush1.bf16.msra.mxu0 %v5117_v31  ;;  %v5467_v31 = vld [vmem:[#allocation12 + $0x44] ss:$16 sps:$4 sm:$0xff]  }
 0x6f2   :  { %1469 = vmatprep.subr.bf16.mxu1 %v5451_v26  ;;  %1510 = vmatprep.subr.bf16.mxu0 %v5120_v46  ;;  %v5471_v46 = vld [vmem:[#allocation12 + $0x40] ss:$16 sps:$4 sm:$0xff]  }
 0x6f5   :  { %1470 = vmatpush1.bf16.msra.mxu1 %v5455_v14  ;;  %1511 = vmatpush1.bf16.msra.mxu0 %v5123_v47  ;;  %v5475_v47 = vld [vmem:[#allocation12 + $0x24] ss:$16 sps:$4 sm:$0xff]  }
 0x6f6   :  { %1471 = vmatprep.subr.bf16.mxu1 %v5459_v27  ;;  %1512 = vmatprep.subr.bf16.mxu0 %v5126_v48  ;;  %v5479_v48 = vld [vmem:[#allocation12 + $0x20] ss:$16 sps:$4 sm:$0xff]  }
 0x6f9   :  { %1472 = vmatpush1.bf16.msra.mxu1 %v5463_v29  ;;  %1513 = vmatpush1.bf16.msra.mxu0 %v5129_v49  ;;  %v5483_v49 = vld [vmem:[#allocation12 + $0x4] ss:$16 sps:$4 sm:$0xff]  }
 0x6fa   :  { %1473 = vmatprep.subr.bf16.mxu1 %v5467_v31  ;;  %1514 = vmatprep.subr.bf16.mxu0 %v5132_v51  ;;  %v5487_v51 = vld [vmem:[#allocation12] ss:$16 sps:$4 sm:$0xff]  }
 0x6fd   :  { %1474 = vmatpush1.bf16.msra.mxu1 %v5471_v46  ;;  %1515 = vmatpush1.bf16.msra.mxu0 %v5135_v52  ;;  %v4403_v52 = vld [vmem:[#allocation12 + $0xe4] ss:$16 sps:$4 sm:$0xff]  }
 0x6fe   :  { %1475 = vmatprep.subr.bf16.mxu1 %v5475_v47  ;;  %1516 = vmatprep.subr.bf16.mxu0 %v5138_v53  ;;  %v1340_v53 = vrot.slane %v5415_v28, 2 }
 0x701   :  { %1476 = vmatpush1.bf16.msra.mxu1 %v5479_v48  ;;  %1517 = vmatpush1.bf16.msra.mxu0 %v5141_v54 }
 0x702   :  { %1477 = vmatprep.subr.bf16.mxu1 %v5483_v49  ;;  %1518 = vmatprep.subr.bf16.mxu0 %v5144_v55 }
 0x705   :  { %1478 = vmatpush1.bf16.msra.mxu1 %v5487_v51  ;;  %1519 = vmatpush1.bf16.msra.mxu0 %v5147_v56 }
 0x706   :  { %1578 = vmatprep.subr.bf16.mxu1 %v4403_v52  ;;  %1619 = vmatprep.subr.bf16.mxu0 %v5095_v21  ;;  %v1343_v21 = vrot.slane %v6170_v42, 2  ;;  %v6172_v52 = vmov 0.0  }
 0x7a8   :  { %v1382_v57 = vpop.f32.mrf.mxu1  ;;  %v1423_v54 = vpop.f32.mrf.mxu0 }
 0x7a9   :  { %v1383_v19 = vadd.f32 %v1382_v57, %v1340_v53  ;;  %v1424_v24 = vadd.f32 %v1423_v54, %v1342_v37  ;;  %v1456_v54 = vrot.slane %v5185_v45, 4 }
 0x7aa   :  { %v1384_v23 = vpop.f32.mrf.mxu1  ;;  %v1425_v16 = vpop.f32.mrf.mxu0 }
 0x7ab   :  { %v3899_v55 = vmul.f32 -1.442695, %v1383_v19  ;;  %v1385_v30 = vadd.f32 %v1384_v23, %v1341_v8  ;;  %v1426_v36 = vadd.f32 %v1425_v16, %v1343_v21 }
 0x7ac   :  { %v1386_v32 = vpop.f32.mrf.mxu1  ;;  %v1427_v33 = vpop.f32.mrf.mxu0 }
 0x7ad   :  { %4340 = vpow2.f32 %v3899_v55  ;;  %v3900_v34 = vmul.f32 -1.442695, %v1385_v30  ;;  %v3901_v38 = vmul.f32 -1.442695, %v1426_v36  ;;  %v1458_v32 = vrot.slane %v6170_v42, 4 }
 0x7ae   :  { %v1387_v56 = vpop.f32.mrf.mxu1  ;;  %v1428_v35 = vpop.f32.mrf.mxu0 }
 0x7af   :  { %4342 = vpow2.f32 %v3900_v34  ;;  %v1457_v34 = vrot.slane %v6171_v7, 4 }
 0x7b0   :  { %4344 = vpow2.f32 %v3901_v38 }
 0x7ba   :  { %v4341_v39 = vpop.eup %4340 }
 0x7bb   :  { %v1433_v40 = vadd.f32 1.0, %v4341_v39 }
 0x7bc   :  { %v4343_v41 = vpop.eup %4342 }
 0x7bd   :  { %4346 = vrcp.f32 %v1433_v40  ;;  %v1439_v43 = vadd.f32 1.0, %v4343_v41  ;;  %v4345_v44 = vpop.eup %4344 }
 0x7be   :  { %4348 = vtanh.f32 %v1424_v24  ;;  %v1446_v22 = vadd.f32 1.0, %v4345_v44 }
 0x7bf   :  { %4350 = vrcp.f32 %v1439_v43 }
 0x7c0   :  { %4352 = vrcp.f32 %v1446_v22 }
 0x7ca   :  { %v4347_v6 = vpop.eup %4346 }
 0x7cb   :  { %v4349_v58 = vpop.eup %4348 }
 0x7cc   :  { %v4351_v18 = vpop.eup %4350  ;;  %v1450_v1 = vmul.f32 %v4349_v58, %v4347_v6 }
 0x7cd   :  { %v1449_v12 = vmul.f32 %v4351_v18, %v5422_v0  ;;  %v4353_v3 = vpop.eup %4352  ;;  %v4405_v0 = vld [vmem:[#allocation12 + $0xcc] ss:$16 sps:$4 sm:$0xff]  }
 0x7cf   :  { %v5497_v2 = vadd.f32 %v1450_v1, %v1449_v12 }
 0x7d1   :  { %4354 = vtanh.f32 %v5497_v2 }
 0x7de   :  { %v4355_v17 = vpop.eup %4354 }
 0x7df   :  { %v5500_v10 = vmul.f32 %v4355_v17, %v4353_v3 }
 0x7e1   :  { %v1454_v63 = vpack.c.bf16 %v5500_v10, %v5500_v10  ;;  %v1694_v1 = vrot.slane %v5500_v10, 6  ;;  %v1571_v10 = vrot.slane %v5185_v45, 6 }
 0x7e3   :  { %1496 = vmatmul.mubr.bf16.vlgmr.msra.gmra.mxu1 %v1454_v63  ;;  %1537 = vmatmul.mubr.bf16.vlgmr.msra.gmra.mxu0 %v1454_v63  ;;  %v1708_v63 = vsel %vm1702_vm7, %v5425_v4, %v1694_v1 }
 0x7e4   :  { %1579 = vmatpush1.bf16.msra.mxu1 %v5429_v15  ;;  %1620 = vmatpush1.bf16.msra.mxu0 %v4404_v59  ;;  %v4409_v15 = vld [vmem:[#allocation12 + $0x8c] ss:$16 sps:$4 sm:$0xff]  }
 0x7e5   :  { %1580 = vmatprep.subr.bf16.mxu1 %v5433_v60  ;;  %1621 = vmatprep.subr.bf16.mxu0 %v4405_v0  ;;  %v4410_v60 = vld [vmem:[#allocation12 + $0x88] ss:$16 sps:$4 sm:$0xff]  }
 0x7e6   :  { %1610 = vmatprep.mubr.bf16.mxu1 %v6169_v9  ;;  %1651 = vmatprep.mubr.bf16.mxu0 %v6169_v9 }
 0x7e8   :  { %1581 = vmatpush1.bf16.msra.mxu1 %v5439_v5  ;;  %1622 = vmatpush1.bf16.msra.mxu0 %v4406_v13  ;;  %v4411_v5 = vld [vmem:[#allocation12 + $0x6c] ss:$16 sps:$4 sm:$0xff]  }
 0x7e9   :  { %1582 = vmatprep.subr.bf16.mxu1 %v5443_v11  ;;  %1623 = vmatprep.subr.bf16.mxu0 %v4407_v62  ;;  %v4412_v11 = vld [vmem:[#allocation12 + $0x68] ss:$16 sps:$4 sm:$0xff]  }
 0x7ec   :  { %1583 = vmatpush1.bf16.msra.mxu1 %v5447_v25  ;;  %1624 = vmatpush1.bf16.msra.mxu0 %v4408_v50  ;;  %v4413_v25 = vld [vmem:[#allocation12 + $0x4c] ss:$16 sps:$4 sm:$0xff]  }
 0x7ed   :  { %1584 = vmatprep.subr.bf16.mxu1 %v5451_v26  ;;  %1625 = vmatprep.subr.bf16.mxu0 %v4409_v15  ;;  %v4414_v26 = vld [vmem:[#allocation12 + $0x48] ss:$16 sps:$4 sm:$0xff]  }
 0x7f0   :  { %1585 = vmatpush1.bf16.msra.mxu1 %v5455_v14  ;;  %1626 = vmatpush1.bf16.msra.mxu0 %v4410_v60  ;;  %v4415_v14 = vld [vmem:[#allocation12 + $0x2c] ss:$16 sps:$4 sm:$0xff]  }
 0x7f1   :  { %1586 = vmatprep.subr.bf16.mxu1 %v5459_v27  ;;  %1627 = vmatprep.subr.bf16.mxu0 %v4411_v5  ;;  %v4416_v27 = vld [vmem:[#allocation12 + $0x28] ss:$16 sps:$4 sm:$0xff]  }
 0x7f4   :  { %1587 = vmatpush1.bf16.msra.mxu1 %v5463_v29  ;;  %1628 = vmatpush1.bf16.msra.mxu0 %v4412_v11  ;;  %v4417_v29 = vld [vmem:[#allocation12 + $0xc] ss:$16 sps:$4 sm:$0xff]  }
 0x7f5   :  { %1588 = vmatprep.subr.bf16.mxu1 %v5467_v31  ;;  %1629 = vmatprep.subr.bf16.mxu0 %v4413_v25  ;;  %v4418_v31 = vld [vmem:[#allocation12 + $0x8] ss:$16 sps:$4 sm:$0xff]  }
 0x7f8   :  { %1589 = vmatpush1.bf16.msra.mxu1 %v5471_v46  ;;  %1630 = vmatpush1.bf16.msra.mxu0 %v4414_v26  ;;  %v1455_v46 = vrot.slane %v5415_v28, 4 }
 0x7f9   :  { %1590 = vmatprep.subr.bf16.mxu1 %v5475_v47  ;;  %1631 = vmatprep.subr.bf16.mxu0 %v4415_v14 }
 0x7fc   :  { %1591 = vmatpush1.bf16.msra.mxu1 %v5479_v48  ;;  %1632 = vmatpush1.bf16.msra.mxu0 %v4416_v27  ;;  %v1573_v27 = vrot.slane %v6170_v42, 6 }
 0x7fd   :  { %1592 = vmatprep.subr.bf16.mxu1 %v5483_v49  ;;  %1633 = vmatprep.subr.bf16.mxu0 %v4417_v29 }
 0x800   :  { %1593 = vmatpush1.bf16.msra.mxu1 %v5487_v51  ;;  %1634 = vmatpush1.bf16.msra.mxu0 %v4418_v31 }
 0x801   :  { %4079 = vmatprep.subr.bf16.mxu1 %v6172_v52 }
 0x8a3   :  { %v1497_v53 = vpop.f32.mrf.mxu1  ;;  %v1538_v47 = vpop.f32.mrf.mxu0 }
 0x8a4   :  { %v1498_v57 = vadd.f32 %v1497_v53, %v1455_v46  ;;  %v1539_v21 = vadd.f32 %v1538_v47, %v1457_v34  ;;  %v4419_v34 = vld [vmem:[#allocation9] sm:$0xff]  }
 0x8a5   :  { %v1499_v48 = vpop.f32.mrf.mxu1  ;;  %v1540_v19 = vpop.f32.mrf.mxu0 }
 0x8a6   :  { %v3902_v8 = vmul.f32 -1.442695, %v1498_v57  ;;  %v1500_v23 = vadd.f32 %v1499_v48, %v1456_v54  ;;  %v1541_v33 = vadd.f32 %v1540_v19, %v1458_v32 }
 0x8a7   :  { %v1501_v49 = vpop.f32.mrf.mxu1  ;;  %v1542_v16 = vpop.f32.mrf.mxu0 }
 0x8a8   :  { %4356 = vpow2.f32 %v3902_v8  ;;  %v3903_v55 = vmul.f32 -1.442695, %v1500_v23  ;;  %v3904_v56 = vmul.f32 -1.442695, %v1541_v33 }
 0x8a9   :  { %v1502_v51 = vpop.f32.mrf.mxu1  ;;  %v1543_v30 = vpop.f32.mrf.mxu0 }
 0x8aa   :  { %4358 = vpow2.f32 %v3903_v55 }
 0x8ab   :  { %4360 = vpow2.f32 %v3904_v56 }
 0x8b5   :  { %v4357_v35 = vpop.eup %4356 }
 0x8b6   :  { %v1548_v36 = vadd.f32 1.0, %v4357_v35 }
 0x8b7   :  { %v4359_v37 = vpop.eup %4358 }
 0x8b8   :  { %4362 = vrcp.f32 %v1548_v36  ;;  %v1554_v38 = vadd.f32 1.0, %v4359_v37  ;;  %v4361_v39 = vpop.eup %4360 }
 0x8b9   :  { %4364 = vtanh.f32 %v1539_v21  ;;  %v1561_v43 = vadd.f32 1.0, %v4361_v39 }
 0x8ba   :  { %4366 = vrcp.f32 %v1554_v38 }
 0x8bb   :  { %4368 = vrcp.f32 %v1561_v43 }
 0x8c5   :  { %v4363_v24 = vpop.eup %4362 }
 0x8c6   :  { %v4365_v40 = vpop.eup %4364 }
 0x8c7   :  { %v4367_v41 = vpop.eup %4366  ;;  %v1565_v44 = vmul.f32 %v4365_v40, %v4363_v24 }
 0x8c8   :  { %v1564_v6 = vmul.f32 %v4367_v41, %v5497_v2  ;;  %v4369_v18 = vpop.eup %4368  ;;  %v1570_v2 = vrot.slane %v5415_v28, 6  ;;  %v1572_v28 = vrot.slane %v6171_v7, 6 }
 0x8ca   :  { %v1566_v58 = vadd.f32 %v1565_v44, %v1564_v6 }
 0x8cc   :  { %4370 = vtanh.f32 %v1566_v58 }
 0x8d9   :  { %v4371_v22 = vpop.eup %4370 }
 0x8da   :  { %v1568_v12 = vmul.f32 %v4371_v22, %v4369_v18 }
 0x8dc   :  { %v1569_v3 = vpack.c.bf16 %v1568_v12, %v1568_v12  ;;  %v1697_v17 = vrot.slane %v1568_v12, 4 }
 0x8de   :  { %1611 = vmatmul.mubr.bf16.vlgmr.msra.gmra.mxu1 %v1569_v3  ;;  %1652 = vmatmul.mubr.bf16.vlgmr.msra.gmra.mxu0 %v1569_v3  ;;  %v1709_v59 = vsel %vm1704_vm8, %v1708_v63, %v1697_v17 }
 0x8df   :  { %4081 = vmatprep.mubr.msk.bf16.mxu1 %vm4889_vm0, %v6172_v52 }
 0x99e   :  { %v1612_v0 = vpop.f32.mrf.mxu1  ;;  %v1653_v13 = vpop.f32.mrf.mxu0 }
 0x99f   :  { %v1613_v62 = vadd.f32 %v1612_v0, %v1570_v2  ;;  %v1654_v53 = vadd.f32 %v1653_v13, %v1572_v28 }
 0x9a0   :  { %v1614_v50 = vpop.f32.mrf.mxu1  ;;  %v1655_v15 = vpop.f32.mrf.mxu0 }
 0x9a1   :  { %v3905_v60 = vmul.f32 -1.442695, %v1613_v62  ;;  %v1615_v5 = vadd.f32 %v1614_v50, %v1571_v10  ;;  %v1656_v29 = vadd.f32 %v1655_v15, %v1573_v27 }
 0x9a2   :  { %v1616_v11 = vpop.f32.mrf.mxu1  ;;  %v1657_v4 = vpop.f32.mrf.mxu0 }
 0x9a3   :  { %4372 = vpow2.f32 %v3905_v60  ;;  %v3906_v25 = vmul.f32 -1.442695, %v1615_v5  ;;  %v3907_v31 = vmul.f32 -1.442695, %v1656_v29 }
 0x9a4   :  { %v1617_v26 = vpop.f32.mrf.mxu1  ;;  %v1658_v14 = vpop.f32.mrf.mxu0 }
 0x9a5   :  { %4374 = vpow2.f32 %v3906_v25 }
 0x9a6   :  { %4376 = vpow2.f32 %v3907_v31 }
 0x9b0   :  { %v4373_v46 = vpop.eup %4372 }
 0x9b1   :  { %v1663_v45 = vadd.f32 1.0, %v4373_v46 }
 0x9b2   :  { %v4375_v47 = vpop.eup %4374 }
 0x9b3   :  { %4378 = vrcp.f32 %v1663_v45  ;;  %v1669_v57 = vadd.f32 1.0, %v4375_v47  ;;  %v4377_v54 = vpop.eup %4376 }
 0x9b4   :  { %4380 = vtanh.f32 %v1654_v53  ;;  %v1676_v23 = vadd.f32 1.0, %v4377_v54 }
 0x9b5   :  { %4382 = vrcp.f32 %v1669_v57 }
 0x9b6   :  { %4384 = vrcp.f32 %v1676_v23 }
 0x9c0   :  { %v4379_v48 = vpop.eup %4378 }
 0x9c1   :  { %v4381_v19 = vpop.eup %4380 }
 0x9c2   :  { %v4383_v8 = vpop.eup %4382  ;;  %v1680_v49 = vmul.f32 %v4381_v19, %v4379_v48 }
 0x9c3   :  { %v1679_v42 = vmul.f32 %v4383_v8, %v1566_v58  ;;  %v4385_v7 = vpop.eup %4384 }
 0x9c5   :  { %v1681_v16 = vadd.f32 %v1680_v49, %v1679_v42 }
 0x9c7   :  { %4386 = vtanh.f32 %v1681_v16 }
 0x9d4   :  { %v4387_v55 = vpop.eup %4386 }
 0x9d5   :  { %v1683_v51 = vmul.f32 %v4387_v55, %v4385_v7 }
 0x9d7   :  { %v1700_v30 = vrot.slane %v1683_v51, 2 }
 0x9d9   :  { %v1710_v32 = vsel %vm1706_vm9, %v1709_v59, %v1700_v30 }
 0x9da   :  { %v1711_v33 = vpack.c.bf16 %v1710_v32, %v5375_v20 }
 0x9dc   :  { %4080 = vmatpush3.bf16.msra.mxu1 %v1711_v33 }
 0x9df   :  { %4082 = vmatmul.mubr.msk.bf16.vlgmr.msra.gmra.mxu1 %vm204_vm1, %v4419_v34 }
 0x9e0   :  { %4843 = shalt.err (!%p4840_p6)  }
 0x9e1   :  { %119 = dma.hbm_to_vmem [thread:$0]  %s6124_s7, 8704, %s117_s20, [#allocation4] }
 0x9e2   :  { %s4852_s27 = scalar_lea.vmem %s129_s23, 3968  ;;  %p4857_p8 = scmp.lt.s32.totalorder %s129_s23, %s129_s23 }
 0x9e3   :  { %p4853_p7 = scmp.ne.s32.totalorder %s129_s23, %s4852_s27  ;;  %p4858_p9 = scmp.lt.s32.totalorder %s4852_s27, %s4852_s27 }
 0x9e5   :  { %p4859_p10 = por %p4858_p9, %p4857_p8 }
 0x9e7   :  { %p4860_p11 = pnand %p4859_p10, %p4853_p7 }
 0x9e9   :  { %4863 = shalt.err (!%p4860_p11)  }
 0x9ea   :  { %131 = dma.hbm_to_vmem [thread:$0]  %s6125_s8, 3968, %s129_s23, [#allocation4 + $0x1] }
 0xa9f   :  { %v1746_v56 = vpop.f32.mrf.mxu1 }
 0xaa0   :  { %v5549_v35 = vsel %vm193_vm4, %v5375_v20, %v1746_v56 }
 0xaa1   :  { %6173 = vst [vmem:[#allocation36_spill] sm:$0xff] %v5549_v35  ;;  %v4083_v21 = vpop.f32.mrf.mxu1 }
 0xaa3   :  { %v1749_v36 = vpop.f32.mrf.mxu1 }
 0xaa4   :  { %v5553_v37 = vsel %vm193_vm4, %v1710_v32, %v1749_v36 }
 0xaa5   :  { %6174 = vst [vmem:[#allocation34_spill] sm:$0xff] %v5553_v37  ;;  %v4084_v38 = vpop.f32.mrf.mxu1 }
 0xaa6   :  { %4872 = dma.done.wait [#allocation4], 8704 }
 0xaa7   :  { %4873 = vsyncadd [#allocation4], 4294958592  ;;  %2038 = vmatprep.mubr.bf16.mxu0 %v6169_v9  ;;  %2081 = vmatprep.mubr.bf16.mxu1 %v6169_v9  ;;  %v4420_v39 = vld [vmem:[#allocation2 + $0xe4] ss:$16 sps:$4 sm:$0xff]   ;;  %v4422_v24 = vld [vmem:[#allocation2 + $0xec] ss:$16 sps:$4 sm:$0xff]   ;;  %v5559_v29 = vpack.c.bf16 %v5553_v37, %v5549_v35 }
 0xaa8   :  { %2006 = vmatprep.subr.bf16.mxu0 %v4420_v39  ;;  %v4424_v40 = vld [vmem:[#allocation2 + $0xe0] ss:$16 sps:$4 sm:$0xff]   ;;  %v4425_v41 = vld [vmem:[#allocation2 + $0xe8] ss:$16 sps:$4 sm:$0xff]   ;;  %2049 = vmatprep.subr.bf16.mxu1 %v4422_v24  ;;  %v4426_v20 = vld [vmem:[#allocation2 + $0xc4] ss:$16 sps:$4 sm:$0xff]  }
 0xaa9   :  { %2007 = vmatpush1.bf16.msra.mxu0 %v4424_v40  ;;  %2050 = vmatpush1.bf16.msra.mxu1 %v4425_v41  ;;  %v4428_v43 = vld [vmem:[#allocation2 + $0xcc] ss:$16 sps:$4 sm:$0xff]   ;;  %v4430_v44 = vld [vmem:[#allocation2 + $0xc0] ss:$16 sps:$4 sm:$0xff]   ;;  %v4431_v6 = vld [vmem:[#allocation2 + $0xc8] ss:$16 sps:$4 sm:$0xff]  }
 0xaaa   :  { %2008 = vmatprep.subr.bf16.mxu0 %v4426_v20  ;;  %2051 = vmatprep.subr.bf16.mxu1 %v4428_v43  ;;  %v4432_v58 = vld [vmem:[#allocation2 + $0xa4] ss:$16 sps:$4 sm:$0xff]   ;;  %v4434_v18 = vld [vmem:[#allocation2 + $0xac] ss:$16 sps:$4 sm:$0xff]   ;;  %v4436_v22 = vld [vmem:[#allocation2 + $0xa0] ss:$16 sps:$4 sm:$0xff]  }
 0xaab   :  { %v4437_v1 = vld [vmem:[#allocation2 + $0xa8] ss:$16 sps:$4 sm:$0xff]   ;;  %v4438_v12 = vld [vmem:[#allocation2 + $0x84] ss:$16 sps:$4 sm:$0xff]   ;;  %v4440_v3 = vld [vmem:[#allocation2 + $0x8c] ss:$16 sps:$4 sm:$0xff]  }
 0xaac   :  { %v4442_v17 = vld [vmem:[#allocation2 + $0x80] ss:$16 sps:$4 sm:$0xff]   ;;  %v4443_v63 = vld [vmem:[#allocation2 + $0x88] ss:$16 sps:$4 sm:$0xff]   ;;  %v4444_v59 = vld [vmem:[#allocation2 + $0x64] ss:$16 sps:$4 sm:$0xff]  }
 0xaad   :  { %2009 = vmatpush1.bf16.msra.mxu0 %v4430_v44  ;;  %2052 = vmatpush1.bf16.msra.mxu1 %v4431_v6  ;;  %v4446_v2 = vld [vmem:[#allocation2 + $0x6c] ss:$16 sps:$4 sm:$0xff]   ;;  %v4448_v0 = vld [vmem:[#allocation2 + $0x60] ss:$16 sps:$4 sm:$0xff]   ;;  %v4449_v13 = vld [vmem:[#allocation2 + $0x68] ss:$16 sps:$4 sm:$0xff]  }
 0xaae   :  { %2010 = vmatprep.subr.bf16.mxu0 %v4432_v58  ;;  %2053 = vmatprep.subr.bf16.mxu1 %v4434_v18  ;;  %v4450_v62 = vld [vmem:[#allocation2 + $0x44] ss:$16 sps:$4 sm:$0xff]   ;;  %v4452_v10 = vld [vmem:[#allocation2 + $0x4c] ss:$16 sps:$4 sm:$0xff]   ;;  %v4454_v50 = vld [vmem:[#allocation2 + $0x40] ss:$16 sps:$4 sm:$0xff]  }
 0xaaf   :  { %v4455_v15 = vld [vmem:[#allocation2 + $0x48] ss:$16 sps:$4 sm:$0xff]   ;;  %v4456_v60 = vld [vmem:[#allocation2 + $0x24] ss:$16 sps:$4 sm:$0xff]   ;;  %v4458_v5 = vld [vmem:[#allocation2 + $0x2c] ss:$16 sps:$4 sm:$0xff]  }
 0xab0   :  { %v4460_v11 = vld [vmem:[#allocation2 + $0x20] ss:$16 sps:$4 sm:$0xff]   ;;  %v4461_v4 = vld [vmem:[#allocation2 + $0x28] ss:$16 sps:$4 sm:$0xff]   ;;  %v4462_v25 = vld [vmem:[#allocation2 + $0x4] ss:$16 sps:$4 sm:$0xff]  }
 0xab1   :  { %2011 = vmatpush1.bf16.msra.mxu0 %v4436_v22  ;;  %2054 = vmatpush1.bf16.msra.mxu1 %v4437_v1  ;;  %v4464_v26 = vld [vmem:[#allocation2 + $0xc] ss:$16 sps:$4 sm:$0xff]   ;;  %v4466_v14 = vld [vmem:[#allocation2] ss:$16 sps:$4 sm:$0xff]   ;;  %v4467_v27 = vld [vmem:[#allocation2 + $0x8] ss:$16 sps:$4 sm:$0xff]  }
 0xab2   :  { %2012 = vmatprep.subr.bf16.mxu0 %v4438_v12  ;;  %2055 = vmatprep.subr.bf16.mxu1 %v4440_v3  ;;  %6175 = vst [vmem:[#allocation37_spill] sm:$0xff] %v5559_v29  ;;  %v1824_v28 = vld [vmem:[#allocation2 + $0x208] sm:$0x11]  ;;  %v1823_v46 = vld [vmem:[#allocation2 + $0x200] sm:$0x11]  ;;  %v6176_v54 = vld [vmem:[#allocation30_spill] sm:$0xff] }
 0xab3   :  { %v1828_v31 = vunpack.c.l.bf16 %v1824_v28  ;;  %v1829_v53 = vunpack.c.h.bf16 %v1824_v28  ;;  %v1827_v45 = vunpack.c.h.bf16 %v1823_v46  ;;  %v1826_v47 = vunpack.c.l.bf16 %v1823_v46  ;;  %v5591_v20 = vld [vmem:[#allocation2 + $0x1e4] ss:$16 sps:$4 sm:$0xff]   ;;  %v5593_v43 = vld [vmem:[#allocation2 + $0x1ec] ss:$16 sps:$4 sm:$0xff]   ;;  %v5597_v6 = vld [vmem:[#allocation2 + $0x1e0] ss:$16 sps:$4 sm:$0xff]  }
 0xab4   :  { %v5599_v58 = vld [vmem:[#allocation2 + $0x1e8] ss:$16 sps:$4 sm:$0xff]   ;;  %v5603_v18 = vld [vmem:[#allocation2 + $0x1c4] ss:$16 sps:$4 sm:$0xff]   ;;  %v5605_v22 = vld [vmem:[#allocation2 + $0x1cc] ss:$16 sps:$4 sm:$0xff]  }
 0xab5   :  { %2013 = vmatpush1.bf16.msra.mxu0 %v4442_v17  ;;  %2056 = vmatpush1.bf16.msra.mxu1 %v4443_v63  ;;  %v1841_v48 = vrot.slane %v1828_v31, %v6176_v54  ;;  %v1845_v8 = vrot.slane %v1829_v53, %v6176_v54  ;;  %v1837_v42 = vrot.slane %v1827_v45, %v6176_v54  ;;  %v6180_v1 = vld [vmem:[#allocation31_spill] sm:$0xff]  ;;  %v5615_v3 = vld [vmem:[#allocation2 + $0x1c8] ss:$16 sps:$4 sm:$0xff]   ;;  %v5619_v17 = vld [vmem:[#allocation2 + $0x1a4] ss:$16 sps:$4 sm:$0xff]  }
 0xab6   :  { %2014 = vmatprep.subr.bf16.mxu0 %v4444_v59  ;;  %2057 = vmatprep.subr.bf16.mxu1 %v4446_v2  ;;  %v1833_v16 = vrot.slane %v1826_v47, %v6176_v54  ;;  %v5613_v12 = vld [vmem:[#allocation2 + $0x1c0] ss:$16 sps:$4 sm:$0xff]   ;;  %v5621_v63 = vld [vmem:[#allocation2 + $0x1ac] ss:$16 sps:$4 sm:$0xff]   ;;  %v5629_v2 = vld [vmem:[#allocation2 + $0x1a8] ss:$16 sps:$4 sm:$0xff]  }
 0xab7   :  { %v5627_v59 = vld [vmem:[#allocation2 + $0x1a0] ss:$16 sps:$4 sm:$0xff]   ;;  %v5677_v31 = vld [vmem:[#allocation2 + $0x128] ss:$16 sps:$4 sm:$0xff]   ;;  %v5681_v46 = vld [vmem:[#allocation2 + $0x104] ss:$16 sps:$4 sm:$0xff]  }
 0xab8   :  { %v5675_v28 = vld [vmem:[#allocation2 + $0x120] ss:$16 sps:$4 sm:$0xff]   ;;  %v5683_v53 = vld [vmem:[#allocation2 + $0x10c] ss:$16 sps:$4 sm:$0xff]   ;;  %v5689_v47 = vld [vmem:[#allocation2 + $0x108] ss:$16 sps:$4 sm:$0xff]  }
 0xab9   :  { %2015 = vmatpush1.bf16.msra.mxu0 %v4448_v0  ;;  %2058 = vmatpush1.bf16.msra.mxu1 %v4449_v13  ;;  %v5633_v0 = vld [vmem:[#allocation2 + $0x184] ss:$16 sps:$4 sm:$0xff]   ;;  %v5635_v13 = vld [vmem:[#allocation2 + $0x18c] ss:$16 sps:$4 sm:$0xff]   ;;  %v5687_v45 = vld [vmem:[#allocation2 + $0x100] ss:$16 sps:$4 sm:$0xff]  }
 0xaba   :  { %2016 = vmatprep.subr.bf16.mxu0 %v4450_v62  ;;  %2059 = vmatprep.subr.bf16.mxu1 %v4452_v10  ;;  %v5639_v62 = vld [vmem:[#allocation2 + $0x180] ss:$16 sps:$4 sm:$0xff]   ;;  %v5641_v10 = vld [vmem:[#allocation2 + $0x188] ss:$16 sps:$4 sm:$0xff]  }
 0xabd   :  { %2017 = vmatpush1.bf16.msra.mxu0 %v4454_v50  ;;  %2060 = vmatpush1.bf16.msra.mxu1 %v4455_v15  ;;  %v5645_v50 = vld [vmem:[#allocation2 + $0x164] ss:$16 sps:$4 sm:$0xff]   ;;  %v5647_v15 = vld [vmem:[#allocation2 + $0x16c] ss:$16 sps:$4 sm:$0xff]  }
 0xabe   :  { %2018 = vmatprep.subr.bf16.mxu0 %v4456_v60  ;;  %2061 = vmatprep.subr.bf16.mxu1 %v4458_v5  ;;  %v5651_v60 = vld [vmem:[#allocation2 + $0x160] ss:$16 sps:$4 sm:$0xff]   ;;  %v5653_v5 = vld [vmem:[#allocation2 + $0x168] ss:$16 sps:$4 sm:$0xff]  }
 0xac1   :  { %2019 = vmatpush1.bf16.msra.mxu0 %v4460_v11  ;;  %2062 = vmatpush1.bf16.msra.mxu1 %v4461_v4  ;;  %v5657_v11 = vld [vmem:[#allocation2 + $0x144] ss:$16 sps:$4 sm:$0xff]   ;;  %v5659_v4 = vld [vmem:[#allocation2 + $0x14c] ss:$16 sps:$4 sm:$0xff]  }
 0xac2   :  { %2020 = vmatprep.subr.bf16.mxu0 %v4462_v25  ;;  %2063 = vmatprep.subr.bf16.mxu1 %v4464_v26  ;;  %v5663_v25 = vld [vmem:[#allocation2 + $0x140] ss:$16 sps:$4 sm:$0xff]   ;;  %v5665_v26 = vld [vmem:[#allocation2 + $0x148] ss:$16 sps:$4 sm:$0xff]  }
 0xac5   :  { %2021 = vmatpush1.bf16.msra.mxu0 %v4466_v14  ;;  %2064 = vmatpush1.bf16.msra.mxu1 %v4467_v27  ;;  %v5669_v14 = vld [vmem:[#allocation2 + $0x124] ss:$16 sps:$4 sm:$0xff]   ;;  %v5671_v27 = vld [vmem:[#allocation2 + $0x12c] ss:$16 sps:$4 sm:$0xff]  }
 0xac8   :  { %2039 = vmatmul.mubr.bf16.vlgmr.msra.gmra.mxu0 %v5559_v29  ;;  %2082 = vmatmul.mubr.bf16.vlgmr.msra.gmra.mxu1 %v5559_v29 }
 0xac9   :  { %2128 = vmatprep.mubr.bf16.mxu0 %v6169_v9  ;;  %2171 = vmatprep.mubr.bf16.mxu1 %v6169_v9 }
 0xb88   :  { %v2040_v57 = vpop.f32.mrf.mxu0  ;;  %v2083_v19 = vpop.f32.mrf.mxu1 }
 0xb89   :  { %v5569_v7 = vadd.f32 %v2083_v19, %v1841_v48  ;;  %v5583_v39 = vadd.f32 %v2040_v57, %v1833_v16 }
 0xb8a   :  { %v2042_v23 = vpop.f32.mrf.mxu0  ;;  %v2085_v49 = vpop.f32.mrf.mxu1 }
 0xb8b   :  { %v5571_v30 = vadd.f32 %v2085_v49, %v1845_v8  ;;  %v5577_v21 = vadd.f32 %v2042_v23, %v1837_v42 }
 0xb8c   :  { %v2044_v55 = vpop.f32.mrf.mxu0  ;;  %v2087_v51 = vpop.f32.mrf.mxu1 }
 0xb8d   :  { %v5573_v32 = vadd.f32 %v2087_v51, %v1841_v48  ;;  %v5575_v33 = vadd.f32 %v2044_v55, %v1833_v16 }
 0xb8e   :  { %v2046_v34 = vpop.f32.mrf.mxu0  ;;  %v2089_v56 = vpop.f32.mrf.mxu1 }
 0xb8f   :  { %6177 = vst [vmem:[#allocation38_spill] sm:$0xff] %v5573_v32  ;;  %v5579_v36 = vadd.f32 %v2046_v34, %v1837_v42  ;;  %v5581_v38 = vadd.f32 %v2089_v56, %v1845_v8  ;;  %v2094_v24 = vpack.c.bf16 %v5573_v32, %v5569_v7  ;;  %v2092_v44 = vpack.c.bf16 %v5575_v33, %v5583_v39 }
 0xb91   :  { %6178 = vst [vmem:[#allocation39_spill] sm:$0xff] %v5579_v36  ;;  %6179 = vst [vmem:[#allocation40_spill] sm:$0xff] %v5581_v38  ;;  %v2093_v40 = vpack.c.bf16 %v5579_v36, %v5577_v21  ;;  %v2095_v41 = vpack.c.bf16 %v5581_v38, %v5571_v30 }
 0xb93   :  { %2110 = vmatprep.subr.bf16.mxu0 %v2093_v40  ;;  %2153 = vmatprep.subr.bf16.mxu1 %v2095_v41 }
 0xb94   :  { %2111 = vmatpush1.bf16.msra.mxu0 %v2092_v44  ;;  %2154 = vmatpush1.bf16.msra.mxu1 %v2094_v24 }
 0xb95   :  { %2350 = vmatprep.subr.bf16.mxu0 %v5591_v20  ;;  %2391 = vmatprep.subr.bf16.mxu1 %v5593_v43 }
 0xb97   :  { %3941 = vmatmul.mubr.msk.bf16.vlgmr.msra.gmra.mxu0 %vm204_vm1, %v6180_v1  ;;  %3942 = vmatmul.mubr.msk.bf16.vlgmr.msra.gmra.mxu1 %vm204_vm1, %v6180_v1 }
 0xb98   :  { %2351 = vmatpush1.bf16.msra.mxu0 %v5597_v6  ;;  %2392 = vmatpush1.bf16.msra.mxu1 %v5599_v58 }
 0xb99   :  { %2352 = vmatprep.subr.bf16.mxu0 %v5603_v18  ;;  %2393 = vmatprep.subr.bf16.mxu1 %v5605_v22 }
 0xb9a   :  { %2382 = vmatprep.mubr.bf16.mxu0 %v6169_v9  ;;  %2423 = vmatprep.mubr.bf16.mxu1 %v6169_v9 }
 0xb9c   :  { %2353 = vmatpush1.bf16.msra.mxu0 %v5613_v12  ;;  %2394 = vmatpush1.bf16.msra.mxu1 %v5615_v3 }
 0xb9d   :  { %2354 = vmatprep.subr.bf16.mxu0 %v5619_v17  ;;  %2395 = vmatprep.subr.bf16.mxu1 %v5621_v63 }
 0xba0   :  { %2355 = vmatpush1.bf16.msra.mxu0 %v5627_v59  ;;  %2396 = vmatpush1.bf16.msra.mxu1 %v5629_v2 }
 0xba1   :  { %2356 = vmatprep.subr.bf16.mxu0 %v5633_v0  ;;  %2397 = vmatprep.subr.bf16.mxu1 %v5635_v13 }
 0xba4   :  { %2357 = vmatpush1.bf16.msra.mxu0 %v5639_v62  ;;  %2398 = vmatpush1.bf16.msra.mxu1 %v5641_v10 }
 0xba5   :  { %2358 = vmatprep.subr.bf16.mxu0 %v5645_v50  ;;  %2399 = vmatprep.subr.bf16.mxu1 %v5647_v15 }
 0xba8   :  { %2359 = vmatpush1.bf16.msra.mxu0 %v5651_v60  ;;  %2400 = vmatpush1.bf16.msra.mxu1 %v5653_v5 }
 0xba9   :  { %2360 = vmatprep.subr.bf16.mxu0 %v5657_v11  ;;  %2401 = vmatprep.subr.bf16.mxu1 %v5659_v4 }
 0xbac   :  { %2361 = vmatpush1.bf16.msra.mxu0 %v5663_v25  ;;  %2402 = vmatpush1.bf16.msra.mxu1 %v5665_v26 }
 0xbad   :  { %2362 = vmatprep.subr.bf16.mxu0 %v5669_v14  ;;  %2403 = vmatprep.subr.bf16.mxu1 %v5671_v27 }
 0xbb0   :  { %2363 = vmatpush1.bf16.msra.mxu0 %v5675_v28  ;;  %2404 = vmatpush1.bf16.msra.mxu1 %v5677_v31 }
 0xbb1   :  { %2364 = vmatprep.subr.bf16.mxu0 %v5681_v46  ;;  %2405 = vmatprep.subr.bf16.mxu1 %v5683_v53 }
 0xbb4   :  { %2365 = vmatpush1.bf16.msra.mxu0 %v5687_v45  ;;  %2406 = vmatpush1.bf16.msra.mxu1 %v5689_v47 }
 0xbb5   :  { %2469 = vmatprep.subr.bf16.mxu0 %v5591_v20  ;;  %2510 = vmatprep.subr.bf16.mxu1 %v5593_v43 }
 0xbb7   :  { %2383 = vmatmul.mubr.bf16.vlgmr.msra.gmra.mxu0 %v6169_v9  ;;  %2424 = vmatmul.mubr.bf16.vlgmr.msra.gmra.mxu1 %v6169_v9 }
 0xbb8   :  { %2470 = vmatpush1.bf16.msra.mxu0 %v5597_v6  ;;  %2511 = vmatpush1.bf16.msra.mxu1 %v5599_v58 }
 0xbb9   :  { %2471 = vmatprep.subr.bf16.mxu0 %v5603_v18  ;;  %2512 = vmatprep.subr.bf16.mxu1 %v5605_v22 }
 0xbba   :  { %2501 = vmatprep.mubr.bf16.mxu0 %v6169_v9  ;;  %2542 = vmatprep.mubr.bf16.mxu1 %v6169_v9 }
 0xbbc   :  { %2472 = vmatpush1.bf16.msra.mxu0 %v5613_v12  ;;  %2513 = vmatpush1.bf16.msra.mxu1 %v5615_v3 }
 0xbbd   :  { %2473 = vmatprep.subr.bf16.mxu0 %v5619_v17  ;;  %2514 = vmatprep.subr.bf16.mxu1 %v5621_v63 }
 0xbc0   :  { %2474 = vmatpush1.bf16.msra.mxu0 %v5627_v59  ;;  %2515 = vmatpush1.bf16.msra.mxu1 %v5629_v2 }
 0xbc1   :  { %2475 = vmatprep.subr.bf16.mxu0 %v5633_v0  ;;  %2516 = vmatprep.subr.bf16.mxu1 %v5635_v13 }
 0xbc4   :  { %2476 = vmatpush1.bf16.msra.mxu0 %v5639_v62  ;;  %2517 = vmatpush1.bf16.msra.mxu1 %v5641_v10 }
 0xbc5   :  { %2477 = vmatprep.subr.bf16.mxu0 %v5645_v50  ;;  %2518 = vmatprep.subr.bf16.mxu1 %v5647_v15 }
 0xbc8   :  { %2478 = vmatpush1.bf16.msra.mxu0 %v5651_v60  ;;  %2519 = vmatpush1.bf16.msra.mxu1 %v5653_v5 }
 0xbc9   :  { %2479 = vmatprep.subr.bf16.mxu0 %v5657_v11  ;;  %2520 = vmatprep.subr.bf16.mxu1 %v5659_v4 }
 0xbcc   :  { %2480 = vmatpush1.bf16.msra.mxu0 %v5663_v25  ;;  %2521 = vmatpush1.bf16.msra.mxu1 %v5665_v26 }
 0xbcd   :  { %2481 = vmatprep.subr.bf16.mxu0 %v5669_v14  ;;  %2522 = vmatprep.subr.bf16.mxu1 %v5671_v27 }
 0xbd0   :  { %2482 = vmatpush1.bf16.msra.mxu0 %v5675_v28  ;;  %2523 = vmatpush1.bf16.msra.mxu1 %v5677_v31 }
 0xbd1   :  { %2483 = vmatprep.subr.bf16.mxu0 %v5681_v46  ;;  %2524 = vmatprep.subr.bf16.mxu1 %v5683_v53 }
 0xbd4   :  { %2484 = vmatpush1.bf16.msra.mxu0 %v5687_v45  ;;  %2525 = vmatpush1.bf16.msra.mxu1 %v5689_v47 }
 0xbd5   :  { %2584 = vmatprep.subr.bf16.mxu0 %v5591_v20  ;;  %2625 = vmatprep.subr.bf16.mxu1 %v5593_v43 }
 0xc57   :  { %v2130_v57 = vpop.f32.mrf.mxu0  ;;  %v2173_v48 = vpop.f32.mrf.mxu1 }
 0xc58   :  { %v5744_v55 = vsel %vm193_vm4, %v5583_v39, %v2130_v57 }
 0xc59   :  { %v2132_v19 = vpop.f32.mrf.mxu0  ;;  %v2175_v8 = vpop.f32.mrf.mxu1 }
 0xc5a   :  { %v5750_v40 = vsel %vm5177_vm3, %v5577_v21, %v2132_v19 }
 0xc5b   :  { %v5733_v23 = vpop.f32.mrf.mxu0  ;;  %v5735_v49 = vpop.f32.mrf.mxu1 }
 0xc5c   :  { %6181 = vst [vmem:[#allocation41_spill] sm:$0xff] %v5735_v49 }
 0xc5d   :  { %v5737_v42 = vpop.f32.mrf.mxu0  ;;  %v5739_v16 = vpop.f32.mrf.mxu1 }
 0xc5e   :  { %6182 = vst [vmem:[#allocation42_spill] sm:$0xff] %v5739_v16 }
 0xc77   :  { %v2384_v51 = vpop.f32.mrf.mxu0  ;;  %v2425_v34 = vpop.f32.mrf.mxu1 }
 0xc78   :  { %v2385_v56 = vadd.f32 %v2384_v51, %v5744_v55  ;;  %v5756_v51 = vsel %vm5209_vm6, %v5571_v30, %v2175_v8 }
 0xc79   :  { %v2386_v41 = vpop.f32.mrf.mxu0  ;;  %v2427_v44 = vpop.f32.mrf.mxu1 }
 0xc7a   :  { %v3975_v37 = vmul.f32 -1.442695, %v2385_v56  ;;  %v2387_v35 = vadd.f32 %v2386_v41, %v5750_v40  ;;  %v2428_v21 = vadd.f32 %v2427_v44, %v5756_v51  ;;  %v5762_v56 = vsel %vm5198_vm5, %v5569_v7, %v2173_v48 }
 0xc7b   :  { %v2388_v54 = vpop.f32.mrf.mxu0  ;;  %v2429_v29 = vpop.f32.mrf.mxu1  ;;  %v2463_v52 = vrot.slane %v5762_v56, 2 }
 0xc7c   :  { %4516 = vpow2.f32 %v3975_v37  ;;  %v3976_v1 = vmul.f32 -1.442695, %v2387_v35  ;;  %v3977_v19 = vmul.f32 -1.442695, %v2428_v21  ;;  %v2426_v37 = vadd.f32 %v2425_v34, %v5762_v56 }
 0xc7d   :  { %v2389_v39 = vpop.f32.mrf.mxu0  ;;  %v2430_v57 = vpop.f32.mrf.mxu1 }
 0xc7e   :  { %4518 = vpow2.f32 %v3976_v1 }
 0xc7f   :  { %4520 = vpow2.f32 %v3977_v19 }
 0xc89   :  { %v4517_v54 = vpop.eup %4516 }
 0xc8a   :  { %v2435_v35 = vadd.f32 1.0, %v4517_v54  ;;  %v2461_v54 = vrot.slane %v5744_v55, 2 }
 0xc8b   :  { %v4519_v29 = vpop.eup %4518 }
 0xc8c   :  { %4522 = vrcp.f32 %v2435_v35  ;;  %v2441_v1 = vadd.f32 1.0, %v4519_v29  ;;  %v4521_v30 = vpop.eup %4520 }
 0xc8d   :  { %4524 = vtanh.f32 %v2426_v37  ;;  %v2448_v39 = vadd.f32 1.0, %v4521_v30 }
 0xc8e   :  { %4526 = vrcp.f32 %v2441_v1  ;;  %v2462_v1 = vrot.slane %v5750_v40, 2 }
 0xc8f   :  { %4528 = vrcp.f32 %v2448_v39 }
 0xc99   :  { %v4523_v8 = vpop.eup %4522 }
 0xc9a   :  { %v4525_v41 = vpop.eup %4524 }
 0xc9b   :  { %v4527_v44 = vpop.eup %4526  ;;  %v2452_v21 = vmul.f32 %v4525_v41, %v4523_v8 }
 0xc9c   :  { %v2451_v57 = vmul.f32 0.0, %v4527_v44  ;;  %v4529_v7 = vpop.eup %4528 }
 0xc9e   :  { %v5765_v32 = vadd.f32 %v2452_v21, %v2451_v57 }
 0xca0   :  { %4530 = vtanh.f32 %v5765_v32 }
 0xcad   :  { %v4531_v48 = vpop.eup %4530 }
 0xcae   :  { %v5768_v34 = vmul.f32 %v4531_v48, %v4529_v7 }
 0xcb0   :  { %v2456_v19 = vpack.c.bf16 %v5768_v34, %v5768_v34 }
 0xcb2   :  { %2502 = vmatmul.mubr.bf16.vlgmr.msra.gmra.mxu0 %v2456_v19  ;;  %2543 = vmatmul.mubr.bf16.vlgmr.msra.gmra.mxu1 %v2456_v19  ;;  %v2464_v19 = vrot.slane %v5756_v51, 2 }
 0xcb3   :  { %2585 = vmatpush1.bf16.msra.mxu0 %v5597_v6  ;;  %2626 = vmatpush1.bf16.msra.mxu1 %v5599_v58 }
 0xcb4   :  { %2586 = vmatprep.subr.bf16.mxu0 %v5603_v18  ;;  %2627 = vmatprep.subr.bf16.mxu1 %v5605_v22 }
 0xcb5   :  { %2616 = vmatprep.mubr.bf16.mxu0 %v6169_v9  ;;  %2657 = vmatprep.mubr.bf16.mxu1 %v6169_v9 }
 0xcb7   :  { %2587 = vmatpush1.bf16.msra.mxu0 %v5613_v12  ;;  %2628 = vmatpush1.bf16.msra.mxu1 %v5615_v3 }
 0xcb8   :  { %2588 = vmatprep.subr.bf16.mxu0 %v5619_v17  ;;  %2629 = vmatprep.subr.bf16.mxu1 %v5621_v63 }
 0xcbb   :  { %2589 = vmatpush1.bf16.msra.mxu0 %v5627_v59  ;;  %2630 = vmatpush1.bf16.msra.mxu1 %v5629_v2 }
 0xcbc   :  { %2590 = vmatprep.subr.bf16.mxu0 %v5633_v0  ;;  %2631 = vmatprep.subr.bf16.mxu1 %v5635_v13 }
 0xcbf   :  { %2591 = vmatpush1.bf16.msra.mxu0 %v5639_v62  ;;  %2632 = vmatpush1.bf16.msra.mxu1 %v5641_v10 }
 0xcc0   :  { %2592 = vmatprep.subr.bf16.mxu0 %v5645_v50  ;;  %2633 = vmatprep.subr.bf16.mxu1 %v5647_v15 }
 0xcc3   :  { %2593 = vmatpush1.bf16.msra.mxu0 %v5651_v60  ;;  %2634 = vmatpush1.bf16.msra.mxu1 %v5653_v5 }
 0xcc4   :  { %2594 = vmatprep.subr.bf16.mxu0 %v5657_v11  ;;  %2635 = vmatprep.subr.bf16.mxu1 %v5659_v4 }
 0xcc7   :  { %2595 = vmatpush1.bf16.msra.mxu0 %v5663_v25  ;;  %2636 = vmatpush1.bf16.msra.mxu1 %v5665_v26 }
 0xcc8   :  { %2596 = vmatprep.subr.bf16.mxu0 %v5669_v14  ;;  %2637 = vmatprep.subr.bf16.mxu1 %v5671_v27 }
 0xccb   :  { %2597 = vmatpush1.bf16.msra.mxu0 %v5675_v28  ;;  %2638 = vmatpush1.bf16.msra.mxu1 %v5677_v31 }
 0xccc   :  { %2598 = vmatprep.subr.bf16.mxu0 %v5681_v46  ;;  %2639 = vmatprep.subr.bf16.mxu1 %v5683_v53 }
 0xccf   :  { %2599 = vmatpush1.bf16.msra.mxu0 %v5687_v45  ;;  %2640 = vmatpush1.bf16.msra.mxu1 %v5689_v47 }
 0xcd0   :  { %2699 = vmatprep.subr.bf16.mxu0 %v5591_v20  ;;  %2740 = vmatprep.subr.bf16.mxu1 %v5593_v43 }
 0xd72   :  { %v2503_v37 = vpop.f32.mrf.mxu0  ;;  %v2544_v35 = vpop.f32.mrf.mxu1 }
 0xd73   :  { %v2504_v29 = vadd.f32 %v2503_v37, %v2461_v54  ;;  %v2545_v38 = vadd.f32 %v2544_v35, %v2463_v52 }
 0xd74   :  { %v2505_v30 = vpop.f32.mrf.mxu0  ;;  %v2546_v8 = vpop.f32.mrf.mxu1 }
 0xd75   :  { %v3978_v41 = vmul.f32 -1.442695, %v2504_v29  ;;  %v2506_v44 = vadd.f32 %v2505_v30, %v2462_v1  ;;  %v2547_v49 = vadd.f32 %v2546_v8, %v2464_v19 }
 0xd76   :  { %v2507_v39 = vpop.f32.mrf.mxu0  ;;  %v2548_v57 = vpop.f32.mrf.mxu1 }
 0xd77   :  { %4532 = vpow2.f32 %v3978_v41  ;;  %v3979_v21 = vmul.f32 -1.442695, %v2506_v44  ;;  %v3980_v54 = vmul.f32 -1.442695, %v2547_v49 }
 0xd78   :  { %v2508_v7 = vpop.f32.mrf.mxu0  ;;  %v2549_v48 = vpop.f32.mrf.mxu1 }
 0xd79   :  { %4534 = vpow2.f32 %v3979_v21  ;;  %v2577_v48 = vrot.slane %v5750_v40, 4 }
 0xd7a   :  { %4536 = vtanh.f32 %v2545_v38 }
 0xd7b   :  { %4538 = vpow2.f32 %v3980_v54 }
 0xd84   :  { %v4533_v37 = vpop.eup %4532 }
 0xd85   :  { %v2554_v16 = vadd.f32 1.0, %v4533_v37 }
 0xd86   :  { %v4535_v24 = vpop.eup %4534 }
 0xd87   :  { %4540 = vrcp.f32 %v2554_v16  ;;  %v2560_v29 = vadd.f32 1.0, %v4535_v24  ;;  %v4537_v1 = vpop.eup %4536 }
 0xd88   :  { %v4539_v30 = vpop.eup %4538 }
 0xd89   :  { %4542 = vrcp.f32 %v2560_v29  ;;  %v2567_v57 = vadd.f32 1.0, %v4539_v30 }
 0xd8b   :  { %4544 = vrcp.f32 %v2567_v57  ;;  %v2579_v57 = vrot.slane %v5756_v51, 4 }
 0xd94   :  { %v4541_v41 = vpop.eup %4540 }
 0xd95   :  { %v2571_v44 = vmul.f32 %v4541_v41, %v4537_v1 }
 0xd96   :  { %v4543_v39 = vpop.eup %4542 }
 0xd97   :  { %v2570_v8 = vmul.f32 %v4543_v39, %v5765_v32  ;;  %v2576_v32 = vrot.slane %v5744_v55, 4 }
 0xd98   :  { %v4545_v52 = vpop.eup %4544 }
 0xd99   :  { %v5811_v21 = vadd.f32 %v2571_v44, %v2570_v8 }
 0xd9b   :  { %4546 = vtanh.f32 %v5811_v21 }
 0xda8   :  { %v4547_v38 = vpop.eup %4546 }
 0xda9   :  { %v5814_v49 = vmul.f32 %v4547_v38, %v4545_v52  ;;  %v2578_v52 = vrot.slane %v5762_v56, 4 }
 0xdab   :  { %v2575_v16 = vpack.c.bf16 %v5814_v49, %v5814_v49 }
 0xdad   :  { %2617 = vmatmul.mubr.bf16.vlgmr.msra.gmra.mxu0 %v2575_v16  ;;  %2658 = vmatmul.mubr.bf16.vlgmr.msra.gmra.mxu1 %v2575_v16 }
 0xdae   :  { %2700 = vmatpush1.bf16.msra.mxu0 %v5597_v6  ;;  %2741 = vmatpush1.bf16.msra.mxu1 %v5599_v58 }
 0xdaf   :  { %2701 = vmatprep.subr.bf16.mxu0 %v5603_v18  ;;  %2742 = vmatprep.subr.bf16.mxu1 %v5605_v22 }
 0xdb0   :  { %2731 = vmatprep.mubr.bf16.mxu0 %v6169_v9  ;;  %2772 = vmatprep.mubr.bf16.mxu1 %v6169_v9 }
 0xdb2   :  { %2702 = vmatpush1.bf16.msra.mxu0 %v5613_v12  ;;  %2743 = vmatpush1.bf16.msra.mxu1 %v5615_v3 }
 0xdb3   :  { %2703 = vmatprep.subr.bf16.mxu0 %v5619_v17  ;;  %2744 = vmatprep.subr.bf16.mxu1 %v5621_v63 }
 0xdb6   :  { %2704 = vmatpush1.bf16.msra.mxu0 %v5627_v59  ;;  %2745 = vmatpush1.bf16.msra.mxu1 %v5629_v2 }
 0xdb7   :  { %2705 = vmatprep.subr.bf16.mxu0 %v5633_v0  ;;  %2746 = vmatprep.subr.bf16.mxu1 %v5635_v13 }
 0xdba   :  { %2706 = vmatpush1.bf16.msra.mxu0 %v5639_v62  ;;  %2747 = vmatpush1.bf16.msra.mxu1 %v5641_v10 }
 0xdbb   :  { %2707 = vmatprep.subr.bf16.mxu0 %v5645_v50  ;;  %2748 = vmatprep.subr.bf16.mxu1 %v5647_v15 }
 0xdbe   :  { %2708 = vmatpush1.bf16.msra.mxu0 %v5651_v60  ;;  %2749 = vmatpush1.bf16.msra.mxu1 %v5653_v5 }
 0xdbf   :  { %2709 = vmatprep.subr.bf16.mxu0 %v5657_v11  ;;  %2750 = vmatprep.subr.bf16.mxu1 %v5659_v4 }
 0xdc2   :  { %2710 = vmatpush1.bf16.msra.mxu0 %v5663_v25  ;;  %2751 = vmatpush1.bf16.msra.mxu1 %v5665_v26 }
 0xdc3   :  { %2711 = vmatprep.subr.bf16.mxu0 %v5669_v14  ;;  %2752 = vmatprep.subr.bf16.mxu1 %v5671_v27 }
 0xdc6   :  { %2712 = vmatpush1.bf16.msra.mxu0 %v5675_v28  ;;  %2753 = vmatpush1.bf16.msra.mxu1 %v5677_v31 }
 0xdc7   :  { %2713 = vmatprep.subr.bf16.mxu0 %v5681_v46  ;;  %2754 = vmatprep.subr.bf16.mxu1 %v5683_v53 }
 0xdca   :  { %2714 = vmatpush1.bf16.msra.mxu0 %v5687_v45  ;;  %2755 = vmatpush1.bf16.msra.mxu1 %v5689_v47 }
 0xdcb   :  { %2806 = vmatprep.subr.bf16.mxu0 %v5591_v20  ;;  %2847 = vmatprep.subr.bf16.mxu1 %v5593_v43 }
 0xe6d   :  { %v2618_v24 = vpop.f32.mrf.mxu0  ;;  %v2659_v35 = vpop.f32.mrf.mxu1 }
 0xe6e   :  { %v2619_v7 = vadd.f32 %v2618_v24, %v2576_v32  ;;  %v2660_v38 = vadd.f32 %v2659_v35, %v2578_v52 }
 0xe6f   :  { %v2620_v19 = vpop.f32.mrf.mxu0  ;;  %v2661_v54 = vpop.f32.mrf.mxu1 }
 0xe70   :  { %v3981_v37 = vmul.f32 -1.442695, %v2619_v7  ;;  %v2621_v29 = vadd.f32 %v2620_v19, %v2577_v48  ;;  %v2662_v8 = vadd.f32 %v2661_v54, %v2579_v57 }
 0xe71   :  { %v2622_v1 = vpop.f32.mrf.mxu0  ;;  %v2663_v30 = vpop.f32.mrf.mxu1 }
 0xe72   :  { %4548 = vpow2.f32 %v3981_v37  ;;  %v3982_v41 = vmul.f32 -1.442695, %v2621_v29  ;;  %v3983_v16 = vmul.f32 -1.442695, %v2662_v8 }
 0xe73   :  { %v2623_v44 = vpop.f32.mrf.mxu0  ;;  %v2664_v39 = vpop.f32.mrf.mxu1 }
 0xe74   :  { %4550 = vpow2.f32 %v3982_v41  ;;  %v3262_v39 = vrot.slane %v5814_v49, 6 }
 0xe75   :  { %4552 = vtanh.f32 %v2660_v38 }
 0xe76   :  { %4554 = vpow2.f32 %v3983_v16  ;;  %v3279_v52 = vsel %vm1702_vm7, %v5768_v34, %v3262_v39  ;;  %v2691_v34 = vrot.slane %v5744_v55, 6  ;;  %v2693_v55 = vrot.slane %v5762_v56, 6 }
 0xe7f   :  { %v4549_v32 = vpop.eup %4548 }
 0xe80   :  { %v2669_v24 = vadd.f32 1.0, %v4549_v32  ;;  %v2692_v32 = vrot.slane %v5750_v40, 6 }
 0xe81   :  { %v4551_v36 = vpop.eup %4550 }
 0xe82   :  { %4556 = vrcp.f32 %v2669_v24  ;;  %v2675_v7 = vadd.f32 1.0, %v4551_v36  ;;  %v4553_v48 = vpop.eup %4552 }
 0xe83   :  { %v4555_v19 = vpop.eup %4554 }
 0xe84   :  { %4558 = vrcp.f32 %v2675_v7  ;;  %v2682_v30 = vadd.f32 1.0, %v4555_v19 }
 0xe86   :  { %4560 = vrcp.f32 %v2682_v30 }
 0xe8f   :  { %v4557_v37 = vpop.eup %4556 }
 0xe90   :  { %v2686_v29 = vmul.f32 %v4557_v37, %v4553_v48 }
 0xe91   :  { %v4559_v1 = vpop.eup %4558 }
 0xe92   :  { %v2685_v54 = vmul.f32 %v4559_v1, %v5811_v21 }
 0xe93   :  { %v4561_v35 = vpop.eup %4560 }
 0xe94   :  { %v5857_v41 = vadd.f32 %v2686_v29, %v2685_v54 }
 0xe96   :  { %4562 = vtanh.f32 %v5857_v41 }
 0xea3   :  { %v4563_v44 = vpop.eup %4562 }
 0xea4   :  { %v2689_v57 = vmul.f32 %v4563_v44, %v4561_v35  ;;  %v2694_v35 = vrot.slane %v5756_v51, 6 }
 0xea6   :  { %v2690_v36 = vpack.c.bf16 %v2689_v57, %v2689_v57  ;;  %v3265_v8 = vrot.slane %v2689_v57, 4 }
 0xea8   :  { %2732 = vmatmul.mubr.bf16.vlgmr.msra.gmra.mxu0 %v2690_v36  ;;  %2773 = vmatmul.mubr.bf16.vlgmr.msra.gmra.mxu1 %v2690_v36  ;;  %v5864_v38 = vsel %vm1704_vm8, %v3279_v52, %v3265_v8 }
 0xea9   :  { %2807 = vmatpush1.bf16.msra.mxu0 %v5597_v6  ;;  %2848 = vmatpush1.bf16.msra.mxu1 %v5599_v58 }
 0xeaa   :  { %2808 = vmatprep.subr.bf16.mxu0 %v5603_v18  ;;  %2849 = vmatprep.subr.bf16.mxu1 %v5605_v22 }
 0xeab   :  { %2838 = vmatprep.mubr.bf16.mxu0 %v6169_v9  ;;  %2879 = vmatprep.mubr.bf16.mxu1 %v6169_v9 }
 0xead   :  { %2809 = vmatpush1.bf16.msra.mxu0 %v5613_v12  ;;  %2850 = vmatpush1.bf16.msra.mxu1 %v5615_v3 }
 0xeae   :  { %2810 = vmatprep.subr.bf16.mxu0 %v5619_v17  ;;  %2851 = vmatprep.subr.bf16.mxu1 %v5621_v63 }
 0xeb1   :  { %2811 = vmatpush1.bf16.msra.mxu0 %v5627_v59  ;;  %2852 = vmatpush1.bf16.msra.mxu1 %v5629_v2 }
 0xeb2   :  { %2812 = vmatprep.subr.bf16.mxu0 %v5633_v0  ;;  %2853 = vmatprep.subr.bf16.mxu1 %v5635_v13 }
 0xeb5   :  { %2813 = vmatpush1.bf16.msra.mxu0 %v5639_v62  ;;  %2854 = vmatpush1.bf16.msra.mxu1 %v5641_v10 }
 0xeb6   :  { %2814 = vmatprep.subr.bf16.mxu0 %v5645_v50  ;;  %2855 = vmatprep.subr.bf16.mxu1 %v5647_v15 }
 0xeb9   :  { %2815 = vmatpush1.bf16.msra.mxu0 %v5651_v60  ;;  %2856 = vmatpush1.bf16.msra.mxu1 %v5653_v5 }
 0xeba   :  { %2816 = vmatprep.subr.bf16.mxu0 %v5657_v11  ;;  %2857 = vmatprep.subr.bf16.mxu1 %v5659_v4 }
 0xebd   :  { %2817 = vmatpush1.bf16.msra.mxu0 %v5663_v25  ;;  %2858 = vmatpush1.bf16.msra.mxu1 %v5665_v26 }
 0xebe   :  { %2818 = vmatprep.subr.bf16.mxu0 %v5669_v14  ;;  %2859 = vmatprep.subr.bf16.mxu1 %v5671_v27 }
 0xec1   :  { %2819 = vmatpush1.bf16.msra.mxu0 %v5675_v28  ;;  %2860 = vmatpush1.bf16.msra.mxu1 %v5677_v31 }
 0xec2   :  { %2820 = vmatprep.subr.bf16.mxu0 %v5681_v46  ;;  %2861 = vmatprep.subr.bf16.mxu1 %v5683_v53 }
 0xec5   :  { %2821 = vmatpush1.bf16.msra.mxu0 %v5687_v45  ;;  %2862 = vmatpush1.bf16.msra.mxu1 %v5689_v47 }
 0xec6   :  { %2925 = vmatprep.subr.bf16.mxu0 %v5591_v20  ;;  %2966 = vmatprep.subr.bf16.mxu1 %v5593_v43 }
 0xf68   :  { %v2733_v21 = vpop.f32.mrf.mxu0  ;;  %v2774_v49 = vpop.f32.mrf.mxu1 }
 0xf69   :  { %v2734_v16 = vadd.f32 %v2733_v21, %v2691_v34  ;;  %v2775_v39 = vadd.f32 %v2774_v49, %v2693_v55 }
 0xf6a   :  { %v2735_v24 = vpop.f32.mrf.mxu0  ;;  %v2776_v7 = vpop.f32.mrf.mxu1 }
 0xf6b   :  { %v3984_v48 = vmul.f32 -1.442695, %v2734_v16  ;;  %v2736_v19 = vadd.f32 %v2735_v24, %v2692_v32  ;;  %v2777_v44 = vadd.f32 %v2776_v7, %v2694_v35  ;;  %v6186_v35 = vld [vmem:[#allocation39_spill] sm:$0xff] }
 0xf6c   :  { %v2737_v37 = vpop.f32.mrf.mxu0  ;;  %v2778_v29 = vpop.f32.mrf.mxu1  ;;  %v5957_v55 = vsel %vm5177_vm3, %v6186_v35, %v5737_v42 }
 0xf6d   :  { %4564 = vpow2.f32 %v3984_v48  ;;  %v3985_v1 = vmul.f32 -1.442695, %v2736_v19  ;;  %v3986_v57 = vmul.f32 -1.442695, %v2777_v44 }
 0xf6e   :  { %v2738_v30 = vpop.f32.mrf.mxu0  ;;  %v2779_v54 = vpop.f32.mrf.mxu1 }
 0xf6f   :  { %4566 = vpow2.f32 %v3985_v1 }
 0xf70   :  { %4568 = vtanh.f32 %v2775_v39 }
 0xf71   :  { %4570 = vpow2.f32 %v3986_v57 }
 0xf7a   :  { %v4565_v36 = vpop.eup %4564 }
 0xf7b   :  { %v2784_v40 = vadd.f32 1.0, %v4565_v36 }
 0xf7c   :  { %v4567_v8 = vpop.eup %4566 }
 0xf7d   :  { %4572 = vrcp.f32 %v2784_v40  ;;  %v2790_v52 = vadd.f32 1.0, %v4567_v8  ;;  %v4569_v34 = vpop.eup %4568 }
 0xf7e   :  { %v4571_v21 = vpop.eup %4570 }
 0xf7f   :  { %4574 = vrcp.f32 %v2790_v52  ;;  %v2797_v48 = vadd.f32 1.0, %v4571_v21  ;;  %v6188_v52 = vld [vmem:[#allocation42_spill] sm:$0xff] }
 0xf81   :  { %4576 = vrcp.f32 %v2797_v48  ;;  %v6192_v48 = vld [vmem:[#allocation38_spill] sm:$0xff] }
 0xf8a   :  { %v4573_v16 = vpop.eup %4572 }
 0xf8b   :  { %v2801_v32 = vmul.f32 %v4573_v16, %v4569_v34  ;;  %v6189_v34 = vld [vmem:[#allocation40_spill] sm:$0xff] }
 0xf8c   :  { %v4575_v24 = vpop.eup %4574  ;;  %v5964_v16 = vsel %vm5209_vm6, %v6189_v34, %v6188_v52 }
 0xf8d   :  { %v2800_v51 = vmul.f32 %v4575_v24, %v5857_v41  ;;  %v5950_v41 = vsel %vm193_vm4, %v5575_v33, %v5733_v23  ;;  %v6191_v24 = vld [vmem:[#allocation41_spill] sm:$0xff] }
 0xf8e   :  { %v4577_v56 = vpop.eup %4576 }
 0xf8f   :  { %v5905_v7 = vadd.f32 %v2801_v32, %v2800_v51  ;;  %v4648_v51 = vld [vmem:[#allocation2 + $0x1c4] ss:$16 sps:$4 sm:$0xff]  }
 0xf91   :  { %4578 = vtanh.f32 %v5905_v7 }
 0xf9e   :  { %v4579_v49 = vpop.eup %4578 }
 0xf9f   :  { %v2804_v19 = vmul.f32 %v4579_v49, %v4577_v56  ;;  %v5971_v56 = vsel %vm5198_vm5, %v6192_v48, %v6191_v24  ;;  %v4646_v24 = vld [vmem:[#allocation2 + $0x1e0] ss:$16 sps:$4 sm:$0xff]   ;;  %v4647_v48 = vld [vmem:[#allocation2 + $0x1e8] ss:$16 sps:$4 sm:$0xff]  }
 0xfa1   :  { %v2805_v37 = vpack.c.bf16 %v2804_v19, %v2804_v19  ;;  %v3268_v29 = vrot.slane %v2804_v19, 2 }
 0xfa3   :  { %2839 = vmatmul.mubr.bf16.vlgmr.msra.gmra.mxu0 %v2805_v37  ;;  %2880 = vmatmul.mubr.bf16.vlgmr.msra.gmra.mxu1 %v2805_v37  ;;  %v5910_v1 = vsel %vm1706_vm9, %v5864_v38, %v3268_v29 }
 0xfa4   :  { %2926 = vmatpush1.bf16.msra.mxu0 %v5597_v6  ;;  %2967 = vmatpush1.bf16.msra.mxu1 %v5599_v58 }
 0xfa5   :  { %2927 = vmatprep.subr.bf16.mxu0 %v5603_v18  ;;  %2968 = vmatprep.subr.bf16.mxu1 %v5605_v22 }
 0xfa6   :  { %2957 = vmatprep.mubr.bf16.mxu0 %v6169_v9  ;;  %2998 = vmatprep.mubr.bf16.mxu1 %v6169_v9 }
 0xfa8   :  { %2928 = vmatpush1.bf16.msra.mxu0 %v5613_v12  ;;  %2969 = vmatpush1.bf16.msra.mxu1 %v5615_v3 }
 0xfa9   :  { %2929 = vmatprep.subr.bf16.mxu0 %v5619_v17  ;;  %2970 = vmatprep.subr.bf16.mxu1 %v5621_v63 }
 0xfac   :  { %2930 = vmatpush1.bf16.msra.mxu0 %v5627_v59  ;;  %2971 = vmatpush1.bf16.msra.mxu1 %v5629_v2 }
 0xfad   :  { %2931 = vmatprep.subr.bf16.mxu0 %v5633_v0  ;;  %2972 = vmatprep.subr.bf16.mxu1 %v5635_v13 }
 0xfb0   :  { %2932 = vmatpush1.bf16.msra.mxu0 %v5639_v62  ;;  %2973 = vmatpush1.bf16.msra.mxu1 %v5641_v10 }
 0xfb1   :  { %2933 = vmatprep.subr.bf16.mxu0 %v5645_v50  ;;  %2974 = vmatprep.subr.bf16.mxu1 %v5647_v15 }
 0xfb4   :  { %2934 = vmatpush1.bf16.msra.mxu0 %v5651_v60  ;;  %2975 = vmatpush1.bf16.msra.mxu1 %v5653_v5 }
 0xfb5   :  { %2935 = vmatprep.subr.bf16.mxu0 %v5657_v11  ;;  %2976 = vmatprep.subr.bf16.mxu1 %v5659_v4 }
 0xfb8   :  { %2936 = vmatpush1.bf16.msra.mxu0 %v5663_v25  ;;  %2977 = vmatpush1.bf16.msra.mxu1 %v5665_v26 }
 0xfb9   :  { %2937 = vmatprep.subr.bf16.mxu0 %v5669_v14  ;;  %2978 = vmatprep.subr.bf16.mxu1 %v5671_v27 }
 0xfbc   :  { %2938 = vmatpush1.bf16.msra.mxu0 %v5675_v28  ;;  %2979 = vmatpush1.bf16.msra.mxu1 %v5677_v31 }
 0xfbd   :  { %2939 = vmatprep.subr.bf16.mxu0 %v5681_v46  ;;  %2980 = vmatprep.subr.bf16.mxu1 %v5683_v53 }
 0xfc0   :  { %2940 = vmatpush1.bf16.msra.mxu0 %v5687_v45  ;;  %2981 = vmatpush1.bf16.msra.mxu1 %v5689_v47 }
 0xfc1   :  { %3040 = vmatprep.subr.bf16.mxu0 %v5591_v20  ;;  %3081 = vmatprep.subr.bf16.mxu1 %v5593_v43 }
0x1063   :  { %v2840_v38 = vpop.f32.mrf.mxu0  ;;  %v2881_v30 = vpop.f32.mrf.mxu1 }
0x1064   :  { %v2841_v54 = vadd.f32 %v2840_v38, %v5950_v41  ;;  %v2882_v19 = vadd.f32 %v2881_v30, %v5971_v56 }
0x1065   :  { %v2842_v39 = vpop.f32.mrf.mxu0  ;;  %v2883_v20 = vpop.f32.mrf.mxu1 }
0x1066   :  { %v3987_v57 = vmul.f32 -1.442695, %v2841_v54  ;;  %v2843_v43 = vadd.f32 %v2842_v39, %v5957_v55  ;;  %v2884_v42 = vadd.f32 %v2883_v20, %v5964_v16 }
0x1067   :  { %v2844_v36 = vpop.f32.mrf.mxu0  ;;  %v2885_v40 = vpop.f32.mrf.mxu1 }
0x1068   :  { %4580 = vpow2.f32 %v3987_v57  ;;  %v3988_v33 = vmul.f32 -1.442695, %v2843_v43  ;;  %v3989_v32 = vmul.f32 -1.442695, %v2884_v42 }
0x1069   :  { %v2845_v23 = vpop.f32.mrf.mxu0  ;;  %v2886_v8 = vpop.f32.mrf.mxu1 }
0x106a   :  { %4582 = vpow2.f32 %v3988_v33 }
0x106b   :  { %4584 = vpow2.f32 %v3989_v32 }
0x1075   :  { %v4581_v49 = vpop.eup %4580 }
0x1076   :  { %v2891_v37 = vadd.f32 1.0, %v4581_v49  ;;  %v4649_v49 = vld [vmem:[#allocation2 + $0x1cc] ss:$16 sps:$4 sm:$0xff]  }
0x1077   :  { %v4583_v29 = vpop.eup %4582 }
0x1078   :  { %4586 = vrcp.f32 %v2891_v37  ;;  %v2897_v38 = vadd.f32 1.0, %v4583_v29  ;;  %v4585_v54 = vpop.eup %4584  ;;  %v4651_v37 = vld [vmem:[#allocation2 + $0x1c8] ss:$16 sps:$4 sm:$0xff]   ;;  %v4652_v29 = vld [vmem:[#allocation2 + $0x1a4] ss:$16 sps:$4 sm:$0xff]  }
0x1079   :  { %4588 = vtanh.f32 %v2882_v19  ;;  %v2904_v20 = vadd.f32 1.0, %v4585_v54  ;;  %v4650_v19 = vld [vmem:[#allocation2 + $0x1c0] ss:$16 sps:$4 sm:$0xff]  }
0x107a   :  { %4590 = vrcp.f32 %v2897_v38  ;;  %v4653_v38 = vld [vmem:[#allocation2 + $0x1ac] ss:$16 sps:$4 sm:$0xff]   ;;  %v4654_v54 = vld [vmem:[#allocation2 + $0x1a0] ss:$16 sps:$4 sm:$0xff]  }
0x107b   :  { %4592 = vrcp.f32 %v2904_v20  ;;  %v4658_v20 = vld [vmem:[#allocation2 + $0x180] ss:$16 sps:$4 sm:$0xff]  }
0x1085   :  { %v4587_v35 = vpop.eup %4586 }
0x1086   :  { %v4589_v44 = vpop.eup %4588 }
0x1087   :  { %v4591_v39 = vpop.eup %4590  ;;  %v2908_v57 = vmul.f32 %v4589_v44, %v4587_v35  ;;  %v4655_v35 = vld [vmem:[#allocation2 + $0x1a8] ss:$16 sps:$4 sm:$0xff]   ;;  %v4656_v44 = vld [vmem:[#allocation2 + $0x184] ss:$16 sps:$4 sm:$0xff]  }
0x1088   :  { %v2907_v43 = vmul.f32 %v4591_v39, %v5905_v7  ;;  %v4593_v30 = vpop.eup %4592  ;;  %v4657_v39 = vld [vmem:[#allocation2 + $0x18c] ss:$16 sps:$4 sm:$0xff]  }
0x108a   :  { %v5975_v36 = vadd.f32 %v2908_v57, %v2907_v43  ;;  %v4659_v57 = vld [vmem:[#allocation2 + $0x188] ss:$16 sps:$4 sm:$0xff]   ;;  %v4661_v43 = vld [vmem:[#allocation2 + $0x16c] ss:$16 sps:$4 sm:$0xff]  }
0x108c   :  { %4594 = vtanh.f32 %v5975_v36 }
0x1099   :  { %v4595_v40 = vpop.eup %4594 }
0x109a   :  { %v5978_v33 = vmul.f32 %v4595_v40, %v4593_v30  ;;  %v4663_v30 = vld [vmem:[#allocation2 + $0x168] ss:$16 sps:$4 sm:$0xff]   ;;  %v4664_v40 = vld [vmem:[#allocation2 + $0x144] ss:$16 sps:$4 sm:$0xff]  }
0x109c   :  { %v2912_v23 = vpack.c.bf16 %v5978_v33, %v5978_v33 }
0x109e   :  { %2958 = vmatmul.mubr.bf16.vlgmr.msra.gmra.mxu0 %v2912_v23  ;;  %2999 = vmatmul.mubr.bf16.vlgmr.msra.gmra.mxu1 %v2912_v23  ;;  %v4665_v23 = vld [vmem:[#allocation2 + $0x14c] ss:$16 sps:$4 sm:$0xff]  }
0x109f   :  { %3041 = vmatpush1.bf16.msra.mxu0 %v5597_v6  ;;  %3082 = vmatpush1.bf16.msra.mxu1 %v5599_v58  ;;  %v4644_v6 = vld [vmem:[#allocation2 + $0x1e4] ss:$16 sps:$4 sm:$0xff]   ;;  %v4645_v58 = vld [vmem:[#allocation2 + $0x1ec] ss:$16 sps:$4 sm:$0xff]  }
0x10a0   :  { %3042 = vmatprep.subr.bf16.mxu0 %v5603_v18  ;;  %3083 = vmatprep.subr.bf16.mxu1 %v5605_v22  ;;  %v2917_v18 = vrot.slane %v5950_v41, 2 }
0x10a1   :  { %3072 = vmatprep.mubr.bf16.mxu0 %v6169_v9  ;;  %3113 = vmatprep.mubr.bf16.mxu1 %v6169_v9 }
0x10a3   :  { %3043 = vmatpush1.bf16.msra.mxu0 %v5613_v12  ;;  %3084 = vmatpush1.bf16.msra.mxu1 %v5615_v3 }
0x10a4   :  { %3044 = vmatprep.subr.bf16.mxu0 %v5619_v17  ;;  %3085 = vmatprep.subr.bf16.mxu1 %v5621_v63  ;;  %v2918_v17 = vrot.slane %v5957_v55, 2 }
0x10a7   :  { %3045 = vmatpush1.bf16.msra.mxu0 %v5627_v59  ;;  %3086 = vmatpush1.bf16.msra.mxu1 %v5629_v2 }
0x10a8   :  { %3046 = vmatprep.subr.bf16.mxu0 %v5633_v0  ;;  %3087 = vmatprep.subr.bf16.mxu1 %v5635_v13 }
0x10ab   :  { %3047 = vmatpush1.bf16.msra.mxu0 %v5639_v62  ;;  %3088 = vmatpush1.bf16.msra.mxu1 %v5641_v10 }
0x10ac   :  { %3048 = vmatprep.subr.bf16.mxu0 %v5645_v50  ;;  %3089 = vmatprep.subr.bf16.mxu1 %v5647_v15 }
0x10af   :  { %3049 = vmatpush1.bf16.msra.mxu0 %v5651_v60  ;;  %3090 = vmatpush1.bf16.msra.mxu1 %v5653_v5  ;;  %v2920_v60 = vrot.slane %v5964_v16, 2 }
0x10b0   :  { %3050 = vmatprep.subr.bf16.mxu0 %v5657_v11  ;;  %3091 = vmatprep.subr.bf16.mxu1 %v5659_v4  ;;  %v2919_v11 = vrot.slane %v5971_v56, 2 }
0x10b3   :  { %3051 = vmatpush1.bf16.msra.mxu0 %v5663_v25  ;;  %3092 = vmatpush1.bf16.msra.mxu1 %v5665_v26 }
0x10b4   :  { %3052 = vmatprep.subr.bf16.mxu0 %v5669_v14  ;;  %3093 = vmatprep.subr.bf16.mxu1 %v5671_v27 }
0x10b7   :  { %3053 = vmatpush1.bf16.msra.mxu0 %v5675_v28  ;;  %3094 = vmatpush1.bf16.msra.mxu1 %v5677_v31 }
0x10b8   :  { %3054 = vmatprep.subr.bf16.mxu0 %v5681_v46  ;;  %3095 = vmatprep.subr.bf16.mxu1 %v5683_v53 }
0x10bb   :  { %3055 = vmatpush1.bf16.msra.mxu0 %v5687_v45  ;;  %3096 = vmatpush1.bf16.msra.mxu1 %v5689_v47 }
0x10bc   :  { %3155 = vmatprep.subr.bf16.mxu0 %v4644_v6  ;;  %3196 = vmatprep.subr.bf16.mxu1 %v4645_v58  ;;  %v4666_v6 = vld [vmem:[#allocation2 + $0x140] ss:$16 sps:$4 sm:$0xff]   ;;  %v4667_v58 = vld [vmem:[#allocation2 + $0x148] ss:$16 sps:$4 sm:$0xff]  }
0x115e   :  { %v2959_v22 = vpop.f32.mrf.mxu0  ;;  %v3000_v12 = vpop.f32.mrf.mxu1 }
0x115f   :  { %v2960_v3 = vadd.f32 %v2959_v22, %v2917_v18  ;;  %v3001_v26 = vadd.f32 %v3000_v12, %v2919_v11  ;;  %v4668_v18 = vld [vmem:[#allocation2 + $0x124] ss:$16 sps:$4 sm:$0xff]   ;;  %v4669_v22 = vld [vmem:[#allocation2 + $0x12c] ss:$16 sps:$4 sm:$0xff]   ;;  %v4670_v12 = vld [vmem:[#allocation2 + $0x120] ss:$16 sps:$4 sm:$0xff]  }
0x1160   :  { %v2961_v63 = vpop.f32.mrf.mxu0  ;;  %v3002_v59 = vpop.f32.mrf.mxu1 }
0x1161   :  { %v3990_v2 = vmul.f32 -1.442695, %v2960_v3  ;;  %v2962_v0 = vadd.f32 %v2961_v63, %v2918_v17  ;;  %v3003_v5 = vadd.f32 %v3002_v59, %v2920_v60  ;;  %v4671_v3 = vld [vmem:[#allocation2 + $0x128] ss:$16 sps:$4 sm:$0xff]   ;;  %v4672_v17 = vld [vmem:[#allocation2 + $0x104] ss:$16 sps:$4 sm:$0xff]  }
0x1162   :  { %v2963_v13 = vpop.f32.mrf.mxu0  ;;  %v3004_v62 = vpop.f32.mrf.mxu1  ;;  %v4673_v63 = vld [vmem:[#allocation2 + $0x10c] ss:$16 sps:$4 sm:$0xff]   ;;  %v4674_v59 = vld [vmem:[#allocation2 + $0x100] ss:$16 sps:$4 sm:$0xff]  }
0x1163   :  { %4596 = vpow2.f32 %v3990_v2  ;;  %v3991_v10 = vmul.f32 -1.442695, %v2962_v0  ;;  %v3992_v4 = vmul.f32 -1.442695, %v3003_v5  ;;  %v4675_v2 = vld [vmem:[#allocation2 + $0x108] ss:$16 sps:$4 sm:$0xff]  }
0x1164   :  { %v2964_v50 = vpop.f32.mrf.mxu0  ;;  %v3005_v15 = vpop.f32.mrf.mxu1  ;;  %v6194_v0 = vmov 0.0   ;;  %v3032_v13 = vrot.slane %v5950_v41, 4 }
0x1165   :  { %4598 = vpow2.f32 %v3991_v10  ;;  %v3033_v15 = vrot.slane %v5957_v55, 4 }
0x1166   :  { %4600 = vpow2.f32 %v3992_v4 }
0x1170   :  { %v4597_v25 = vpop.eup %4596 }
0x1171   :  { %v3010_v14 = vadd.f32 1.0, %v4597_v25 }
0x1172   :  { %v4599_v27 = vpop.eup %4598 }
0x1173   :  { %4602 = vrcp.f32 %v3010_v14  ;;  %v3016_v28 = vadd.f32 1.0, %v4599_v27  ;;  %v4601_v31 = vpop.eup %4600 }
0x1174   :  { %4604 = vtanh.f32 %v3001_v26  ;;  %v3023_v47 = vadd.f32 1.0, %v4601_v31  ;;  %v3035_v31 = vrot.slane %v5964_v16, 4 }
0x1175   :  { %4606 = vrcp.f32 %v3016_v28 }
0x1176   :  { %4608 = vrcp.f32 %v3023_v47 }
0x1180   :  { %v4603_v46 = vpop.eup %4602 }
0x1181   :  { %v4605_v53 = vpop.eup %4604 }
0x1182   :  { %v4607_v45 = vpop.eup %4606  ;;  %v3027_v7 = vmul.f32 %v4605_v53, %v4603_v46  ;;  %v3034_v53 = vrot.slane %v5971_v56, 4 }
0x1183   :  { %v3026_v8 = vmul.f32 %v4607_v45, %v5975_v36  ;;  %v4609_v34 = vpop.eup %4608  ;;  %v4662_v36 = vld [vmem:[#allocation2 + $0x160] ss:$16 sps:$4 sm:$0xff]  }
0x1185   :  { %v6019_v52 = vadd.f32 %v3027_v7, %v3026_v8 }
0x1187   :  { %4610 = vtanh.f32 %v6019_v52 }
0x1194   :  { %v4611_v21 = vpop.eup %4610 }
0x1195   :  { %v6022_v42 = vmul.f32 %v4611_v21, %v4609_v34 }
0x1197   :  { %v3031_v32 = vpack.c.bf16 %v6022_v42, %v6022_v42 }
0x1199   :  { %3073 = vmatmul.mubr.bf16.vlgmr.msra.gmra.mxu0 %v3031_v32  ;;  %3114 = vmatmul.mubr.bf16.vlgmr.msra.gmra.mxu1 %v3031_v32 }
0x119a   :  { %3156 = vmatpush1.bf16.msra.mxu0 %v4646_v24  ;;  %3197 = vmatpush1.bf16.msra.mxu1 %v4647_v48 }
0x119b   :  { %3157 = vmatprep.subr.bf16.mxu0 %v4648_v51  ;;  %3198 = vmatprep.subr.bf16.mxu1 %v4649_v49 }
0x119c   :  { %3187 = vmatprep.mubr.bf16.mxu0 %v6169_v9  ;;  %3228 = vmatprep.mubr.bf16.mxu1 %v6169_v9  ;;  %v4660_v9 = vld [vmem:[#allocation2 + $0x164] ss:$16 sps:$4 sm:$0xff]  }
0x119e   :  { %3158 = vmatpush1.bf16.msra.mxu0 %v4650_v19  ;;  %3199 = vmatpush1.bf16.msra.mxu1 %v4651_v37 }
0x119f   :  { %3159 = vmatprep.subr.bf16.mxu0 %v4652_v29  ;;  %3200 = vmatprep.subr.bf16.mxu1 %v4653_v38 }
0x11a2   :  { %3160 = vmatpush1.bf16.msra.mxu0 %v4654_v54  ;;  %3201 = vmatpush1.bf16.msra.mxu1 %v4655_v35  ;;  %v3271_v35 = vrot.slane %v6022_v42, 6  ;;  %v3148_v42 = vrot.slane %v5957_v55, 6 }
0x11a3   :  { %3161 = vmatprep.subr.bf16.mxu0 %v4656_v44  ;;  %3202 = vmatprep.subr.bf16.mxu1 %v4657_v39 }
0x11a6   :  { %3162 = vmatpush1.bf16.msra.mxu0 %v4658_v20  ;;  %3203 = vmatpush1.bf16.msra.mxu1 %v4659_v57  ;;  %v3282_v57 = vsel %vm1702_vm7, %v5978_v33, %v3271_v35 }
0x11a7   :  { %3163 = vmatprep.subr.bf16.mxu0 %v4660_v9  ;;  %3204 = vmatprep.subr.bf16.mxu1 %v4661_v43 }
0x11aa   :  { %3164 = vmatpush1.bf16.msra.mxu0 %v4662_v36  ;;  %3205 = vmatpush1.bf16.msra.mxu1 %v4663_v30 }
0x11ab   :  { %3165 = vmatprep.subr.bf16.mxu0 %v4664_v40  ;;  %3206 = vmatprep.subr.bf16.mxu1 %v4665_v23 }
0x11ae   :  { %3166 = vmatpush1.bf16.msra.mxu0 %v4666_v6  ;;  %3207 = vmatpush1.bf16.msra.mxu1 %v4667_v58 }
0x11af   :  { %3167 = vmatprep.subr.bf16.mxu0 %v4668_v18  ;;  %3208 = vmatprep.subr.bf16.mxu1 %v4669_v22 }
0x11b2   :  { %3168 = vmatpush1.bf16.msra.mxu0 %v4670_v12  ;;  %3209 = vmatpush1.bf16.msra.mxu1 %v4671_v3 }
0x11b3   :  { %3169 = vmatprep.subr.bf16.mxu0 %v4672_v17  ;;  %3210 = vmatprep.subr.bf16.mxu1 %v4673_v63  ;;  %v3150_v17 = vrot.slane %v5964_v16, 6 }
0x11b6   :  { %3170 = vmatpush1.bf16.msra.mxu0 %v4674_v59  ;;  %3211 = vmatpush1.bf16.msra.mxu1 %v4675_v2 }
0x11b7   :  { %4085 = vmatprep.subr.bf16.mxu0 %v6194_v0 }
0x1259   :  { %v3074_v62 = vpop.f32.mrf.mxu0  ;;  %v3115_v10 = vpop.f32.mrf.mxu1 }
0x125a   :  { %v3075_v50 = vadd.f32 %v3074_v62, %v3032_v13  ;;  %v3116_v7 = vadd.f32 %v3115_v10, %v3034_v53 }
0x125b   :  { %v3076_v60 = vpop.f32.mrf.mxu0  ;;  %v3117_v5 = vpop.f32.mrf.mxu1 }
0x125c   :  { %v3993_v11 = vmul.f32 -1.442695, %v3075_v50  ;;  %v3077_v4 = vadd.f32 %v3076_v60, %v3033_v15  ;;  %v3118_v46 = vadd.f32 %v3117_v5, %v3035_v31 }
0x125d   :  { %v3078_v25 = vpop.f32.mrf.mxu0  ;;  %v3119_v26 = vpop.f32.mrf.mxu1 }
0x125e   :  { %4612 = vpow2.f32 %v3993_v11  ;;  %v3994_v14 = vmul.f32 -1.442695, %v3077_v4  ;;  %v3995_v45 = vmul.f32 -1.442695, %v3118_v46  ;;  %v6195_v46 = vld [vmem:[#allocation31_spill] sm:$0xff] }
0x125f   :  { %v3079_v27 = vpop.f32.mrf.mxu0  ;;  %v3120_v28 = vpop.f32.mrf.mxu1 }
0x1260   :  { %4614 = vpow2.f32 %v3994_v14 }
0x1261   :  { %4616 = vpow2.f32 %v3995_v45 }
0x126b   :  { %v4613_v47 = vpop.eup %4612 }
0x126c   :  { %v3125_v8 = vadd.f32 1.0, %v4613_v47 }
0x126d   :  { %v4615_v34 = vpop.eup %4614 }
0x126e   :  { %4618 = vrcp.f32 %v3125_v8  ;;  %v3131_v21 = vadd.f32 1.0, %v4615_v34  ;;  %v4617_v32 = vpop.eup %4616 }
0x126f   :  { %4620 = vtanh.f32 %v3116_v7  ;;  %v3138_v49 = vadd.f32 1.0, %v4617_v32 }
0x1270   :  { %4622 = vrcp.f32 %v3131_v21 }
0x1271   :  { %4624 = vrcp.f32 %v3138_v49 }
0x127b   :  { %v4619_v24 = vpop.eup %4618 }
0x127c   :  { %v4621_v48 = vpop.eup %4620 }
0x127d   :  { %v4623_v51 = vpop.eup %4622  ;;  %v3142_v19 = vmul.f32 %v4621_v48, %v4619_v24 }
0x127e   :  { %v3141_v37 = vmul.f32 %v4623_v51, %v6019_v52  ;;  %v4625_v38 = vpop.eup %4624  ;;  %v3147_v52 = vrot.slane %v5950_v41, 6  ;;  %v3149_v41 = vrot.slane %v5971_v56, 6 }
0x1280   :  { %v3143_v29 = vadd.f32 %v3142_v19, %v3141_v37 }
0x1282   :  { %4626 = vtanh.f32 %v3143_v29 }
0x128f   :  { %v4627_v54 = vpop.eup %4626 }
0x1290   :  { %v3145_v44 = vmul.f32 %v4627_v54, %v4625_v38 }
0x1292   :  { %v3146_v39 = vpack.c.bf16 %v3145_v44, %v3145_v44  ;;  %v3274_v20 = vrot.slane %v3145_v44, 4 }
0x1294   :  { %3188 = vmatmul.mubr.bf16.vlgmr.msra.gmra.mxu0 %v3146_v39  ;;  %3229 = vmatmul.mubr.bf16.vlgmr.msra.gmra.mxu1 %v3146_v39  ;;  %v3283_v9 = vsel %vm1704_vm8, %v3282_v57, %v3274_v20 }
0x1295   :  { %4087 = vmatprep.mubr.msk.bf16.mxu0 %vm4889_vm0, %v6194_v0 }
0x1354   :  { %v3189_v43 = vpop.f32.mrf.mxu0  ;;  %v3230_v36 = vpop.f32.mrf.mxu1 }
0x1355   :  { %v3190_v30 = vadd.f32 %v3189_v43, %v3147_v52  ;;  %v3231_v13 = vadd.f32 %v3230_v36, %v3149_v41 }
0x1356   :  { %v3191_v40 = vpop.f32.mrf.mxu0  ;;  %v3232_v23 = vpop.f32.mrf.mxu1 }
0x1357   :  { %v3996_v6 = vmul.f32 -1.442695, %v3190_v30  ;;  %v3192_v58 = vadd.f32 %v3191_v40, %v3148_v42  ;;  %v3233_v63 = vadd.f32 %v3232_v23, %v3150_v17 }
0x1358   :  { %v3193_v18 = vpop.f32.mrf.mxu0  ;;  %v3234_v33 = vpop.f32.mrf.mxu1 }
0x1359   :  { %4628 = vpow2.f32 %v3996_v6  ;;  %v3997_v22 = vmul.f32 -1.442695, %v3192_v58  ;;  %v3998_v59 = vmul.f32 -1.442695, %v3233_v63 }
0x135a   :  { %v3194_v12 = vpop.f32.mrf.mxu0  ;;  %v3235_v3 = vpop.f32.mrf.mxu1 }
0x135b   :  { %4630 = vpow2.f32 %v3997_v22 }
0x135c   :  { %4632 = vpow2.f32 %v3998_v59 }
0x1366   :  { %v4629_v2 = vpop.eup %4628 }
0x1367   :  { %v3240_v55 = vadd.f32 1.0, %v4629_v2 }
0x1368   :  { %v4631_v62 = vpop.eup %4630 }
0x1369   :  { %4634 = vrcp.f32 %v3240_v55  ;;  %v3246_v10 = vadd.f32 1.0, %v4631_v62  ;;  %v4633_v50 = vpop.eup %4632 }
0x136a   :  { %4636 = vtanh.f32 %v3231_v13  ;;  %v3253_v11 = vadd.f32 1.0, %v4633_v50 }
0x136b   :  { %4638 = vrcp.f32 %v3246_v10 }
0x136c   :  { %4640 = vrcp.f32 %v3253_v11 }
0x1376   :  { %v4635_v15 = vpop.eup %4634 }
0x1377   :  { %v4637_v60 = vpop.eup %4636 }
0x1378   :  { %v4639_v5 = vpop.eup %4638  ;;  %v3257_v4 = vmul.f32 %v4637_v60, %v4635_v15 }
0x1379   :  { %v3256_v16 = vmul.f32 %v4639_v5, %v3143_v29  ;;  %v4641_v56 = vpop.eup %4640 }
0x137b   :  { %v3258_v25 = vadd.f32 %v3257_v4, %v3256_v16 }
0x137d   :  { %4642 = vtanh.f32 %v3258_v25 }
0x138a   :  { %v4643_v26 = vpop.eup %4642 }
0x138b   :  { %v3260_v14 = vmul.f32 %v4643_v26, %v4641_v56 }
0x138d   :  { %v3277_v27 = vrot.slane %v3260_v14, 2 }
0x138f   :  { %v3284_v28 = vsel %vm1706_vm9, %v3283_v9, %v3277_v27 }
0x1390   :  { %v3285_v31 = vpack.c.bf16 %v3284_v28, %v5910_v1 }
0x1392   :  { %4086 = vmatpush3.bf16.msra.mxu0 %v3285_v31 }
0x1395   :  { %4088 = vmatmul.mubr.msk.bf16.vlgmr.msra.gmra.mxu0 %vm204_vm1, %v6195_v46 }
0x1455   :  { %v3320_v53 = vpop.f32.mrf.mxu0 }
0x1456   :  { %v6051_v45 = vsel %vm193_vm4, %v5910_v1, %v3320_v53 }
0x1457   :  { %v4089_v47 = vpop.f32.mrf.mxu0 }
0x1459   :  { %v3323_v7 = vpop.f32.mrf.mxu0 }
0x145a   :  { %v6055_v8 = vsel %vm193_vm4, %v3284_v28, %v3323_v7 }
0x145b   :  { %v4090_v34 = vpop.f32.mrf.mxu0 }
0x145c   :  { %4874 = dma.done.wait [#allocation4 + $0x1], 3968 }
0x145d   :  { %4875 = vsyncadd [#allocation4 + $0x1], 4294963328  ;;  %4091 = vmatprep.subr.bf16.mxu1 %v6194_v0  ;;  %4111 = vmatprep.subr.bf16.mxu0 %v6194_v0  ;;  %v4676_v1 = vld [vmem:[#allocation3 + $0x38] sm:$0xff]   ;;  %v4678_v32 = vld [vmem:[#allocation3 + $0x30] sm:$0xff]   ;;  %v3488_v20 = vpack.c.bf16 %v6055_v8, %v6051_v45 }
0x145e   :  { %4107 = vmatprep.mubr.msk.bf16.mxu1 %vm4889_vm0, %v6194_v0  ;;  %4127 = vmatprep.mubr.msk.bf16.mxu0 %vm4889_vm0, %v6194_v0  ;;  %v4677_v21 = vld [vmem:[#allocation3 + $0x78] sm:$0xff]   ;;  %v4679_v61 = vld [vmem:[#allocation3 + $0x70] sm:$0xff]   ;;  %v4680_v24 = vld [vmem:[#allocation3 + $0x28] sm:$0xff]  }
0x145f   :  { %4092 = vmatpush3.bf16.msra.mxu1 %v4676_v1  ;;  %4112 = vmatpush3.bf16.msra.mxu0 %v4677_v21  ;;  %v4681_v48 = vld [vmem:[#allocation3 + $0x68] sm:$0xff]   ;;  %v4682_v51 = vld [vmem:[#allocation3 + $0x20] sm:$0xff]   ;;  %v4684_v19 = vld [vmem:[#allocation3 + $0x18] sm:$0xff]  }
0x1460   :  { %4093 = vmatprep.subr.bf16.mxu1 %v6194_v0  ;;  %4113 = vmatprep.subr.bf16.mxu0 %v6194_v0  ;;  %v4683_v49 = vld [vmem:[#allocation3 + $0x60] sm:$0xff]   ;;  %v4685_v37 = vld [vmem:[#allocation3 + $0x58] sm:$0xff]   ;;  %v4686_v29 = vld [vmem:[#allocation3 + $0x10] sm:$0xff]  }
0x1461   :  { %v4687_v38 = vld [vmem:[#allocation3 + $0x50] sm:$0xff]   ;;  %v4688_v54 = vld [vmem:[#allocation3 + $0x8] sm:$0xff]   ;;  %v4690_v44 = vld [vmem:[#allocation3] sm:$0xff]  }
0x1462   :  { %v4689_v35 = vld [vmem:[#allocation3 + $0x48] sm:$0xff]   ;;  %v4691_v39 = vld [vmem:[#allocation3 + $0x40] sm:$0xff]   ;;  %v4696_v9 = vld [vmem:[#allocation3 + $0xd8] sm:$0xff]  }
0x1463   :  { %4094 = vmatpush3.bf16.msra.mxu1 %v4678_v32  ;;  %4114 = vmatpush3.bf16.msra.mxu0 %v4679_v61  ;;  %v6196_v57 = vld [vmem:[#allocation37_spill] sm:$0xff]  ;;  %v3389_v36 = vld [vmem:[#allocation3 + $0xe0] sm:$0x1]  ;;  %v3390_v30 = vld [vmem:[#allocation3 + $0xe8] sm:$0x1] }
0x1464   :  { %4095 = vmatprep.subr.bf16.mxu1 %v6194_v0  ;;  %4115 = vmatprep.subr.bf16.mxu0 %v6194_v0  ;;  %v4698_v52 = vld [vmem:[#allocation3 + $0xd0] sm:$0xff]   ;;  %v4700_v43 = vld [vmem:[#allocation3 + $0xc8] sm:$0xff]   ;;  %v3392_v42 = vunpack.c.l.bf16 %v3389_v36  ;;  %v3489_v40 = vunpack.c.l.bf16 %v3390_v30  ;;  %v6201_v28 = vld [vmem:[#allocation27_spill] sm:$0xff] }
0x1465   :  { %v6197_v23 = vld [vmem:[#allocation30_spill] sm:$0xff]  ;;  %v6198_v17 = vld [vmem:[#allocation36_spill] sm:$0xff]  ;;  %v6202_v21 = vld [vmem:[#allocation29_spill] sm:$0xff] }
0x1466   :  { %v3396_v6 = vrot.slane %v3392_v42, %v6197_v23  ;;  %v3493_v58 = vrot.slane %v3489_v40, %v6197_v23  ;;  %v3585_v63 = vadd.f32 %v6051_v45, %v6198_v17  ;;  %v6199_v55 = vld [vmem:[#allocation34_spill] sm:$0xff]  ;;  %v6200_v27 = vld [vmem:[#allocation28_spill] sm:$0xff] }
0x1467   :  { %4096 = vmatpush3.bf16.msra.mxu1 %v4680_v24  ;;  %4116 = vmatpush3.bf16.msra.mxu0 %v4681_v48  ;;  %v3586_v62 = vadd.f32 %v6055_v8, %v6199_v55  ;;  %v4016_v31 = vcombine.low %v6201_v28, %v6200_v27  ;;  %v4692_v46 = vld [vmem:[#allocation3 + $0xb8] sm:$0xff]   ;;  %v4693_v53 = vld [vmem:[#allocation3 + $0xb0] sm:$0xff]   ;;  %v4694_v45 = vld [vmem:[#allocation3 + $0xa8] sm:$0xff]  }
0x1468   :  { %4097 = vmatprep.subr.bf16.mxu1 %v6194_v0  ;;  %4117 = vmatprep.subr.bf16.mxu0 %v6194_v0  ;;  %v4695_v47 = vld [vmem:[#allocation3 + $0xa0] sm:$0xff]   ;;  %v4697_v7 = vld [vmem:[#allocation3 + $0x98] sm:$0xff]   ;;  %v4699_v8 = vld [vmem:[#allocation3 + $0x90] sm:$0xff]  }
0x1469   :  { %v4702_v34 = vld [vmem:[#allocation3 + $0xc0] sm:$0xff]   ;;  %v4701_v1 = vld [vmem:[#allocation3 + $0x88] sm:$0xff]  }
0x146a   :  { %v4703_v32 = vld [vmem:[#allocation3 + $0x80] sm:$0xff]  }
0x146b   :  { %4098 = vmatpush3.bf16.msra.mxu1 %v4682_v51  ;;  %4118 = vmatpush3.bf16.msra.mxu0 %v4683_v49 }
0x146c   :  { %4099 = vmatprep.subr.bf16.mxu1 %v6194_v0  ;;  %4119 = vmatprep.subr.bf16.mxu0 %v6194_v0 }
0x146f   :  { %4100 = vmatpush3.bf16.msra.mxu1 %v4684_v19  ;;  %4120 = vmatpush3.bf16.msra.mxu0 %v4685_v37 }
0x1470   :  { %4101 = vmatprep.subr.bf16.mxu1 %v6194_v0  ;;  %4121 = vmatprep.subr.bf16.mxu0 %v6194_v0 }
0x1473   :  { %4102 = vmatpush3.bf16.msra.mxu1 %v4686_v29  ;;  %4122 = vmatpush3.bf16.msra.mxu0 %v4687_v38 }
0x1474   :  { %4103 = vmatprep.subr.bf16.mxu1 %v6194_v0  ;;  %4123 = vmatprep.subr.bf16.mxu0 %v6194_v0 }
0x1477   :  { %4104 = vmatpush3.bf16.msra.mxu1 %v4688_v54  ;;  %4124 = vmatpush3.bf16.msra.mxu0 %v4689_v35  ;;  %v3391_v54 = vld [vmem:[#allocation3 + $0xf0] sm:$0x1] }
0x1478   :  { %4105 = vmatprep.subr.bf16.mxu1 %v6194_v0  ;;  %4125 = vmatprep.subr.bf16.mxu0 %v6194_v0  ;;  %v3799_v35 = vunpack.c.l.bf16 %v3391_v54 }
0x147b   :  { %4106 = vmatpush3.bf16.msra.mxu1 %v4690_v44  ;;  %4126 = vmatpush3.bf16.msra.mxu0 %v4691_v39  ;;  %v3803_v44 = vrot.slane %v3799_v35, %v6197_v23 }
0x147c   :  { %4131 = vmatprep.subr.bf16.mxu1 %v6194_v0  ;;  %4137 = vmatprep.subr.bf16.mxu0 %v6194_v0 }
0x147e   :  { %4108 = vmatmul.mubr.bf16.vlgmr.msra.gmra.mxu1 %v6196_v57  ;;  %4128 = vmatmul.mubr.bf16.vlgmr.msra.gmra.mxu0 %v3488_v20 }
0x147f   :  { %4133 = vmatprep.mubr.msk.bf16.mxu1 %vm4889_vm0, %v6194_v0  ;;  %4145 = vmatprep.mubr.msk.bf16.mxu0 %vm4889_vm0, %v6194_v0 }
0x1480   :  { %4138 = vmatpush3.bf16.msra.mxu0 %v4696_v9 }
0x1481   :  { %4139 = vmatprep.subr.bf16.mxu0 %v6194_v0 }
0x1484   :  { %4140 = vmatpush3.bf16.msra.mxu0 %v4698_v52 }
0x1485   :  { %4141 = vmatprep.subr.bf16.mxu0 %v6194_v0 }
0x1488   :  { %4142 = vmatpush3.bf16.msra.mxu0 %v4700_v43 }
0x1489   :  { %4143 = vmatprep.subr.bf16.mxu0 %v6194_v0 }
0x148c   :  { %4144 = vmatpush3.bf16.msra.mxu0 %v4702_v34 }
0x148f   :  { %4146 = vmatmul.mubr.msk.bf16.vlgmr.msra.gmra.mxu0 %vm417_vm2, %v6202_v21 }
0x153e   :  { %v3479_v18 = vpop.f32.mrf.mxu1  ;;  %v3576_v22 = vpop.f32.mrf.mxu0 }
0x153f   :  { %v3480_v33 = vadd.f32 %v3479_v18, %v3396_v6  ;;  %v3577_v41 = vadd.f32 %v3576_v22, %v3493_v58 }
0x1540   :  { %v4109_v12 = vpop.f32.mrf.mxu1  ;;  %v4129_v59 = vpop.f32.mrf.mxu0 }
0x1541   :  { %v3486_v3 = vmax.f32 %v3480_v33, 0.0  ;;  %v3583_v5 = vmax.f32 %v3577_v41, 0.0 }
0x1542   :  { %v3482_v2 = vpop.f32.mrf.mxu1  ;;  %v3579_v10 = vpop.f32.mrf.mxu0 }
0x1543   :  { %v3483_v13 = vadd.f32 %v3482_v2, %v3396_v6  ;;  %v3580_v50 = vadd.f32 %v3579_v10, %v3493_v58  ;;  %v3587_v60 = vadd.f32 %v3585_v63, %v3486_v3 }
0x1544   :  { %v4110_v15 = vpop.f32.mrf.mxu1  ;;  %v4130_v4 = vpop.f32.mrf.mxu0 }
0x1545   :  { %v3487_v11 = vmax.f32 %v3483_v13, 0.0  ;;  %v3584_v25 = vmax.f32 %v3580_v50, 0.0  ;;  %v3589_v56 = vadd.f32 %v3587_v60, %v3583_v5 }
0x1547   :  { %v3588_v16 = vadd.f32 %v3586_v62, %v3487_v11 }
0x1549   :  { %v3590_v26 = vadd.f32 %v3588_v16, %v3584_v25 }
0x154b   :  { %v3591_v14 = vpack.c.bf16 %v3590_v26, %v3589_v56 }
0x154d   :  { %4132 = vmatpush3.bf16.msra.mxu1 %v3591_v14 }
0x154e   :  { %4149 = vmatprep.subr.bf16.mxu1 %v6194_v0 }
0x154f   :  { %v3703_v19 = vpop.f32.mrf.mxu0 }
0x1550   :  { %4134 = vmatmul.mubr.msk.bf16.vlgmr.msra.gmra.mxu1 %vm204_vm1, %v4016_v31 }
0x1551   :  { %4150 = vmatpush3.bf16.msra.mxu1 %v4692_v46  ;;  %4165 = vmatprep.mubr.msk.bf16.mxu1 %vm4889_vm0, %v6194_v0  ;;  %v4147_v37 = vpop.f32.mrf.mxu0 }
0x1552   :  { %4151 = vmatprep.subr.bf16.mxu1 %v6194_v0 }
0x1553   :  { %v3706_v29 = vpop.f32.mrf.mxu0 }
0x1555   :  { %4152 = vmatpush3.bf16.msra.mxu1 %v4693_v53  ;;  %v4148_v38 = vpop.f32.mrf.mxu0 }
0x1556   :  { %4153 = vmatprep.subr.bf16.mxu1 %v6194_v0 }
0x1559   :  { %4154 = vmatpush3.bf16.msra.mxu1 %v4694_v45 }
0x155a   :  { %4155 = vmatprep.subr.bf16.mxu1 %v6194_v0 }
0x155d   :  { %4156 = vmatpush3.bf16.msra.mxu1 %v4695_v47 }
0x155e   :  { %4157 = vmatprep.subr.bf16.mxu1 %v6194_v0 }
0x1561   :  { %4158 = vmatpush3.bf16.msra.mxu1 %v4697_v7 }
0x1562   :  { %4159 = vmatprep.subr.bf16.mxu1 %v6194_v0 }
0x1565   :  { %4160 = vmatpush3.bf16.msra.mxu1 %v4699_v8 }
0x1566   :  { %4161 = vmatprep.subr.bf16.mxu1 %v6194_v0 }
0x1569   :  { %4162 = vmatpush3.bf16.msra.mxu1 %v4701_v1 }
0x156a   :  { %4163 = vmatprep.subr.bf16.mxu1 %v6194_v0 }
0x156d   :  { %4164 = vmatpush3.bf16.msra.mxu1 %v4703_v32 }
0x1610   :  { %v3634_v61 = vpop.f32.mrf.mxu1 }
0x1612   :  { %v4135_v24 = vpop.f32.mrf.mxu1 }
0x1614   :  { %v3637_v48 = vpop.f32.mrf.mxu1 }
0x1615   :  { %v3641_v51 = vpack.c.bf16 %v3637_v48, %v3634_v61 }
0x1616   :  { %v4136_v49 = vpop.f32.mrf.mxu1 }
0x1617   :  { %4166 = vmatmul.mubr.bf16.vlgmr.msra.gmra.mxu1 %v3641_v51 }
0x16d7   :  { %v3792_v0 = vpop.f32.mrf.mxu1 }
0x16d8   :  { %v3793_v39 = vadd.f32 %v3792_v0, %v3703_v19 }
0x16d9   :  { %v4167_v20 = vpop.f32.mrf.mxu1 }
0x16da   :  { %v3804_v57 = vadd.f32 %v3803_v44, %v3793_v39 }
0x16db   :  { %v3795_v9 = vpop.f32.mrf.mxu1 }
0x16dc   :  { %3806 = vst [vmem:[%s6126_s9] sm:$0xff] %v3804_v57  ;;  %v3796_v52 = vadd.f32 %v3795_v9, %v3706_v29 }
0x16dd   :  { %v4168_v43 = vpop.f32.mrf.mxu1 }
0x16de   :  { %v3805_v36 = vadd.f32 %v3803_v44, %v3796_v52 }
0x16e0   :  { %3807 = vst [vmem:[%s6126_s9 + $0x8] sm:$0xff] %v3805_v36 }
0x16e1   :  { %3812 = vsyncpa [#allocation6], 1 }
0x16e2   :  { %3813 = vsyncpa [#allocation8], 1 }
0x16e3   :  { %3814 = vsyncpa [#allocation11], 1 }
0x16e4   :  { %3815 = vsyncpa [#allocation14], 1 }
0x16e5   :  { %3816 = vsyncmov [#allocation4] }
0x16e8   :  { %s3817_s10 = vpop.sfrf %3816 }
0x16e9   :  { %p4031_p12 = scmp.ne.s32.totalorder %s3817_s10, 0 }
0x16eb   :  { %3821 = shalt.err (%p4031_p12)  }
0x16ec   :  { %3823 = vsyncmov [#allocation4 + $0x1] }
0x16ef   :  { %s3824_s11 = vpop.sfrf %3823 }
0x16f0   :  { %p4032_p13 = scmp.ne.s32.totalorder %s3824_s11, 0 }
0x16f2   :  { %3828 = shalt.err (%p4032_p13)  }

</bundles_post_ra>
